<compile_context>
chip_gen: v6e
topology: v6e:2x2x1
jax: 0.10.0
libtpu: 0.0.40
codegen_flags: <defaults>
</compile_context>

<pallas_src>
import jax
import jax.numpy as jnp
from jax import lax
from jax.experimental import pallas as pl
from jax.experimental.pallas import tpu as pltpu

# ---- model hyper-parameters (small synthetic "game") -----------------------
FEATURE_DIM = 32                      # game.feature_dim()
EMB_CARD = 16                         # embedding cardinality
EMB_DIM = 64                          # embedding_dim (fixed at 64)
EMB_RANGES = ((0, 4), (4, 8))         # bag slices of embedding_features
NUM_BAGS = len(EMB_RANGES)
NUM_IDX = EMB_RANGES[-1][1]           # total embedding-index columns (8)
EMB_SIZE = EMB_DIM * NUM_BAGS         # 128
ACTION_DIM = 16                       # game.action_dim()
OUT_PAD = 128                         # lane-dense padded output width
NEG_SLOPE = 0.01                      # LeakyReLU default
NEG_INF = -1e30                       # finite "masked" value (avoids NaN)

# Batch tile: 128 works on every generation (v5e MXU is 4x128x128); bump to
# 256 on v6e/v7x if batches are large enough to fill the 256-row MXU.
TILE_B = 128


def _leaky(x):
    return jnp.where(x > 0, x, NEG_SLOPE * x)


def _round_up(n, m):
    return -(-n // m) * m


# ---- the Pallas kernel: full forward pass on one batch tile -----------------
def imitation_kernel(
    dense_ref, embidx_ref, mask_ref,          # batch-tiled data
    wd_ref, w1d_ref, ew1_ref,                 # folded weights (resident)
    w2_ref, w3_ref, w4_ref, bias_ref,
    out_ref,
):
    f32 = jnp.float32

    # Packed bias slab: row 0 = bd, 1 = B1, 2 = B2, 3 = B3, 4 = B4(padded)
    biases = bias_ref[...]
    bd = biases[0:1, 0:64]
    b1 = biases[1:2, :]
    b2 = biases[2:3, :]
    b3 = biases[3:4, 0:64]
    b4 = biases[4:5, :]

    # GameStateTrunk.dense: Linear -> LeakyReLU (BN folded into W1D/B1)
    x = dense_ref[...]
    h = _leaky(jnp.dot(x, wd_ref[...], preferred_element_type=f32) + bd)

    # Trunk layer 1: dense branch + embedding bags (table folded into EW1).
    t = jnp.dot(h, w1d_ref[...], preferred_element_type=f32) + b1

    # Both mean-bags as one scaled-count matrix -> a single MXU matmul.
    idx = embidx_ref[...]                                   # [Bt, NUM_IDX] i32
    tile = idx.shape[0]
    cid = lax.broadcasted_iota(jnp.int32, (tile, NUM_BAGS * EMB_CARD), 1)
    counts_all = jnp.zeros((tile, NUM_BAGS * EMB_CARD), f32)
    for k, (lo, hi) in enumerate(EMB_RANGES):               # static unroll
        off = k * EMB_CARD
        counts_k = jnp.zeros((tile, NUM_BAGS * EMB_CARD), f32)
        nz = jnp.zeros((tile, 1), f32)
        for j in range(lo, hi):                             # static unroll
            col = idx[:, j:j + 1]
            # idx values < EMB_CARD, so this only matches bag k's columns.
            counts_k = counts_k + (col == (cid - off)).astype(f32)
            nz = nz + (col != 0).astype(f32)
        counts_all = counts_all + counts_k * (1.0 / jnp.maximum(nz, 1.0))
    # padding index 0 contributes nothing: EW1 rows {0, EMB_CARD} are zero
    t = t + jnp.dot(counts_all, ew1_ref[...], preferred_element_type=f32)
    t = _leaky(t)

    # Trunk layer 2 (BN folded), Dropout(0.1) eval == identity
    t = _leaky(jnp.dot(t, w2_ref[...], preferred_element_type=f32) + b2)

    # Head: Linear(128,64) -> LeakyReLU (BN folded), Dropout identity,
    # Linear(64, ACTION_DIM) padded to 128 output lanes (lane-dense store).
    u = _leaky(jnp.dot(t, w3_ref[...], preferred_element_type=f32) + b3)
    logits = jnp.dot(u, w4_ref[...], preferred_element_type=f32) + b4

    # mask (padded lanes are 0 -> NEG_INF -> exp underflows to 0)
    mask = mask_ref[...]
    logits = jnp.where(mask != 0, logits, NEG_INF)
    m = jnp.max(logits, axis=1, keepdims=True)
    p = jnp.exp(logits - m)
    out_ref[...] = p * (1.0 / jnp.sum(p, axis=1, keepdims=True))


# ---- wrapper ----------------------------------------------------------------
def imitation_forward(dense, embidx, mask, kparams):
    B = dense.shape[0]
    tile = TILE_B if B >= TILE_B else max(8, _round_up(B, 8))
    Bp = _round_up(B, tile)
    pad = Bp - B

    dense_p = jnp.pad(dense, ((0, pad), (0, 0)))
    embidx_p = jnp.pad(embidx, ((0, pad), (0, 0)))
    mask_p = jnp.pad(mask, ((0, pad), (0, OUT_PAD - mask.shape[1])))

    wd, w1d, ew1, w2, w3, w4, biases = kparams
    weights = (wd, w1d, ew1, w2, w3, w4, biases)

    data_specs = [
        pl.BlockSpec((tile, FEATURE_DIM), lambda i: (i, 0)),
        pl.BlockSpec((tile, NUM_IDX), lambda i: (i, 0)),
        pl.BlockSpec((tile, OUT_PAD), lambda i: (i, 0)),
    ]
    # Weights: same block every grid step -> DMA'd once, stay resident in VMEM.
    weight_specs = [pl.BlockSpec(w.shape, lambda i: (0, 0)) for w in weights]

    out = pl.pallas_call(
        imitation_kernel,
        out_shape=jax.ShapeDtypeStruct((Bp, OUT_PAD), jnp.float32),
        grid_spec=pltpu.PrefetchScalarGridSpec(
            num_scalar_prefetch=0,
            grid=(Bp // tile,),
            in_specs=data_specs + weight_specs,
            out_specs=pl.BlockSpec((tile, OUT_PAD), lambda i: (i, 0)),
        ),
        compiler_params=pltpu.CompilerParams(
            dimension_semantics=("parallel",)),
    )(dense_p, embidx_p, mask_p, *weights)

    return out[:B, :ACTION_DIM]


# ---- deterministic synthetic parameters (raw, PyTorch-equivalent) -----------
def init_params(key):
    ks = jax.random.split(key, 15)

    def w(k, shape, scale=0.1):
        return jax.random.normal(k, shape, jnp.float32) * scale

    def bn(k, n):
        k1, k2, k3, k4 = jax.random.split(k, 4)
        gamma = 1.0 + 0.1 * jax.random.normal(k1, (1, n), jnp.float32)
        beta = 0.1 * jax.random.normal(k2, (1, n), jnp.float32)
        mean = 0.1 * jax.random.normal(k3, (1, n), jnp.float32)
        var = jnp.abs(jax.random.normal(k4, (1, n), jnp.float32)) + 1.0
        scale = gamma / jnp.sqrt(var + 1e-5)
        shift = beta - mean * scale
        return scale, shift

    wd = w(ks[0], (FEATURE_DIM, 64)); bd = w(ks[1], (1, 64))
    sd, hd = bn(ks[2], 64)
    emb = w(ks[3], (EMB_CARD, EMB_DIM)).at[0].set(0.0)   # padding_idx=0 row
    w1 = w(ks[4], (64 + EMB_SIZE, 128)); b1 = w(ks[5], (1, 128))
    s1, h1 = bn(ks[6], 128)
    w2 = w(ks[7], (128, 128)); b2 = w(ks[8], (1, 128))
    s2, h2 = bn(ks[9], 128)
    w3 = w(ks[10], (128, 64)); b3 = w(ks[11], (1, 64))
    s3, h3 = bn(ks[12], 64)
    w4 = w(ks[13], (64, ACTION_DIM)); b4 = w(ks[14], (1, ACTION_DIM))
    return (wd, bd, sd, hd, emb, w1, b1, s1, h1,
            w2, b2, s2, h2, w3, b3, s3, h3, w4, b4)


# ---- constant folding (BN + embedding table + bias packing) ------------------
def fold_params(raw):
    (wd, bd, sd, hd, emb, w1, b1, s1, h1,
     w2, b2, s2, h2, w3, b3, s3, h3, w4, b4) = raw

    # BN after layer L folds into layer L+1: (a*s + h) @ W = a @ (W*s^T) + h@W
    w1_dense = w1[0:64, :]
    W1D = w1_dense * sd.reshape(64, 1)
    B1 = b1 + hd @ w1_dense

    # Embedding table folded into the bag slices of W1 (row 0 stays zero).
    ew1 = jnp.concatenate(
        [emb @ w1[64 + k * EMB_DIM: 64 + (k + 1) * EMB_DIM, :]
         for k in range(NUM_BAGS)], axis=0)                  # [2*CARD, 128]

    W2 = w2 * s1.reshape(128, 1); B2 = b2 + h1 @ w2
    W3 = w3 * s2.reshape(128, 1); B3 = b3 + h2 @ w3
    W4 = w4 * s3.reshape(64, 1);  B4 = b4 + h3 @ w4

    # Lane-dense padding of the final layer to 128 output lanes.
    W4p = jnp.zeros((64, OUT_PAD), jnp.float32).at[:, :ACTION_DIM].set(W4)
    B4p = jnp.zeros((1, OUT_PAD), jnp.float32).at[:, :ACTION_DIM].set(B4)

    # Pack all biases into one [8, 128] slab (single DMA).
    biases = jnp.zeros((8, OUT_PAD), jnp.float32)
    biases = biases.at[0, :64].set(bd[0])
    biases = biases.at[1, :].set(B1[0])
    biases = biases.at[2, :].set(B2[0])
    biases = biases.at[3, :64].set(B3[0])
    biases = biases.at[4, :].set(B4p[0])

    return (wd, W1D, ew1, W2, W3, W4p, biases)


# ---- pure-JAX reference (original, unfolded math) ----------------------------
def reference_forward(dense, embidx, mask, raw):
    (wd, bd, sd, hd, emb, w1, b1, s1, h1,
     w2, b2, s2, h2, w3, b3, s3, h3, w4, b4) = raw
    h = _leaky(dense @ wd + bd) * sd + hd
    parts = [h]
    for (lo, hi) in EMB_RANGES:
        sub = embidx[:, lo:hi]
        oh = jax.nn.one_hot(sub, EMB_CARD, dtype=jnp.float32)
        counts = oh.sum(axis=1)
        counts = counts.at[:, 0].set(0.0)
        bag_sum = counts @ emb
        n = counts.sum(axis=1, keepdims=True)
        parts.append(bag_sum / jnp.maximum(n, 1.0))
    cat = jnp.concatenate(parts, axis=1)
    t = _leaky(cat @ w1 + b1) * s1 + h1
    t = _leaky(t @ w2 + b2) * s2 + h2
    u = _leaky(t @ w3 + b3) * s3 + h3
    logits = u @ w4 + b4
    logits = jnp.where(mask != 0, logits, NEG_INF)
    return jax.nn.softmax(logits, axis=1)


if __name__ == "__main__":
    key = jax.random.PRNGKey(0)
    kp, kd, ke, km = jax.random.split(key, 4)
    raw = init_params(kp)
    kparams = fold_params(raw)

    # Non-multiple of the batch tile to exercise the padded multi-step grid.
    B = 200
    dense = jax.random.normal(kd, (B, FEATURE_DIM), jnp.float32)
    embidx = jax.random.randint(ke, (B, NUM_IDX), 0, EMB_CARD, dtype=jnp.int32)
    mask = (jax.random.uniform(km, (B, ACTION_DIM)) > 0.3).astype(jnp.int32)
    mask = mask.at[:, 0].set(1)   # keep at least one possible action per row

    out = imitation_forward(dense, embidx, mask, kparams)
    out = jax.block_until_ready(out)

    ref = reference_forward(dense, embidx, mask, raw)
    assert out.shape == (B, ACTION_DIM)
    assert bool(jnp.all(jnp.isfinite(out)))
    assert bool(jnp.allclose(jnp.sum(out, axis=1), 1.0, atol=1e-4))
    assert bool(jnp.allclose(out, ref, rtol=1e-2, atol=1e-3))
    print("KERNEL_OK")
</pallas_src>

<mosaic_0001>
module attributes {stable_mosaic.version = 11 : i64} {
  func.func @imitation_kernel(%arg0: i32, %arg1: memref<128x32xf32, #tpu.memory_space<vmem>>, %arg2: memref<128x8xi32, #tpu.memory_space<vmem>>, %arg3: memref<128x128xi32, #tpu.memory_space<vmem>>, %arg4: memref<32x64xf32, #tpu.memory_space<vmem>>, %arg5: memref<64x128xf32, #tpu.memory_space<vmem>>, %arg6: memref<32x128xf32, #tpu.memory_space<vmem>>, %arg7: memref<128x128xf32, #tpu.memory_space<vmem>>, %arg8: memref<128x64xf32, #tpu.memory_space<vmem>>, %arg9: memref<64x128xf32, #tpu.memory_space<vmem>>, %arg10: memref<8x128xf32, #tpu.memory_space<vmem>>, %arg11: memref<128x128xf32, #tpu.memory_space<vmem>>) attributes {dimension_semantics = [#tpu.dimension_semantics<parallel>], iteration_bounds = array<i64: 2>, scalar_prefetch = 0 : i64, scratch_operands = 0 : i64, tpu.core_type = #tpu.core_type<tc>, window_params = [{transform_indices = @transform_0, window_bounds = array<i64: 128, 32>}, {transform_indices = @transform_1, window_bounds = array<i64: 128, 8>}, {transform_indices = @transform_2, window_bounds = array<i64: 128, 128>}, {pipeline_mode = #tpu.pipeline_mode<synchronous>, transform_indices = @transform_3, window_bounds = array<i64: 32, 64>}, {pipeline_mode = #tpu.pipeline_mode<synchronous>, transform_indices = @transform_4, window_bounds = array<i64: 64, 128>}, {pipeline_mode = #tpu.pipeline_mode<synchronous>, transform_indices = @transform_5, window_bounds = array<i64: 32, 128>}, {pipeline_mode = #tpu.pipeline_mode<synchronous>, transform_indices = @transform_6, window_bounds = array<i64: 128, 128>}, {pipeline_mode = #tpu.pipeline_mode<synchronous>, transform_indices = @transform_7, window_bounds = array<i64: 128, 64>}, {pipeline_mode = #tpu.pipeline_mode<synchronous>, transform_indices = @transform_8, window_bounds = array<i64: 64, 128>}, {pipeline_mode = #tpu.pipeline_mode<synchronous>, transform_indices = @transform_9, window_bounds = array<i64: 8, 128>}, {transform_indices = @transform_10, window_bounds = array<i64: 128, 128>}]} {
    %c0 = arith.constant 0 : index
    %c0_0 = arith.constant 0 : index
    %0 = vector.load %arg10[%c0, %c0_0] : memref<8x128xf32, #tpu.memory_space<vmem>>, vector<8x128xf32>
    %1 = vector.extract_strided_slice %0 {offsets = [0, 0], sizes = [1, 64], strides = [1, 1]} : vector<8x128xf32> to vector<1x64xf32>
    %2 = vector.extract_strided_slice %0 {offsets = [1, 0], sizes = [1, 128], strides = [1, 1]} : vector<8x128xf32> to vector<1x128xf32>
    %3 = vector.extract_strided_slice %0 {offsets = [2, 0], sizes = [1, 128], strides = [1, 1]} : vector<8x128xf32> to vector<1x128xf32>
    %4 = vector.extract_strided_slice %0 {offsets = [3, 0], sizes = [1, 64], strides = [1, 1]} : vector<8x128xf32> to vector<1x64xf32>
    %5 = vector.extract_strided_slice %0 {offsets = [4, 0], sizes = [1, 128], strides = [1, 1]} : vector<8x128xf32> to vector<1x128xf32>
    %c0_1 = arith.constant 0 : index
    %c0_2 = arith.constant 0 : index
    %6 = vector.load %arg1[%c0_1, %c0_2] : memref<128x32xf32, #tpu.memory_space<vmem>>, vector<128x32xf32>
    %c0_3 = arith.constant 0 : index
    %c0_4 = arith.constant 0 : index
    %7 = vector.load %arg4[%c0_3, %c0_4] : memref<32x64xf32, #tpu.memory_space<vmem>>, vector<32x64xf32>
    %cst = arith.constant dense<0.000000e+00> : vector<128x64xf32>
    %8 = tpu.matmul %6, %7, %cst {dimension_numbers = #tpu.dot_dimension_numbers<[1], [0], [0], [1], [0, 0, 1, 1], [], []>} : vector<128x32xf32>, vector<32x64xf32>, vector<128x64xf32> -> vector<128x64xf32>
    %9 = vector.broadcast %1 : vector<1x64xf32> to vector<128x64xf32>
    %10 = arith.addf %8, %9 : vector<128x64xf32>
    %cst_5 = arith.constant 0.000000e+00 : f32
    %11 = vector.broadcast %cst_5 : f32 to vector<128x64xf32>
    %12 = arith.cmpf ogt, %10, %11 : vector<128x64xf32>
    %cst_6 = arith.constant 0.00999999977 : f32
    %13 = vector.broadcast %cst_6 : f32 to vector<128x64xf32>
    %14 = arith.mulf %13, %10 : vector<128x64xf32>
    %15 = arith.select %12, %10, %14 : vector<128x64xi1>, vector<128x64xf32>
    %c0_7 = arith.constant 0 : index
    %c0_8 = arith.constant 0 : index
    %16 = vector.load %arg5[%c0_7, %c0_8] : memref<64x128xf32, #tpu.memory_space<vmem>>, vector<64x128xf32>
    %cst_9 = arith.constant dense<0.000000e+00> : vector<128x128xf32>
    %17 = tpu.matmul %15, %16, %cst_9 {dimension_numbers = #tpu.dot_dimension_numbers<[1], [0], [0], [1], [0, 0, 1, 1], [], []>} : vector<128x64xf32>, vector<64x128xf32>, vector<128x128xf32> -> vector<128x128xf32>
    %18 = vector.broadcast %2 : vector<1x128xf32> to vector<128x128xf32>
    %19 = arith.addf %17, %18 : vector<128x128xf32>
    %c0_10 = arith.constant 0 : index
    %c0_11 = arith.constant 0 : index
    %20 = vector.load %arg2[%c0_10, %c0_11] : memref<128x8xi32, #tpu.memory_space<vmem>>, vector<128x8xi32>
    %21 = tpu.iota {dimensions = array<i32: 1>} : vector<128x32xi32>
    %cst_12 = arith.constant 0.000000e+00 : f32
    %22 = vector.broadcast %cst_12 : f32 to vector<128x32xf32>
    %cst_13 = arith.constant 0.000000e+00 : f32
    %23 = vector.broadcast %cst_13 : f32 to vector<128x32xf32>
    %cst_14 = arith.constant 0.000000e+00 : f32
    %24 = vector.broadcast %cst_14 : f32 to vector<128x1xf32>
    %25 = vector.extract_strided_slice %20 {offsets = [0, 0], sizes = [128, 1], strides = [1, 1]} : vector<128x8xi32> to vector<128x1xi32>
    %c0_i32 = arith.constant 0 : i32
    %26 = vector.broadcast %c0_i32 : i32 to vector<128x32xi32>
    %27 = arith.subi %21, %26 : vector<128x32xi32>
    %28 = vector.broadcast %25 : vector<128x1xi32> to vector<128x32xi32>
    %29 = arith.cmpi eq, %28, %27 : vector<128x32xi32>
    %30 = arith.extui %29 : vector<128x32xi1> to vector<128x32xi32>
    %31 = arith.sitofp %30 : vector<128x32xi32> to vector<128x32xf32>
    %32 = arith.addf %23, %31 : vector<128x32xf32>
    %c0_i32_15 = arith.constant 0 : i32
    %33 = vector.broadcast %c0_i32_15 : i32 to vector<128x1xi32>
    %34 = arith.cmpi ne, %25, %33 : vector<128x1xi32>
    %35 = arith.extui %34 : vector<128x1xi1> to vector<128x1xi32>
    %36 = arith.sitofp %35 : vector<128x1xi32> to vector<128x1xf32>
    %37 = arith.addf %24, %36 : vector<128x1xf32>
    %38 = vector.extract_strided_slice %20 {offsets = [0, 1], sizes = [128, 1], strides = [1, 1]} : vector<128x8xi32> to vector<128x1xi32>
    %c0_i32_16 = arith.constant 0 : i32
    %39 = vector.broadcast %c0_i32_16 : i32 to vector<128x32xi32>
    %40 = arith.subi %21, %39 : vector<128x32xi32>
    %41 = vector.broadcast %38 : vector<128x1xi32> to vector<128x32xi32>
    %42 = arith.cmpi eq, %41, %40 : vector<128x32xi32>
    %43 = arith.extui %42 : vector<128x32xi1> to vector<128x32xi32>
    %44 = arith.sitofp %43 : vector<128x32xi32> to vector<128x32xf32>
    %45 = arith.addf %32, %44 : vector<128x32xf32>
    %c0_i32_17 = arith.constant 0 : i32
    %46 = vector.broadcast %c0_i32_17 : i32 to vector<128x1xi32>
    %47 = arith.cmpi ne, %38, %46 : vector<128x1xi32>
    %48 = arith.extui %47 : vector<128x1xi1> to vector<128x1xi32>
    %49 = arith.sitofp %48 : vector<128x1xi32> to vector<128x1xf32>
    %50 = arith.addf %37, %49 : vector<128x1xf32>
    %51 = vector.extract_strided_slice %20 {offsets = [0, 2], sizes = [128, 1], strides = [1, 1]} : vector<128x8xi32> to vector<128x1xi32>
    %c0_i32_18 = arith.constant 0 : i32
    %52 = vector.broadcast %c0_i32_18 : i32 to vector<128x32xi32>
    %53 = arith.subi %21, %52 : vector<128x32xi32>
    %54 = vector.broadcast %51 : vector<128x1xi32> to vector<128x32xi32>
    %55 = arith.cmpi eq, %54, %53 : vector<128x32xi32>
    %56 = arith.extui %55 : vector<128x32xi1> to vector<128x32xi32>
    %57 = arith.sitofp %56 : vector<128x32xi32> to vector<128x32xf32>
    %58 = arith.addf %45, %57 : vector<128x32xf32>
    %c0_i32_19 = arith.constant 0 : i32
    %59 = vector.broadcast %c0_i32_19 : i32 to vector<128x1xi32>
    %60 = arith.cmpi ne, %51, %59 : vector<128x1xi32>
    %61 = arith.extui %60 : vector<128x1xi1> to vector<128x1xi32>
    %62 = arith.sitofp %61 : vector<128x1xi32> to vector<128x1xf32>
    %63 = arith.addf %50, %62 : vector<128x1xf32>
    %64 = vector.extract_strided_slice %20 {offsets = [0, 3], sizes = [128, 1], strides = [1, 1]} : vector<128x8xi32> to vector<128x1xi32>
    %c0_i32_20 = arith.constant 0 : i32
    %65 = vector.broadcast %c0_i32_20 : i32 to vector<128x32xi32>
    %66 = arith.subi %21, %65 : vector<128x32xi32>
    %67 = vector.broadcast %64 : vector<128x1xi32> to vector<128x32xi32>
    %68 = arith.cmpi eq, %67, %66 : vector<128x32xi32>
    %69 = arith.extui %68 : vector<128x32xi1> to vector<128x32xi32>
    %70 = arith.sitofp %69 : vector<128x32xi32> to vector<128x32xf32>
    %71 = arith.addf %58, %70 : vector<128x32xf32>
    %c0_i32_21 = arith.constant 0 : i32
    %72 = vector.broadcast %c0_i32_21 : i32 to vector<128x1xi32>
    %73 = arith.cmpi ne, %64, %72 : vector<128x1xi32>
    %74 = arith.extui %73 : vector<128x1xi1> to vector<128x1xi32>
    %75 = arith.sitofp %74 : vector<128x1xi32> to vector<128x1xf32>
    %76 = arith.addf %63, %75 : vector<128x1xf32>
    %cst_22 = arith.constant 1.000000e+00 : f32
    %77 = vector.broadcast %cst_22 : f32 to vector<128x1xf32>
    %78 = arith.maximumf %76, %77 : vector<128x1xf32>
    %cst_23 = arith.constant 1.000000e+00 : f32
    %79 = vector.broadcast %cst_23 : f32 to vector<128x1xf32>
    %80 = arith.divf %79, %78 : vector<128x1xf32>
    %81 = vector.broadcast %80 : vector<128x1xf32> to vector<128x32xf32>
    %82 = arith.mulf %71, %81 : vector<128x32xf32>
    %83 = arith.addf %22, %82 : vector<128x32xf32>
    %cst_24 = arith.constant 0.000000e+00 : f32
    %84 = vector.broadcast %cst_24 : f32 to vector<128x32xf32>
    %cst_25 = arith.constant 0.000000e+00 : f32
    %85 = vector.broadcast %cst_25 : f32 to vector<128x1xf32>
    %86 = vector.extract_strided_slice %20 {offsets = [0, 4], sizes = [128, 1], strides = [1, 1]} : vector<128x8xi32> to vector<128x1xi32>
    %c16_i32 = arith.constant 16 : i32
    %87 = vector.broadcast %c16_i32 : i32 to vector<128x32xi32>
    %88 = arith.subi %21, %87 : vector<128x32xi32>
    %89 = vector.broadcast %86 : vector<128x1xi32> to vector<128x32xi32>
    %90 = arith.cmpi eq, %89, %88 : vector<128x32xi32>
    %91 = arith.extui %90 : vector<128x32xi1> to vector<128x32xi32>
    %92 = arith.sitofp %91 : vector<128x32xi32> to vector<128x32xf32>
    %93 = arith.addf %84, %92 : vector<128x32xf32>
    %c0_i32_26 = arith.constant 0 : i32
    %94 = vector.broadcast %c0_i32_26 : i32 to vector<128x1xi32>
    %95 = arith.cmpi ne, %86, %94 : vector<128x1xi32>
    %96 = arith.extui %95 : vector<128x1xi1> to vector<128x1xi32>
    %97 = arith.sitofp %96 : vector<128x1xi32> to vector<128x1xf32>
    %98 = arith.addf %85, %97 : vector<128x1xf32>
    %99 = vector.extract_strided_slice %20 {offsets = [0, 5], sizes = [128, 1], strides = [1, 1]} : vector<128x8xi32> to vector<128x1xi32>
    %c16_i32_27 = arith.constant 16 : i32
    %100 = vector.broadcast %c16_i32_27 : i32 to vector<128x32xi32>
    %101 = arith.subi %21, %100 : vector<128x32xi32>
    %102 = vector.broadcast %99 : vector<128x1xi32> to vector<128x32xi32>
    %103 = arith.cmpi eq, %102, %101 : vector<128x32xi32>
    %104 = arith.extui %103 : vector<128x32xi1> to vector<128x32xi32>
    %105 = arith.sitofp %104 : vector<128x32xi32> to vector<128x32xf32>
    %106 = arith.addf %93, %105 : vector<128x32xf32>
    %c0_i32_28 = arith.constant 0 : i32
    %107 = vector.broadcast %c0_i32_28 : i32 to vector<128x1xi32>
    %108 = arith.cmpi ne, %99, %107 : vector<128x1xi32>
    %109 = arith.extui %108 : vector<128x1xi1> to vector<128x1xi32>
    %110 = arith.sitofp %109 : vector<128x1xi32> to vector<128x1xf32>
    %111 = arith.addf %98, %110 : vector<128x1xf32>
    %112 = vector.extract_strided_slice %20 {offsets = [0, 6], sizes = [128, 1], strides = [1, 1]} : vector<128x8xi32> to vector<128x1xi32>
    %c16_i32_29 = arith.constant 16 : i32
    %113 = vector.broadcast %c16_i32_29 : i32 to vector<128x32xi32>
    %114 = arith.subi %21, %113 : vector<128x32xi32>
    %115 = vector.broadcast %112 : vector<128x1xi32> to vector<128x32xi32>
    %116 = arith.cmpi eq, %115, %114 : vector<128x32xi32>
    %117 = arith.extui %116 : vector<128x32xi1> to vector<128x32xi32>
    %118 = arith.sitofp %117 : vector<128x32xi32> to vector<128x32xf32>
    %119 = arith.addf %106, %118 : vector<128x32xf32>
    %c0_i32_30 = arith.constant 0 : i32
    %120 = vector.broadcast %c0_i32_30 : i32 to vector<128x1xi32>
    %121 = arith.cmpi ne, %112, %120 : vector<128x1xi32>
    %122 = arith.extui %121 : vector<128x1xi1> to vector<128x1xi32>
    %123 = arith.sitofp %122 : vector<128x1xi32> to vector<128x1xf32>
    %124 = arith.addf %111, %123 : vector<128x1xf32>
    %125 = vector.extract_strided_slice %20 {offsets = [0, 7], sizes = [128, 1], strides = [1, 1]} : vector<128x8xi32> to vector<128x1xi32>
    %c16_i32_31 = arith.constant 16 : i32
    %126 = vector.broadcast %c16_i32_31 : i32 to vector<128x32xi32>
    %127 = arith.subi %21, %126 : vector<128x32xi32>
    %128 = vector.broadcast %125 : vector<128x1xi32> to vector<128x32xi32>
    %129 = arith.cmpi eq, %128, %127 : vector<128x32xi32>
    %130 = arith.extui %129 : vector<128x32xi1> to vector<128x32xi32>
    %131 = arith.sitofp %130 : vector<128x32xi32> to vector<128x32xf32>
    %132 = arith.addf %119, %131 : vector<128x32xf32>
    %c0_i32_32 = arith.constant 0 : i32
    %133 = vector.broadcast %c0_i32_32 : i32 to vector<128x1xi32>
    %134 = arith.cmpi ne, %125, %133 : vector<128x1xi32>
    %135 = arith.extui %134 : vector<128x1xi1> to vector<128x1xi32>
    %136 = arith.sitofp %135 : vector<128x1xi32> to vector<128x1xf32>
    %137 = arith.addf %124, %136 : vector<128x1xf32>
    %cst_33 = arith.constant 1.000000e+00 : f32
    %138 = vector.broadcast %cst_33 : f32 to vector<128x1xf32>
    %139 = arith.maximumf %137, %138 : vector<128x1xf32>
    %cst_34 = arith.constant 1.000000e+00 : f32
    %140 = vector.broadcast %cst_34 : f32 to vector<128x1xf32>
    %141 = arith.divf %140, %139 : vector<128x1xf32>
    %142 = vector.broadcast %141 : vector<128x1xf32> to vector<128x32xf32>
    %143 = arith.mulf %132, %142 : vector<128x32xf32>
    %144 = arith.addf %83, %143 : vector<128x32xf32>
    %c0_35 = arith.constant 0 : index
    %c0_36 = arith.constant 0 : index
    %145 = vector.load %arg6[%c0_35, %c0_36] : memref<32x128xf32, #tpu.memory_space<vmem>>, vector<32x128xf32>
    %cst_37 = arith.constant dense<0.000000e+00> : vector<128x128xf32>
    %146 = tpu.matmul %144, %145, %cst_37 {dimension_numbers = #tpu.dot_dimension_numbers<[1], [0], [0], [1], [0, 0, 1, 1], [], []>} : vector<128x32xf32>, vector<32x128xf32>, vector<128x128xf32> -> vector<128x128xf32>
    %147 = arith.addf %19, %146 : vector<128x128xf32>
    %cst_38 = arith.constant 0.000000e+00 : f32
    %148 = vector.broadcast %cst_38 : f32 to vector<128x128xf32>
    %149 = arith.cmpf ogt, %147, %148 : vector<128x128xf32>
    %cst_39 = arith.constant 0.00999999977 : f32
    %150 = vector.broadcast %cst_39 : f32 to vector<128x128xf32>
    %151 = arith.mulf %150, %147 : vector<128x128xf32>
    %152 = arith.select %149, %147, %151 : vector<128x128xi1>, vector<128x128xf32>
    %c0_40 = arith.constant 0 : index
    %c0_41 = arith.constant 0 : index
    %153 = vector.load %arg7[%c0_40, %c0_41] : memref<128x128xf32, #tpu.memory_space<vmem>>, vector<128x128xf32>
    %cst_42 = arith.constant dense<0.000000e+00> : vector<128x128xf32>
    %154 = tpu.matmul %152, %153, %cst_42 {dimension_numbers = #tpu.dot_dimension_numbers<[1], [0], [0], [1], [0, 0, 1, 1], [], []>} : vector<128x128xf32>, vector<128x128xf32>, vector<128x128xf32> -> vector<128x128xf32>
    %155 = vector.broadcast %3 : vector<1x128xf32> to vector<128x128xf32>
    %156 = arith.addf %154, %155 : vector<128x128xf32>
    %cst_43 = arith.constant 0.000000e+00 : f32
    %157 = vector.broadcast %cst_43 : f32 to vector<128x128xf32>
    %158 = arith.cmpf ogt, %156, %157 : vector<128x128xf32>
    %cst_44 = arith.constant 0.00999999977 : f32
    %159 = vector.broadcast %cst_44 : f32 to vector<128x128xf32>
    %160 = arith.mulf %159, %156 : vector<128x128xf32>
    %161 = arith.select %158, %156, %160 : vector<128x128xi1>, vector<128x128xf32>
    %c0_45 = arith.constant 0 : index
    %c0_46 = arith.constant 0 : index
    %162 = vector.load %arg8[%c0_45, %c0_46] : memref<128x64xf32, #tpu.memory_space<vmem>>, vector<128x64xf32>
    %cst_47 = arith.constant dense<0.000000e+00> : vector<128x64xf32>
    %163 = tpu.matmul %161, %162, %cst_47 {dimension_numbers = #tpu.dot_dimension_numbers<[1], [0], [0], [1], [0, 0, 1, 1], [], []>} : vector<128x128xf32>, vector<128x64xf32>, vector<128x64xf32> -> vector<128x64xf32>
    %164 = vector.broadcast %4 : vector<1x64xf32> to vector<128x64xf32>
    %165 = arith.addf %163, %164 : vector<128x64xf32>
    %cst_48 = arith.constant 0.000000e+00 : f32
    %166 = vector.broadcast %cst_48 : f32 to vector<128x64xf32>
    %167 = arith.cmpf ogt, %165, %166 : vector<128x64xf32>
    %cst_49 = arith.constant 0.00999999977 : f32
    %168 = vector.broadcast %cst_49 : f32 to vector<128x64xf32>
    %169 = arith.mulf %168, %165 : vector<128x64xf32>
    %170 = arith.select %167, %165, %169 : vector<128x64xi1>, vector<128x64xf32>
    %c0_50 = arith.constant 0 : index
    %c0_51 = arith.constant 0 : index
    %171 = vector.load %arg9[%c0_50, %c0_51] : memref<64x128xf32, #tpu.memory_space<vmem>>, vector<64x128xf32>
    %cst_52 = arith.constant dense<0.000000e+00> : vector<128x128xf32>
    %172 = tpu.matmul %170, %171, %cst_52 {dimension_numbers = #tpu.dot_dimension_numbers<[1], [0], [0], [1], [0, 0, 1, 1], [], []>} : vector<128x64xf32>, vector<64x128xf32>, vector<128x128xf32> -> vector<128x128xf32>
    %173 = vector.broadcast %5 : vector<1x128xf32> to vector<128x128xf32>
    %174 = arith.addf %172, %173 : vector<128x128xf32>
    %c0_53 = arith.constant 0 : index
    %c0_54 = arith.constant 0 : index
    %175 = vector.load %arg3[%c0_53, %c0_54] : memref<128x128xi32, #tpu.memory_space<vmem>>, vector<128x128xi32>
    %c0_i32_55 = arith.constant 0 : i32
    %176 = vector.broadcast %c0_i32_55 : i32 to vector<128x128xi32>
    %177 = arith.cmpi ne, %175, %176 : vector<128x128xi32>
    %cst_56 = arith.constant -1.000000e+30 : f32
    %178 = vector.broadcast %cst_56 : f32 to vector<128x128xf32>
    %179 = arith.select %177, %174, %178 : vector<128x128xi1>, vector<128x128xf32>
    %cst_57 = arith.constant dense<0xFF800000> : vector<128xf32>
    %180 = vector.multi_reduction <maximumf>, %179, %cst_57 [1] : vector<128x128xf32> to vector<128xf32>
    %181 = vector.shape_cast %180 : vector<128xf32> to vector<128x1xf32>
    %182 = vector.broadcast %181 : vector<128x1xf32> to vector<128x128xf32>
    %183 = arith.subf %179, %182 : vector<128x128xf32>
    %184 = math.exp %183 : vector<128x128xf32>
    %cst_58 = arith.constant dense<0.000000e+00> : vector<128xf32>
    %185 = vector.multi_reduction <add>, %184, %cst_58 [1] : vector<128x128xf32> to vector<128xf32>
    %186 = vector.shape_cast %185 : vector<128xf32> to vector<128x1xf32>
    %cst_59 = arith.constant 1.000000e+00 : f32
    %187 = vector.broadcast %cst_59 : f32 to vector<128x1xf32>
    %188 = arith.divf %187, %186 : vector<128x1xf32>
    %189 = vector.broadcast %188 : vector<128x1xf32> to vector<128x128xf32>
    %190 = arith.mulf %184, %189 : vector<128x128xf32>
    %c0_60 = arith.constant 0 : index
    %c0_61 = arith.constant 0 : index
    %191 = vector.load %arg11[%c0_60, %c0_61] : memref<128x128xf32, #tpu.memory_space<vmem>>, vector<128x128xf32>
    tpu.vector_store %arg11[%c0_60, %c0_61], %190 {strides = array<i32>} : memref<128x128xf32, #tpu.memory_space<vmem>>, vector<128x128xf32>,
    return
  }
  func.func @transform_0(%arg0: i32) -> (i32, i32) {
    %c0_i32 = arith.constant 0 : i32
    %c0_i32_0 = arith.constant 0 : i32
    return %arg0, %c0_i32 : i32, i32
  }
  func.func @transform_1(%arg0: i32) -> (i32, i32) {
    %c0_i32 = arith.constant 0 : i32
    %c0_i32_0 = arith.constant 0 : i32
    return %arg0, %c0_i32 : i32, i32
  }
  func.func @transform_2(%arg0: i32) -> (i32, i32) {
    %c0_i32 = arith.constant 0 : i32
    %c0_i32_0 = arith.constant 0 : i32
    return %arg0, %c0_i32 : i32, i32
  }
  func.func @transform_3(%arg0: i32) -> (i32, i32) {
    %c0_i32 = arith.constant 0 : i32
    %c0_i32_0 = arith.constant 0 : i32
    %c0_i32_1 = arith.constant 0 : i32
    return %c0_i32, %c0_i32_0 : i32, i32
  }
  func.func @transform_4(%arg0: i32) -> (i32, i32) {
    %c0_i32 = arith.constant 0 : i32
    %c0_i32_0 = arith.constant 0 : i32
    %c0_i32_1 = arith.constant 0 : i32
    return %c0_i32, %c0_i32_0 : i32, i32
  }
  func.func @transform_5(%arg0: i32) -> (i32, i32) {
    %c0_i32 = arith.constant 0 : i32
    %c0_i32_0 = arith.constant 0 : i32
    %c0_i32_1 = arith.constant 0 : i32
    return %c0_i32, %c0_i32_0 : i32, i32
  }
  func.func @transform_6(%arg0: i32) -> (i32, i32) {
    %c0_i32 = arith.constant 0 : i32
    %c0_i32_0 = arith.constant 0 : i32
    %c0_i32_1 = arith.constant 0 : i32
    return %c0_i32, %c0_i32_0 : i32, i32
  }
  func.func @transform_7(%arg0: i32) -> (i32, i32) {
    %c0_i32 = arith.constant 0 : i32
    %c0_i32_0 = arith.constant 0 : i32
    %c0_i32_1 = arith.constant 0 : i32
    return %c0_i32, %c0_i32_0 : i32, i32
  }
  func.func @transform_8(%arg0: i32) -> (i32, i32) {
    %c0_i32 = arith.constant 0 : i32
    %c0_i32_0 = arith.constant 0 : i32
    %c0_i32_1 = arith.constant 0 : i32
    return %c0_i32, %c0_i32_0 : i32, i32
  }
  func.func @transform_9(%arg0: i32) -> (i32, i32) {
    %c0_i32 = arith.constant 0 : i32
    %c0_i32_0 = arith.constant 0 : i32
    %c0_i32_1 = arith.constant 0 : i32
    return %c0_i32, %c0_i32_0 : i32, i32
  }
  func.func @transform_10(%arg0: i32) -> (i32, i32) {
    %c0_i32 = arith.constant 0 : i32
    %c0_i32_0 = arith.constant 0 : i32
    return %arg0, %c0_i32 : i32, i32
  }
}

</mosaic_0001>

<bundles_post_ra>
// kernel: tpu_custom_call.1
= control target key start
LH: loop header
LB: loop body
LE: loop exit
PB: predicated region body
PF: predicated region fallthrough
CT: control target
= control target key end

     0   :  { %15 = vsyncpa [#allocation3], 0  ;;  %s6630_s0 = inlined_call_operand.vmem [shape: f32[256,32], index: 0, kind: input, shape index: {}]   ;;  %s6631_s1 = inlined_call_operand.vmem [shape: s32[256,8], index: 1, kind: input, shape index: {}]   ;;  %s6632_s2 = inlined_call_operand.vmem [shape: s32[256,128], index: 2, kind: input, shape index: {}]   ;;  %s6633_s3 = inlined_call_operand.vmem [shape: f32[32,64], index: 3, kind: input, shape index: {}]   ;;  %s6634_s4 = inlined_call_operand.vmem [shape: f32[64,128], index: 4, kind: input, shape index: {}]   ;;  %s6635_s5 = inlined_call_operand.vmem [shape: f32[32,128], index: 5, kind: input, shape index: {}]   ;;  %s6636_s6 = inlined_call_operand.vmem [shape: f32[128,128], index: 6, kind: input, shape index: {}]   ;;  %s6637_s7 = inlined_call_operand.vmem [shape: f32[128,64], index: 7, kind: input, shape index: {}]   ;;  %s6638_s8 = inlined_call_operand.vmem [shape: f32[64,128], index: 8, kind: input, shape index: {}]   ;;  %s6639_s9 = inlined_call_operand.vmem [shape: f32[8,128], index: 9, kind: input, shape index: {}]   ;;  %s6640_s10 = inlined_call_operand.hbm [shape: f32[256,128], index: 10, kind: output, shape index: {}]  }
   0x1   :  { %17 = vsyncpa [#allocation3 + $0x1], 0  ;;  %s4757_s13 = smov 0   ;;  %s4759_s14 = smov 0  }
   0x2   :  { %s4761_s15 = smov 0   ;;  %s4763_s16 = smov 0  }
   0x3 LB: > { %s4778_s17 = sadd.s32 4294967295, %s4685_s16   ;;  %s3537_s18 = sadd.s32 4294967294, %s4685_s16   ;;  %s4685_s16 = sphi %s4763_s16, %s6804_s16   ;;  %s4681_s15 = sphi %s4761_s15, %s6803_s15   ;;  %s4677_s14 = sphi %s4759_s14, %s6802_s14   ;;  %s4673_s13 = sphi %s4757_s13, %s6801_s13  }
   0x4   : > { %s4782_s19 = sadd.s32 1, %s4685_s16   ;;  %s255_s20 = sadd.s32 1, %s4681_s15 }
   0x5   : > { %s252_s21 = ssub.s32 %s4685_s16, %s4782_s19  ;;  %p265_p0 = scmp.ne.s32.totalorder %s4681_s15, %s4677_s14 }
   0x6   : > { %p253_p1 = scmp.eq.s32.totalorder %s252_s21, 0  ;;  %p266_p2 = scmp.eq.s32.totalorder %s4778_s17, 1 }
   0x7   : > { %p271_p3 = scmp.ne.s32.totalorder %s4677_s14, %s4673_s13  ;;  %p272_p4 = scmp.eq.s32.totalorder %s3537_s18, 1 }
   0x8   : > { %s4793_s22 = scalar_select %p253_p1, %s4681_s15, %s255_s20  }
   0x9   : > { %p4795_p5 = por %p266_p2, %p265_p0  ;;  %p4799_p6 = por %p272_p4, %p271_p3 }
   0xa   : > { %p3540_p7 = scmp.ge.s32.totalorder %s4685_s16, 1  ;;  %p338_p8 = scmp.lt.s32.totalorder %s4685_s16, 3 }
   0xc   : > { %p339_p9 = pnand %p3540_p7, %p338_p8 }
   0xe   : > { %342 = sbr.rel (%p339_p9) target bundleno = 1843 (0x733), region = 60 }
  0x13   : > { %s3542_s25 = sshll.u32 %s4778_s17, 4  ;;  %v6655_v0 = vmov 4   ;;  %v6647_v1 = vmov 1   ;;  %v6643_v8 = vmov 0.0   ;;  %s4690_s30 = smov 127   ;;  %v425_v24 = vld [vmem:[%s6633_s3 + $0x18] sm:$0xff] }
  0x14   : > { %p387_p10 = scmp.lt.s32.totalorder %s3542_s25, 31  ;;  %4364 = vset.pattern.permute.xlu0 %v6655_v0  ;;  %4360 = vset.pattern.permute.xlu1 %v6647_v1  ;;  %s6641_s11 = smov 125   ;;  %v424_v28 = vld [vmem:[%s6633_s3 + $0x10] sm:$0xff]  ;;  %v423_v32 = vld [vmem:[%s6633_s3 + $0x8] sm:$0xff]  ;;  %v422_v33 = vld [vmem:[%s6633_s3] sm:$0xff]  ;;  %vm430_vm12 = vcmask 261120  }
  0x15   : > { %s4692_s12 = smov 126   ;;  %3915 = vmatprep.subr.mxu0 %v425_v24  ;;  %s6687_s27 = smov 125   ;;  %v6649_v51 = vmov 0   ;;  %v6645_v52 = vmov 3   ;;  %v4695_v53 = vmov 5   ;;  %v6653_v54 = vmov 2  }
  0x16   : > { %s6806_s25 = smov (!%p387_p10, %s3542_s25), 31  ;;  %3916 = vmatpush3.msra.mxu0 %v425_v24  ;;  %v6659_v55 = vmov 6   ;;  %v6651_v56 = vmov 7   ;;  %s3762_s28 = sshll.u32 %s4778_s17, 11 }
  0x17   : > { %s4808_s26 = sshll.u32 %s6806_s25, 3  ;;  %3917 = vmatprep.subr.mxu0 %v424_v28  ;;  %s6581_s21 = scalar_lea.hbm %s6640_s10, %s3762_s28 }
  0x18   : > { %s4814_s29 = scalar_lea.vmem %s6631_s1, %s4808_s26  ;;  %3918 = vmatpush3.msra.mxu0 %v424_v28  ;;  %s6394_s25 = scalar_lea.vmem %s6632_s2, %s4808_s26 }
  0x19   : > { %v4817_v2 = vld [vmem:[%s4814_s29 + $0x10] sm:$0xff]  ;;  %v4820_v3 = vld [vmem:[%s4814_s29 + $0x18] sm:$0xff]  ;;  %v4823_v4 = vld [vmem:[%s4814_s29] sm:$0xff]  ;;  %3919 = vmatprep.subr.mxu0 %v423_v32 }
  0x1a   : > { %vm1010_vm0 = vcmp.ne.s32.totalorder %v4817_v2, 0  ;;  %vm1011_vm1 = vcmp.ne.s32.totalorder %v4820_v3, 0  ;;  %v4828_v5 = vld [vmem:[%s4814_s29 + $0x8] sm:$0xff]  ;;  %vm1008_vm2 = vcmp.ne.s32.totalorder %v4823_v4, 0  ;;  %v4832_v6 = vld [vmem:[%s4814_s29 + $0x20] sm:$0xff]  ;;  %v4868_v18 = vld [vmem:[%s4814_s29 + $0x30] sm:$0xff]  ;;  %3920 = vmatpush3.msra.mxu0 %v423_v32 }
  0x1b   : > { %v4835_v7 = vld [vmem:[%s4814_s29 + $0x28] sm:$0xff]  ;;  %v4838_v9 = vsel %vm1010_vm0, 1.0, %v6643_v8  ;;  %v4841_v10 = vsel %vm1011_vm1, 1.0, %v6643_v8  ;;  %vm1009_vm3 = vcmp.ne.s32.totalorder %v4828_v5, 0  ;;  %v4845_v11 = vsel %vm1008_vm2, 1.0, %v6643_v8  ;;  %v4871_v19 = vld [vmem:[%s4814_s29 + $0x38] sm:$0xff]  ;;  %3921 = vmatprep.subr.mxu0 %v422_v33 }
  0x1c   : > { %v4250_v12 = vpack.i.bf16 %v4841_v10, %v4838_v9  ;;  %v4850_v13 = vsel %vm1009_vm3, 1.0, %v6643_v8  ;;  %vm1012_vm4 = vcmp.ne.s32.totalorder %v4832_v6, 0  ;;  %vm1013_vm5 = vcmp.ne.s32.totalorder %v4835_v7, 0  ;;  %v4877_v20 = vld [vmem:[%s4814_s29 + $0x40] sm:$0xff]  ;;  %v4880_v21 = vld [vmem:[%s4814_s29 + $0x48] sm:$0xff]  ;;  %v4912_v30 = vld [vmem:[%s4814_s29 + $0x50] sm:$0xff]  ;;  %3922 = vmatpush3.msra.mxu0 %v422_v33 }
  0x1d   : > { %v4240_v14 = vpack.i.bf16 %v4850_v13, %v4845_v11  ;;  %v4859_v15 = vsel %vm1012_vm4, 1.0, %v6643_v8  ;;  %v4862_v16 = vsel %vm1013_vm5, 1.0, %v6643_v8  ;;  %vm1014_vm6 = vcmp.ne.s32.totalorder %v4868_v18, 0  ;;  %v4915_v31 = vld [vmem:[%s4814_s29 + $0x58] sm:$0xff]  ;;  %v4933_v34 = vld [vmem:[%s4814_s29 + $0x60] sm:$0xff]  ;;  %v4936_v35 = vld [vmem:[%s4814_s29 + $0x68] sm:$0xff] }
  0x1e   : > { %4251 = vrot.lane.b32.xlu1 %v4250_v12, %s4690_s30  ;;  %v4265_v17 = vpack.i.bf16 %v4862_v16, %v4859_v15  ;;  %vm1015_vm7 = vcmp.ne.s32.totalorder %v4871_v19, 0  ;;  %v4885_v22 = vsel %vm1014_vm6, 1.0, %v6643_v8  ;;  %vm1016_vm8 = vcmp.ne.s32.totalorder %v4877_v20, 0  ;;  %v4966_v44 = vld [vmem:[%s4814_s29 + $0x70] sm:$0xff]  ;;  %v4969_v45 = vld [vmem:[%s4814_s29 + $0x78] sm:$0xff] }
  0x1f   : > { %4241 = vrot.lane.b32.xlu0 %v4240_v14, %s4690_s30  ;;  %v4888_v23 = vsel %vm1015_vm7, 1.0, %v6643_v8  ;;  %vm1017_vm9 = vcmp.ne.s32.totalorder %v4880_v21, 0  ;;  %v4900_v26 = vsel %vm1016_vm8, 1.0, %v6643_v8  ;;  %vm1018_vm10 = vcmp.ne.s32.totalorder %v4912_v30, 0 }
  0x20   : > { %v4280_v25 = vpack.i.bf16 %v4888_v23, %v4885_v22  ;;  %6685 = vst [vmem:[#allocation5_spill] sm:$0xff] %v4900_v26  ;;  %v4903_v27 = vsel %vm1017_vm9, 1.0, %v6643_v8  ;;  %vm1019_vm11 = vcmp.ne.s32.totalorder %v4915_v31, 0  ;;  %v4944_v38 = vsel %vm1018_vm10, 1.0, %v6643_v8 }
  0x21   : > { %v4295_v29 = vpack.i.bf16 %v4903_v27, %v4900_v26  ;;  %6686 = vst [vmem:[#allocation6_spill] sm:$0xff] %v4944_v38  ;;  %v4947_v39 = vsel %vm1019_vm11, 1.0, %v6643_v8  ;;  %vm1020_vm13 = vcmp.ne.s32.totalorder %v4933_v34, 0  ;;  %vm1021_vm14 = vcmp.ne.s32.totalorder %v4936_v35, 0 }
  0x22   : > { %4256 = vrot.lane.b32.xlu1 %v4240_v14, %s6641_s11  ;;  %v4310_v40 = vpack.i.bf16 %v4947_v39, %v4944_v38  ;;  %v4957_v41 = vsel %vm1020_vm13, 1.0, %v6643_v8  ;;  %v4960_v42 = vsel %vm1021_vm14, 1.0, %v6643_v8  ;;  %vm1022_vm15 = vcmp.ne.s32.totalorder %v4966_v44, 0 }
  0x23   : > { %4246 = vrot.lane.b32.xlu0 %v4240_v14, %s4692_s12  ;;  %6688 = vst [vmem:[#allocation7_spill] sm:$0xff] %v4957_v41  ;;  %v4325_v43 = vpack.i.bf16 %v4960_v42, %v4957_v41  ;;  %vm1023_vm0 = vcmp.ne.s32.totalorder %v4969_v45, 0  ;;  %v4977_v46 = vsel %vm1022_vm15, 1.0, %v6643_v8  ;;  %v6700_v41 = vmov 2  }
  0x24   : > { %v4980_v47 = vsel %vm1023_vm0, 1.0, %v6643_v8  ;;  %vm684_vm3 = vcmask 523264  }
  0x25   : > { %v4340_v48 = vpack.i.bf16 %v4980_v47, %v4977_v46 }
  0x26   : > { %4266 = vrot.lane.b32.xlu1 %v4265_v17, %s4690_s30 }
  0x27   : > { %4261 = vrot.lane.b32.xlu0 %v4250_v12, %s4692_s12 }
  0x2a   : > { %4276 = vrot.lane.b32.xlu1 %v4265_v17, %s4692_s12 }
  0x2b   : > { %4271 = vrot.lane.b32.xlu0 %v4250_v12, %s6641_s11 }
  0x2e   : > { %4286 = vrot.lane.b32.xlu1 %v4265_v17, %s6641_s11  ;;  %s4928_s11 = scalar_lea.vmem %s6630_s0, %s4808_s26  ;;  %s383_s26 = sand.u32 1, %s4677_s14  }
  0x2f   : > { %4281 = vrot.lane.b32.xlu0 %v4280_v25, %s4690_s30  ;;  %v406_v36 = vld [vmem:[%s4928_s11] sm:$0xff]  ;;  %v407_v37 = vld [vmem:[%s4928_s11 + $0x8] sm:$0xff]  ;;  %v408_v49 = vld [vmem:[%s4928_s11 + $0x10] sm:$0xff]  ;;  %s6590_s17 = scalar_lea.sflag [#allocation3], %s383_s26 }
  0x30   : > { %3923 = vmatprep.mubr.msk.f32.mxu0 %vm430_vm12, %v406_v36  ;;  %v409_v50 = vld [vmem:[%s4928_s11 + $0x18] sm:$0xff]  ;;  %v410_v58 = vld [vmem:[%s4928_s11 + $0x20] sm:$0xff]  ;;  %v411_v60 = vld [vmem:[%s4928_s11 + $0x28] sm:$0xff] }
  0x31   : > { %3924 = vmatmul.mubr.msk.f32.vlgmr.msra.gmra.mxu0 %vm430_vm12, %v407_v37 }
  0x32   : > { %4296 = vrot.lane.b32.xlu1 %v4295_v29, %s4690_s30  ;;  %3926 = vmatprep.mubr.msk.f32.mxu0 %vm430_vm12, %v408_v49 }
  0x33   : > { %4291 = vrot.lane.b32.xlu0 %v4280_v25, %s4692_s12 }
  0x35   : > { %3927 = vmatmul.mubr.msk.f32.gmra.mxu0 %vm430_vm12, %v409_v50 }
  0x36   : > { %4306 = vrot.lane.b32.xlu1 %v4295_v29, %s4692_s12  ;;  %3929 = vmatprep.mubr.msk.f32.mxu0 %vm430_vm12, %v410_v58 }
  0x37   : > { %4301 = vrot.lane.b32.xlu0 %v4280_v25, %s6687_s27 }
  0x39   : > { %3930 = vmatmul.mubr.msk.f32.gmra.mxu0 %vm430_vm12, %v411_v60 }
  0x3a   : > { %4316 = vrot.lane.b32.xlu1 %v4295_v29, %s6687_s27 }
  0x3b   : > { %4311 = vrot.lane.b32.xlu0 %v4310_v40, %s4690_s30 }
  0x3e   : > { %4326 = vrot.lane.b32.xlu1 %v4325_v43, %s4690_s30 }
  0x3f   : > { %4321 = vrot.lane.b32.xlu0 %v4310_v40, %s4692_s12 }
  0x42   : > { %4336 = vrot.lane.b32.xlu1 %v4325_v43, %s4692_s12 }
  0x43   : > { %4331 = vrot.lane.b32.xlu0 %v4310_v40, %s6687_s27 }
  0x46   : > { %4346 = vrot.lane.b32.xlu1 %v4325_v43, %s6687_s27 }
  0x47   : > { %4341 = vrot.lane.b32.xlu0 %v4340_v48, %s4690_s30  ;;  %s3541_s30 = sshll.u32 %s383_s26, 7 }
  0x4a   : > { %4356 = vrot.lane.b32.xlu1 %v4340_v48, %s6687_s27  ;;  %s4699_s27 = smov [#allocation2]  }
  0x4b   : > { %4351 = vrot.lane.b32.xlu0 %v4340_v48, %s4692_s12  ;;  %s6546_s12 = scalar_lea.vmem [#allocation2], %s3541_s30 }
  0x4c   : > { %s3451_s18 = sshll.u32 %s6546_s12, 4  ;;  %s6583_s18 = int_to_ptr.vmem [resolvable:$true] %s3451_s18 }
  0x4e   : > { %1073 = vperm.xlu1 %4360, %v4823_v4  }
  0x4f   : > { %1781 = vperm.xlu0 %4364, %v4828_v5  }
  0x52   : > { %4361 = vset.pattern.permute.xlu1 %v6655_v0 }
  0x53   : > { %1784 = vperm.xlu0 %4364, %v4817_v2   ;;  %1778 = vperm.xlu1 %4361, %v4823_v4  }
  0x57   : > { %1787 = vperm.xlu0 %4364, %v4820_v3   ;;  %4362 = vset.pattern.permute.xlu1 %v6649_v51 }
  0x58   : > { %900 = vperm.xlu1 %4362, %v4828_v5  }
  0x5b   : > { %4380 = vset.pattern.permute.xlu0 %v6645_v52 }
  0x5c   : > { %1447 = vperm.xlu0 %4380, %v4817_v2   ;;  %4363 = vset.pattern.permute.xlu1 %v6647_v1 }
  0x5d   : > { %1076 = vperm.xlu1 %4363, %v4828_v5  }
  0x60   : > { %1453 = vperm.xlu0 %4380, %v4832_v6  }
  0x61   : > { %4365 = vset.pattern.permute.xlu1 %v4695_v53 }
  0x62   : > { %1893 = vperm.xlu1 %4365, %v4828_v5  }
  0x64   : > { %1459 = vperm.xlu0 %4380, %v4868_v18  }
  0x66   : > { %4366 = vset.pattern.permute.xlu1 %v6653_v54 }
  0x67   : > { %1265 = vperm.xlu1 %4366, %v4823_v4  }
  0x68   : > { %1465 = vperm.xlu0 %4380, %v4877_v20  }
  0x6b   : > { %1268 = vperm.xlu1 %4366, %v4828_v5  }
  0x6c   : > { %1471 = vperm.xlu0 %4380, %v4912_v30  }
  0x6f   : > { %4367 = vset.pattern.permute.xlu1 %v6659_v55 }
  0x70   : > { %1477 = vperm.xlu0 %4380, %v4933_v34   ;;  %2005 = vperm.xlu1 %4367, %v4828_v5  }
  0x74   : > { %4446 = vset.pattern.permute.xlu0 %v4695_v53  ;;  %4368 = vset.pattern.permute.xlu1 %v6647_v1 }
  0x75   : > { %1890 = vperm.xlu0 %4446, %v4823_v4   ;;  %1079 = vperm.xlu1 %4368, %v4817_v2  }
  0x79   : > { %1902 = vperm.xlu0 %4446, %v4832_v6   ;;  %4369 = vset.pattern.permute.xlu1 %v6645_v52 }
  0x7a   : > { %1441 = vperm.xlu1 %4369, %v4823_v4  }
  0x7d   : > { %1905 = vperm.xlu0 %4446, %v4835_v7  }
  0x7e   : > { %4370 = vset.pattern.permute.xlu1 %v4695_v53 }
  0x7f   : > { %1896 = vperm.xlu1 %4370, %v4817_v2  }
  0x81   : > { %1908 = vperm.xlu0 %4446, %v4868_v18  }
  0x83   : > { %4371 = vset.pattern.permute.xlu1 %v6651_v56 }
  0x84   : > { %2114 = vperm.xlu1 %4371, %v4823_v4  }
  0x85   : > { %1911 = vperm.xlu0 %4446, %v4871_v19  }
  0x88   : > { %4372 = vset.pattern.permute.xlu1 %v6647_v1 }
  0x89   : > { %1914 = vperm.xlu0 %4446, %v4877_v20   ;;  %1082 = vperm.xlu1 %4372, %v4820_v3  }
  0x8d   : > { %1917 = vperm.xlu0 %4446, %v4880_v21   ;;  %4373 = vset.pattern.permute.xlu1 %v6645_v52 }
  0x8e   : > { %1444 = vperm.xlu1 %4373, %v4828_v5  }
  0x90   : > { %v5035_v57 = vpop.permute.xlu1 %4251 }
  0x91   : > { %1920 = vperm.xlu0 %4446, %v4912_v30   ;;  %v4242_v59 = vpop.permute.xlu0 %4241 }
  0x92   : > { %4374 = vset.pattern.permute.xlu1 %v4695_v53  ;;  %v4577_v25 = vadd.low.f32.bf16 %v4845_v11, %v4242_v59  ;;  %v4580_v58 = vadd.high.f32.bf16 %v4850_v13, %v4242_v59 }
  0x93   : > { %1899 = vperm.xlu1 %4374, %v4820_v3  }
  0x94   : > { %v5043_v61 = vpop.permute.xlu1 %4256 }
  0x95   : > { %1923 = vperm.xlu0 %4446, %v4915_v31   ;;  %v4247_v62 = vpop.permute.xlu0 %4246 }
  0x96   : > { %v4578_v32 = vadd.low.f32.bf16 %v4577_v25, %v4247_v62  ;;  %v4581_v25 = vadd.high.f32.bf16 %v4580_v58, %v4247_v62 }
  0x97   : > { %4375 = vset.pattern.permute.xlu1 %v6651_v56 }
  0x98   : > { %2117 = vperm.xlu1 %4375, %v4828_v5   ;;  %v5048_v63 = vpop.permute.xlu1 %4266  ;;  %v4579_v11 = vadd.low.f32.bf16 %v4578_v32, %v5043_v61 }
  0x99   : > { %1926 = vperm.xlu0 %4446, %v4933_v34   ;;  %v5051_v12 = vpop.permute.xlu0 %4261 }
  0x9a   : > { %v1616_v40 = vmax.f32 %v4579_v11, 1.0 }
  0x9c   : > { %4376 = vset.pattern.permute.xlu1 %v6659_v55  ;;  %v5054_v14 = vpop.permute.xlu1 %4276  ;;  %4469 = vrcp.f32 %v1616_v40 }
  0x9d   : > { %1929 = vperm.xlu0 %4446, %v4936_v35   ;;  %v5057_v17 = vpop.permute.xlu0 %4271  ;;  %2008 = vperm.xlu1 %4376, %v4817_v2  }
  0xa0   : > { %v5060_v24 = vpop.permute.xlu1 %4286 }
  0xa1   : > { %1932 = vperm.xlu0 %4446, %v4966_v44   ;;  %v5063_v5 = vpop.permute.xlu0 %4281  ;;  %4377 = vset.pattern.permute.xlu1 %v6653_v54 }
  0xa2   : > { %1274 = vperm.xlu1 %4377, %v4820_v3  }
  0xa4   : > { %v5068_v28 = vpop.permute.xlu1 %4296 }
  0xa5   : > { %1935 = vperm.xlu0 %4446, %v4969_v45   ;;  %v5071_v29 = vpop.permute.xlu0 %4291 }
  0xa6   : > { %4378 = vset.pattern.permute.xlu1 %v6649_v51 }
  0xa7   : > { %909 = vperm.xlu1 %4378, %v4832_v6  }
  0xa8   : > { %v5075_v33 = vpop.permute.xlu1 %4306 }
  0xa9   : > { %4454 = vset.pattern.permute.xlu0 %v6653_v54  ;;  %v5078_v36 = vpop.permute.xlu0 %4301  ;;  %v4470_v60 = vpop.eup %4469 }
  0xaa   : > { %1271 = vperm.xlu0 %4454, %v4817_v2  }
  0xab   : > { %4379 = vset.pattern.permute.xlu1 %v6647_v1 }
  0xac   : > { %1085 = vperm.xlu1 %4379, %v4832_v6   ;;  %v5084_v37 = vpop.permute.xlu1 %4316 }
  0xad   : > { %v5086_v43 = vpop.permute.xlu0 %4311 }
  0xae   : > { %1277 = vperm.xlu0 %4454, %v4832_v6  }
  0xb0   : > { %4381 = vset.pattern.permute.xlu1 %v6655_v0  ;;  %v5092_v48 = vpop.permute.xlu1 %4326 }
  0xb1   : > { %1790 = vperm.xlu1 %4381, %v4832_v6   ;;  %6689 = vst [vmem:[#allocation8_spill] sm:$0xff] %v5092_v48  ;;  %v5094_v49 = vpop.permute.xlu0 %4321 }
  0xb2   : > { %1283 = vperm.xlu0 %4454, %v4868_v18   ;;  %6690 = vst [vmem:[#allocation9_spill] sm:$0xff] %v5094_v49 }
  0xb4   : > { %v5099_v50 = vpop.permute.xlu1 %4336 }
  0xb5   : > { %4382 = vset.pattern.permute.xlu1 %v6651_v56  ;;  %6691 = vst [vmem:[#allocation10_spill] sm:$0xff] %v5099_v50  ;;  %v5101_v53 = vpop.permute.xlu0 %4331 }
  0xb6   : > { %1289 = vperm.xlu0 %4454, %v4877_v20   ;;  %2120 = vperm.xlu1 %4382, %v4817_v2   ;;  %6692 = vst [vmem:[#allocation11_spill] sm:$0xff] %v5101_v53 }
  0xb8   : > { %v5108_v32 = vpop.permute.xlu1 %4346 }
  0xb9   : > { %6693 = vst [vmem:[#allocation12_spill] sm:$0xff] %v5108_v32  ;;  %v5111_v11 = vpop.permute.xlu0 %4341 }
  0xba   : > { %1295 = vperm.xlu0 %4454, %v4912_v30   ;;  %4383 = vset.pattern.permute.xlu1 %v6647_v1  ;;  %v4582_v30 = vadd.high.f32.bf16 %v4581_v25, %v5043_v61  ;;  %v413_v25 = vld [vmem:[%s4928_s11 + $0x38] sm:$0xff]  ;;  %v4583_v1 = vadd.low.f32.bf16 %v4838_v9, %v5035_v57 }
  0xbb   : > { %1088 = vperm.xlu1 %4383, %v4835_v7  }
  0xbc   : > { %v5116_v13 = vpop.permute.xlu1 %4356  ;;  %v1617_v59 = vmax.f32 %v4582_v30, 1.0 }
  0xbe   : > { %1301 = vperm.xlu0 %4454, %v4933_v34   ;;  %v5118_v34 = vpop.permute.xlu0 %4351  ;;  %4471 = vrcp.f32 %v1617_v59 }
  0xbf   : > { %4384 = vset.pattern.permute.xlu1 %v6649_v51  ;;  %v4584_v51 = vadd.low.f32.bf16 %v4583_v1, %v5051_v12 }
  0xc0   : > { %1666 = vperm.xlu1 %4384, %v4470_v60  }
  0xc2   : > { %1307 = vperm.xlu0 %4454, %v4966_v44  }
  0xc4   : > { %4385 = vset.pattern.permute.xlu1 %v6655_v0 }
  0xc5   : > { %2226 = vperm.xlu1 %4385, %v4470_v60   ;;  %v412_v60 = vld [vmem:[%s4928_s11 + $0x30] sm:$0xff] }
  0xc6   : > { %4457 = vset.pattern.permute.xlu0 %v6659_v55  ;;  %3932 = vmatprep.mubr.msk.f32.mxu0 %vm430_vm12, %v412_v60 }
  0xc7   : > { %2002 = vperm.xlu0 %4457, %v4823_v4   ;;  %3933 = vmatmul.mubr.msk.f32.gmra.mxu0 %vm430_vm12, %v413_v25 }
  0xc9   : > { %v5122_v62 = vpop.permute.xlu1 %1073  ;;  %4386 = vset.pattern.permute.xlu1 %v6645_v52 }
  0xca   : > { %1450 = vperm.xlu1 %4386, %v4820_v3   ;;  %v5126_v61 = vpop.permute.xlu0 %1781 }
  0xcb   : > { %2011 = vperm.xlu0 %4457, %v4820_v3   ;;  %v5150_v52 = vpop.eup %4471 }
  0xce   : > { %v5129_v40 = vpop.permute.xlu1 %1778  ;;  %4387 = vset.pattern.permute.xlu1 %v6655_v0  ;;  %v5132_v58 = vpop.permute.xlu0 %1784 }
  0xcf   : > { %6694 = vst [vmem:[#allocation13_spill] sm:$0xff] %v5132_v58  ;;  %2017 = vperm.xlu0 %4457, %v4835_v7   ;;  %1793 = vperm.xlu1 %4387, %v4835_v7  }
  0xd2   : > { %v5138_v30 = vpop.permute.xlu0 %1787 }
  0xd3   : > { %6695 = vst [vmem:[#allocation14_spill] sm:$0xff] %v5138_v30  ;;  %2023 = vperm.xlu0 %4457, %v4871_v19   ;;  %v5142_v59 = vpop.permute.xlu1 %900  ;;  %4388 = vset.pattern.permute.xlu1 %v6651_v56  ;;  %v4585_v56 = vadd.low.f32.bf16 %v4584_v51, %v5057_v17  ;;  %v414_v51 = vld [vmem:[%s4928_s11 + $0x40] sm:$0xff] }
  0xd4   : > { %2123 = vperm.xlu1 %4388, %v4820_v3   ;;  %3935 = vmatprep.mubr.msk.f32.mxu0 %vm430_vm12, %v414_v51  ;;  %v679_v51 = vld [vmem:[%s6634_s4 + $0x38] sm:$0xff] }
  0xd5   : > { %3947 = vmatprep.subr.mxu1 %v679_v51 }
  0xd6   : > { %3948 = vmatpush3.msra.mxu1 %v679_v51 }
  0xd7   : > { %2029 = vperm.xlu0 %4457, %v4880_v21   ;;  %v5148_v8 = vpop.permute.xlu0 %1447 }
  0xd8   : > { %6696 = vst [vmem:[#allocation15_spill] sm:$0xff] %v5148_v8  ;;  %v5154_v60 = vpop.permute.xlu1 %1076  ;;  %4389 = vset.pattern.permute.xlu1 %v6655_v0  ;;  %v1618_v0 = vmax.f32 %v4585_v56, 1.0  ;;  %v417_v8 = vld [vmem:[%s4928_s11 + $0x58] sm:$0xff] }
  0xd9   : > { %2230 = vperm.xlu1 %4389, %v5150_v52  }
  0xda   : > { %4473 = vrcp.f32 %v1618_v0  ;;  %v4586_v0 = vadd.high.f32.bf16 %v4841_v10, %v5035_v57  ;;  %v678_v10 = vld [vmem:[%s6634_s4 + $0x30] sm:$0xff]  ;;  %v419_v57 = vld [vmem:[%s4928_s11 + $0x68] sm:$0xff] }
  0xdb   : > { %2035 = vperm.xlu0 %4457, %v4915_v31   ;;  %v5160_v25 = vpop.permute.xlu0 %1453  ;;  %3949 = vmatprep.subr.mxu1 %v678_v10 }
  0xdc   : > { %6697 = vst [vmem:[#allocation16_spill] sm:$0xff] %v5160_v25  ;;  %v6705_v25 = vmov 0   ;;  %3950 = vmatpush3.msra.mxu1 %v678_v10 }
  0xdd   : > { %v5163_v54 = vpop.permute.xlu1 %1893  ;;  %4390 = vset.pattern.permute.xlu1 %v6659_v55 }
  0xde   : > { %6698 = vst [vmem:[#allocation17_spill] sm:$0xff] %v5163_v54  ;;  %2014 = vperm.xlu1 %4390, %v4832_v6  }
  0xdf   : > { %2041 = vperm.xlu0 %4457, %v4936_v35   ;;  %v5168_v9 = vpop.permute.xlu0 %1459 }
  0xe0   : > { %6699 = vst [vmem:[#allocation18_spill] sm:$0xff] %v5168_v9  ;;  %v6703_v9 = vmov 7  }
  0xe2   : > { %v5170_v1 = vpop.permute.xlu1 %1265  ;;  %4391 = vset.pattern.permute.xlu1 %v6700_v41 }
  0xe3   : > { %2047 = vperm.xlu0 %4457, %v4969_v45   ;;  %v5174_v38 = vpop.permute.xlu0 %1465  ;;  %1280 = vperm.xlu1 %4391, %v4835_v7  }
  0xe4   : > { %6701 = vst [vmem:[#allocation19_spill] sm:$0xff] %v5174_v38  ;;  %v415_v38 = vld [vmem:[%s4928_s11 + $0x48] sm:$0xff] }
  0xe5   : > { %3936 = vmatmul.mubr.msk.f32.gmra.mxu0 %vm430_vm12, %v415_v38  ;;  %v4587_v38 = vadd.high.f32.bf16 %v4586_v0, %v5051_v12 }
  0xe6   : > { %v5178_v55 = vpop.permute.xlu1 %1268 }
  0xe7   : > { %6702 = vst [vmem:[#allocation20_spill] sm:$0xff] %v5178_v55  ;;  %4462 = vset.pattern.permute.xlu0 %v6703_v9  ;;  %v5182_v56 = vpop.permute.xlu0 %1471  ;;  %4392 = vset.pattern.permute.xlu1 %v6705_v25 }
  0xe8   : > { %6704 = vst [vmem:[#allocation21_spill] sm:$0xff] %v5182_v56  ;;  %2156 = vperm.xlu0 %4462, %v4966_v44   ;;  %915 = vperm.xlu1 %4392, %v4868_v18   ;;  %v416_v56 = vld [vmem:[%s4928_s11 + $0x50] sm:$0xff]  ;;  %v6708_v44 = vmov 1  }
  0xe9   : > { %3938 = vmatprep.mubr.msk.f32.mxu0 %vm430_vm12, %v416_v56  ;;  %v6710_v56 = vlaneseq }
  0xea   : > { %3939 = vmatmul.mubr.msk.f32.gmra.mxu0 %vm430_vm12, %v417_v8  ;;  %v676_v8 = vld [vmem:[%s6634_s4 + $0x20] sm:$0xff] }
  0xeb   : > { %v5191_v26 = vpop.permute.xlu1 %2005  ;;  %v5193_v30 = vpop.permute.xlu0 %1477  ;;  %v5222_v55 = vshrl.u32 %v6710_v56, 7 }
  0xec   : > { %6706 = vst [vmem:[#allocation22_spill] sm:$0xff] %v5191_v26  ;;  %6707 = vst [vmem:[#allocation23_spill] sm:$0xff] %v5193_v30  ;;  %4463 = vset.pattern.permute.xlu0 %v6705_v25  ;;  %4393 = vset.pattern.permute.xlu1 %v6708_v44  ;;  %v4588_v30 = vadd.high.f32.bf16 %v4587_v38, %v5057_v17  ;;  %v418_v26 = vld [vmem:[%s4928_s11 + $0x60] sm:$0xff]  ;;  %v5224_v17 = vpop.eup %4473 }
  0xed   : > { %897 = vperm.xlu0 %4463, %v4823_v4   ;;  %1091 = vperm.xlu1 %4393, %v4868_v18   ;;  %v677_v4 = vld [vmem:[%s6634_s4 + $0x28] sm:$0xff]  ;;  %6711 = vst [vmem:[#allocation25_spill] sm:$0xff] %v5222_v55  ;;  %v428_v51 = vsub.s32 0, %v5222_v55 }
  0xee   : > { %3941 = vmatprep.mubr.msk.f32.mxu0 %vm430_vm12, %v418_v26  ;;  %v4589_v26 = vadd.high.f32.bf16 %v4862_v16, %v5048_v63  ;;  %v1619_v38 = vmax.f32 %v4588_v30, 1.0  ;;  %3951 = vmatprep.subr.mxu1 %v677_v4  ;;  %v675_v16 = vld [vmem:[%s6634_s4 + $0x18] sm:$0xff] }
  0xef   : > { %3942 = vmatmul.mubr.msk.f32.gmra.mxu0 %vm430_vm12, %v419_v57  ;;  %3952 = vmatpush3.msra.mxu1 %v677_v4  ;;  %v4591_v57 = vadd.high.f32.bf16 %v4888_v23, %v5063_v5  ;;  %v421_v4 = vld [vmem:[%s4928_s11 + $0x78] sm:$0xff] }
  0xf0   : > { %v5212_v12 = vpop.permute.xlu0 %1890  ;;  %v5214_v0 = vpop.permute.xlu1 %1079  ;;  %v4590_v30 = vadd.high.f32.bf16 %v4589_v26, %v5054_v14  ;;  %3953 = vmatprep.subr.mxu1 %v676_v8  ;;  %4475 = vrcp.f32 %v1619_v38  ;;  %v2324_v23 = vld [vmem:[%s6635_s5 + $0x18] sm:$0xff] }
  0xf1   : > { %6709 = vst [vmem:[#allocation24_spill] sm:$0xff] %v5214_v0  ;;  %903 = vperm.xlu0 %4463, %v4817_v2   ;;  %4394 = vset.pattern.permute.xlu1 %v6705_v25  ;;  %v405_v2 = vld [vmem:[%s6639_s9] sm:$0xff]  ;;  %v420_v0 = vld [vmem:[%s4928_s11 + $0x70] sm:$0xff]  ;;  %v3925_v58 = vpop.f32.mrf.mxu0  ;;  %v4593_v38 = vadd.high.f32.bf16 %v4591_v57, %v5071_v29  ;;  %s4629_s11 = sshll.u32 %s4699_s27, 4  ;;  %s4630_s11 = int_to_ptr.vmem [resolvable:$false] %s4629_s11 }
  0xf2   : > { %1676 = vperm.xlu1 %4394, %v5224_v17   ;;  %v5242_v54 = vrot.slane %v405_v2, %v428_v51  ;;  %3944 = vmatprep.mubr.msk.f32.mxu0 %vm430_vm12, %v420_v0  ;;  %v6714_v51 = vmov 4   ;;  %v4592_v0 = vadd.high.f32.bf16 %v4590_v30, %v5060_v24  ;;  %v673_v30 = vld [vmem:[%s6634_s4 + $0x8] sm:$0xff]  ;;  %s4631_s30 = scalar_lea.vmem %s4630_s11, 4096  ;;  %p4632_p0 = scmp.lt.s32.totalorder %s6583_s18, %s4630_s11 }
  0xf3   : > { %3954 = vmatpush3.msra.mxu1 %v676_v8  ;;  %v545_v2 = vpop.f32.mrf.mxu0  ;;  %3945 = vmatmul.mubr.msk.f32.gmra.mxu0 %vm430_vm12, %v421_v4 }
  0xf4   : > { %v5240_v10 = vpop.permute.xlu0 %1902  ;;  %3955 = vmatprep.subr.mxu1 %v675_v16  ;;  %v551_v8 = vadd.f32 %v3925_v58, %v5242_v54  ;;  %3987 = vmatprep.subr.mxu0 %v2324_v23  ;;  %v2323_v58 = vld [vmem:[%s6635_s5 + $0x10] sm:$0xff] }
  0xf5   : > { %6712 = vst [vmem:[#allocation26_spill] sm:$0xff] %v5240_v10  ;;  %906 = vperm.xlu0 %4463, %v4820_v3   ;;  %v5252_v55 = vpop.permute.xlu1 %1441  ;;  %v674_v10 = vld [vmem:[%s6634_s4 + $0x10] sm:$0xff]  ;;  %v546_v3 = vadd.f32 %v545_v2, %v5242_v54  ;;  %3956 = vmatpush3.msra.mxu1 %v675_v16  ;;  %v1621_v16 = vmax.f32 %v4592_v0, 1.0  ;;  %v4594_v0 = vadd.high.f32.bf16 %v4593_v38, %v5078_v36 }
  0xf6   : > { %6713 = vst [vmem:[#allocation27_spill] sm:$0xff] %v5252_v55  ;;  %4395 = vset.pattern.permute.xlu1 %v6714_v51  ;;  %3957 = vmatprep.subr.mxu1 %v674_v10  ;;  %vm625_vm2 = vcmp.gt.f32.partialorder %v551_v8, 0.0 }
  0xf7   : > { %1796 = vperm.xlu1 %4395, %v4868_v18   ;;  %3958 = vmatpush3.msra.mxu1 %v674_v10  ;;  %v640_v57 = vmul.f32 0.01, %v546_v3  ;;  %v2322_v10 = vld [vmem:[%s6635_s5 + $0x8] sm:$0xff]  ;;  %vm624_vm1 = vcmp.gt.f32.partialorder %v546_v3, 0.0  ;;  %4477 = vrcp.f32 %v1621_v16  ;;  %v1623_v38 = vmax.f32 %v4594_v0, 1.0 }
  0xf8   : > { %v5265_v26 = vpop.permute.xlu0 %1905  ;;  %3988 = vmatpush3.msra.mxu0 %v2324_v23  ;;  %3959 = vmatprep.subr.mxu1 %v673_v30 }
  0xf9   : > { %6715 = vst [vmem:[#allocation28_spill] sm:$0xff] %v5265_v26  ;;  %912 = vperm.xlu0 %4463, %v4835_v7   ;;  %v641_v26 = vmul.f32 0.01, %v551_v8  ;;  %3989 = vmatprep.subr.mxu0 %v2323_v58  ;;  %v656_v23 = vsel %vm624_vm1, %v546_v3, %v640_v57  ;;  %4479 = vrcp.f32 %v1623_v38  ;;  %v4602_v38 = vadd.low.f32.bf16 %v4977_v46, %v5111_v11 }
  0xfa   : > { %v5274_v2 = vpop.permute.xlu1 %1896  ;;  %3960 = vmatpush3.msra.mxu1 %v673_v30  ;;  %3990 = vmatpush3.msra.mxu0 %v2323_v58  ;;  %v4595_v30 = vadd.high.f32.bf16 %v4903_v27, %v5068_v28  ;;  %v4605_v46 = vadd.high.f32.bf16 %v4980_v47, %v5111_v11 }
  0xfb   : > { %6716 = vst [vmem:[#allocation29_spill] sm:$0xff] %v5274_v2  ;;  %4396 = vset.pattern.permute.xlu1 %v6703_v9  ;;  %v672_v2 = vld [vmem:[%s6634_s4] sm:$0xff]  ;;  %3991 = vmatprep.subr.mxu0 %v2322_v10  ;;  %v657_v55 = vsel %vm625_vm2, %v551_v8, %v641_v26 }
  0xfc   : > { %2126 = vperm.xlu1 %4396, %v4832_v6   ;;  %v5281_v4 = vpop.permute.xlu0 %1908  ;;  %3961 = vmatprep.subr.mxu1 %v672_v2  ;;  %v4596_v26 = vadd.high.f32.bf16 %v4595_v30, %v5075_v33 }
  0xfd   : > { %6717 = vst [vmem:[#allocation30_spill] sm:$0xff] %v5281_v4  ;;  %1671 = vperm.xlu0 %4463, %v5150_v52   ;;  %3962 = vmatpush3.msra.mxu1 %v672_v2  ;;  %v2321_v52 = vld [vmem:[%s6635_s5] sm:$0xff]  ;;  %v4476_v3 = vpop.eup %4475 }
  0xfe   : > { %3963 = vmatprep.mubr.msk.f32.mxu1 %vm684_vm3, %v656_v23  ;;  %3992 = vmatpush3.msra.mxu0 %v2322_v10  ;;  %v4598_v27 = vadd.high.f32.bf16 %v4596_v26, %v5084_v37  ;;  %v6721_v10 = vmov 3  }
  0xff   : > { %v5291_v6 = vpop.permute.xlu1 %2114  ;;  %3964 = vmatmul.mubr.msk.f32.vlgmr.msra.gmra.mxu1 %vm684_vm3, %v657_v55  ;;  %3993 = vmatprep.subr.mxu0 %v2321_v52 }
 0x100   : > { %4397 = vset.pattern.permute.xlu1 %v6714_v51  ;;  %v5294_v4 = vpop.permute.xlu0 %1911  ;;  %3994 = vmatpush3.msra.mxu0 %v2321_v52  ;;  %v1625_v57 = vmax.f32 %v4598_v27, 1.0  ;;  %v4601_v52 = vadd.high.f32.bf16 %v4960_v42, %v5092_v48  ;;  %v3928_v27 = vpop.f32.mrf.mxu0 }
 0x101   : > { %6718 = vst [vmem:[#allocation31_spill] sm:$0xff] %v5294_v4  ;;  %918 = vperm.xlu0 %4463, %v4871_v19   ;;  %2234 = vperm.xlu1 %4397, %v5224_v17   ;;  %v4597_v17 = vadd.high.f32.bf16 %v4947_v39, %v5086_v43  ;;  %v561_v42 = vadd.f32 %v3928_v27, %v5242_v54 }
 0x102   : > { %4481 = vrcp.f32 %v1625_v57  ;;  %v4603_v26 = vadd.high.f32.bf16 %v4601_v52, %v5099_v50 }
 0x103   : > { %v4599_v58 = vadd.high.f32.bf16 %v4597_v17, %v5094_v49  ;;  %vm627_vm4 = vcmp.gt.f32.partialorder %v561_v42, 0.0 }
 0x104   : > { %v5306_v8 = vpop.permute.xlu1 %1082  ;;  %v5308_v2 = vpop.permute.xlu0 %1914  ;;  %v4604_v57 = vadd.high.f32.bf16 %v4603_v26, %v5108_v32 }
 0x105   : > { %6719 = vst [vmem:[#allocation32_spill] sm:$0xff] %v5308_v2  ;;  %1681 = vperm.xlu0 %4463, %v4476_v3   ;;  %4398 = vset.pattern.permute.xlu1 %v6708_v44  ;;  %v5323_v39 = vpop.eup %4477  ;;  %v4600_v23 = vadd.high.f32.bf16 %v4599_v58, %v5101_v53 }
 0x106   : > { %1094 = vperm.xlu1 %4398, %v4871_v19   ;;  %v5341_v58 = vpop.eup %4479  ;;  %v1629_v11 = vmax.f32 %v4604_v57, 1.0 }
 0x107   : > { %v1627_v17 = vmax.f32 %v4600_v23, 1.0 }
 0x108   : > { %v5315_v55 = vpop.permute.xlu0 %1917 }
 0x109   : > { %6720 = vst [vmem:[#allocation33_spill] sm:$0xff] %v5315_v55  ;;  %924 = vperm.xlu0 %4463, %v4880_v21   ;;  %v5319_v16 = vpop.permute.xlu1 %1444  ;;  %4483 = vrcp.f32 %v1627_v17 }
 0x10a   : > { %4399 = vset.pattern.permute.xlu1 %v6721_v10  ;;  %4485 = vrcp.f32 %v1629_v11 }
 0x10b   : > { %1456 = vperm.xlu1 %4399, %v4835_v7  }
 0x10c   : > { %v5325_v0 = vpop.permute.xlu0 %1920 }
 0x10d   : > { %6722 = vst [vmem:[#allocation34_spill] sm:$0xff] %v5325_v0  ;;  %1691 = vperm.xlu0 %4463, %v5323_v39   ;;  %v4606_v0 = vadd.low.f32.bf16 %v4602_v38, %v5118_v34  ;;  %v4607_v38 = vadd.high.f32.bf16 %v4605_v46, %v5118_v34 }
 0x10e   : > { %v5331_v21 = vpop.permute.xlu1 %1899 }
 0x10f   : > { %4400 = vset.pattern.permute.xlu1 %v6714_v51  ;;  %v4608_v26 = vadd.low.f32.bf16 %v4606_v0, %v5116_v13  ;;  %v4611_v0 = vadd.high.f32.bf16 %v4607_v38, %v5116_v13 }
 0x110   : > { %1799 = vperm.xlu1 %4400, %v4871_v19   ;;  %v5337_v30 = vpop.permute.xlu0 %1923 }
 0x111   : > { %6723 = vst [vmem:[#allocation35_spill] sm:$0xff] %v5337_v30  ;;  %930 = vperm.xlu0 %4463, %v4915_v31   ;;  %v555_v30 = vpop.f32.mrf.mxu0  ;;  %v643_v31 = vmul.f32 0.01, %v561_v42  ;;  %v1630_v17 = vmax.f32 %v4608_v26, 1.0 }
 0x112   : > { %v556_v52 = vadd.f32 %v555_v30, %v5242_v54  ;;  %v4609_v30 = vadd.low.f32.bf16 %v4859_v15, %v5048_v63  ;;  %v6728_v63 = vmov 6  }
 0x113   : > { %v5348_v55 = vpop.permute.xlu1 %2117  ;;  %v659_v32 = vsel %vm627_vm4, %v561_v42, %v643_v31  ;;  %4487 = vrcp.f32 %v1630_v17 }
 0x114   : > { %4401 = vset.pattern.permute.xlu1 %v6703_v9  ;;  %v5351_v23 = vpop.permute.xlu0 %1926  ;;  %vm626_vm5 = vcmp.gt.f32.partialorder %v556_v52, 0.0  ;;  %v642_v47 = vmul.f32 0.01, %v556_v52  ;;  %v4610_v34 = vadd.low.f32.bf16 %v4609_v30, %v5054_v14 }
 0x115   : > { %6724 = vst [vmem:[#allocation36_spill] sm:$0xff] %v5351_v23  ;;  %1701 = vperm.xlu0 %4463, %v5341_v58   ;;  %2129 = vperm.xlu1 %4401, %v4835_v7   ;;  %v5367_v7 = vpop.eup %4481 }
 0x116   : > { %v658_v23 = vsel %vm626_vm5, %v556_v52, %v642_v47  ;;  %6726 = vst [vmem:[#allocation38_spill] sm:$0xff] %v5367_v7  ;;  %v4612_v15 = vadd.low.f32.bf16 %v4610_v34, %v5060_v24 }
 0x117   : > { %3966 = vmatprep.mubr.msk.f32.mxu1 %vm684_vm3, %v658_v23 }
 0x118   : > { %v5358_v27 = vpop.permute.xlu1 %2008  ;;  %v5360_v2 = vpop.permute.xlu0 %1929  ;;  %3967 = vmatmul.mubr.msk.f32.gmra.mxu1 %vm684_vm3, %v659_v32  ;;  %v1620_v13 = vmax.f32 %v4612_v15, 1.0  ;;  %v4566_v15 = vld [vmem:[%s4814_s29 + $0x30] sm:$0xff] }
 0x119   : > { %6725 = vst [vmem:[#allocation37_spill] sm:$0xff] %v5360_v2  ;;  %936 = vperm.xlu0 %4463, %v4936_v35   ;;  %4402 = vset.pattern.permute.xlu1 %v6714_v51  ;;  %v5383_v32 = vpop.eup %4483 }
 0x11a   : > { %2238 = vperm.xlu1 %4402, %v4476_v3   ;;  %v1631_v3 = vmax.f32 %v4611_v0, 1.0  ;;  %6730 = vst [vmem:[#allocation41_spill] sm:$0xff] %v5383_v32  ;;  %v5394_v46 = vpop.eup %4485 }
 0x11b   : > { %6731 = vst [vmem:[#allocation42_spill] sm:$0xff] %v5394_v46 }
 0x11c   : > { %v5372_v42 = vpop.permute.xlu0 %1932  ;;  %4489 = vrcp.f32 %v1631_v3 }
 0x11d   : > { %6727 = vst [vmem:[#allocation39_spill] sm:$0xff] %v5372_v42  ;;  %1711 = vperm.xlu0 %4463, %v5367_v7   ;;  %v5376_v35 = vpop.permute.xlu1 %1274  ;;  %4491 = vrcp.f32 %v1620_v13 }
 0x11e   : > { %4403 = vset.pattern.permute.xlu1 %v6728_v63 }
 0x11f   : > { %2020 = vperm.xlu1 %4403, %v4868_v18  }
 0x120   : > { %v5380_v14 = vpop.permute.xlu0 %1935  ;;  %v5401_v23 = vpop.eup %4487 }
 0x121   : > { %6729 = vst [vmem:[#allocation40_spill] sm:$0xff] %v5380_v14  ;;  %942 = vperm.xlu0 %4463, %v4969_v45   ;;  %6732 = vst [vmem:[#allocation43_spill] sm:$0xff] %v5401_v23 }
 0x122   : > { %v5385_v57 = vpop.permute.xlu1 %909 }
 0x123   : > { %4404 = vset.pattern.permute.xlu1 %v6700_v41 }
 0x124   : > { %1286 = vperm.xlu1 %4404, %v4871_v19  }
 0x125   : > { %1721 = vperm.xlu0 %4463, %v5383_v32   ;;  %v5390_v24 = vpop.permute.xlu0 %1271 }
 0x127   : > { %v5392_v18 = vpop.permute.xlu1 %1085 }
 0x128   : > { %4405 = vset.pattern.permute.xlu1 %v6705_v25 }
 0x129   : > { %1731 = vperm.xlu0 %4463, %v5394_v46   ;;  %v5398_v45 = vpop.permute.xlu0 %1277  ;;  %921 = vperm.xlu1 %4405, %v4877_v20   ;;  %v5410_v52 = vpop.eup %4489 }
 0x12a   : > { %6734 = vst [vmem:[#allocation45_spill] sm:$0xff] %v5410_v52  ;;  %v4492_v38 = vpop.eup %4491  ;;  %v3931_v46 = vpop.f32.mrf.mxu0 }
 0x12c   : > { %v5403_v19 = vpop.permute.xlu1 %1790  ;;  %v565_v32 = vpop.f32.mrf.mxu0 }
 0x12d   : > { %1736 = vperm.xlu0 %4463, %v5401_v23   ;;  %v5406_v31 = vpop.permute.xlu0 %1283  ;;  %4406 = vset.pattern.permute.xlu1 %v6708_v44  ;;  %v566_v48 = vadd.f32 %v565_v32, %v5242_v54 }
 0x12e   : > { %6733 = vst [vmem:[#allocation44_spill] sm:$0xff] %v5406_v31  ;;  %1097 = vperm.xlu1 %4406, %v4877_v20   ;;  %v5425_v20 = vld [vmem:[%s4814_s29 + $0x40] sm:$0xff] }
 0x12f   : > { %vm628_vm7 = vcmp.gt.f32.partialorder %v566_v48, 0.0 }
 0x131   : > { %1741 = vperm.xlu0 %4463, %v5410_v52   ;;  %v5413_v47 = vpop.permute.xlu1 %2120  ;;  %v5415_v11 = vpop.permute.xlu0 %1289 }
 0x132   : > { %6735 = vst [vmem:[#allocation46_spill] sm:$0xff] %v5415_v11  ;;  %4407 = vset.pattern.permute.xlu1 %v6705_v25  ;;  %v571_v11 = vadd.f32 %v3931_v46, %v5242_v54 }
 0x133   : > { %1686 = vperm.xlu1 %4407, %v4492_v38  }
 0x134   : > { %v645_v50 = vmul.f32 0.01, %v571_v11  ;;  %vm629_vm6 = vcmp.gt.f32.partialorder %v571_v11, 0.0 }
 0x135   : > { %v5418_v26 = vpop.permute.xlu0 %1295  ;;  %4468 = vset.pattern.permute.xlu0 %v6714_v51 }
 0x136   : > { %6736 = vst [vmem:[#allocation47_spill] sm:$0xff] %v5418_v26  ;;  %v5421_v30 = vpop.permute.xlu1 %1088  ;;  %v5445_v26 = vld [vmem:[%s4814_s29 + $0x48] sm:$0xff]  ;;  %v661_v53 = vsel %vm629_vm6, %v571_v11, %v645_v50 }
 0x137   : > { %4408 = vset.pattern.permute.xlu1 %v6714_v51 }
 0x138   : > { %1802 = vperm.xlu1 %4408, %v5425_v20  }
 0x139   : > { %v5428_v34 = vpop.permute.xlu0 %1301 }
 0x13a   : > { %6737 = vst [vmem:[#allocation48_spill] sm:$0xff] %v5428_v34 }
 0x13b   : > { %v5430_v0 = vpop.permute.xlu1 %1666 }
 0x13c   : > { %4409 = vset.pattern.permute.xlu1 %v6703_v9 }
 0x13d   : > { %v5433_v17 = vpop.permute.xlu0 %1307  ;;  %2132 = vperm.xlu1 %4409, %v4566_v15   ;;  %v4568_v15 = vld [vmem:[%s4814_s29 + $0x38] sm:$0xff] }
 0x13e   : > { %6738 = vst [vmem:[#allocation49_spill] sm:$0xff] %v5433_v17 }
 0x140   : > { %v5436_v3 = vpop.permute.xlu1 %2226 }
 0x141   : > { %4410 = vset.pattern.permute.xlu1 %v6714_v51 }
 0x142   : > { %v2003_v13 = vpop.permute.xlu0 %2002  ;;  %2242 = vperm.xlu1 %4410, %v4492_v38  }
 0x145   : > { %v5439_v14 = vpop.permute.xlu1 %1450 }
 0x146   : > { %v5441_v42 = vpop.permute.xlu0 %2011  ;;  %4411 = vset.pattern.permute.xlu1 %v6708_v44 }
 0x147   : > { %1100 = vperm.xlu1 %4411, %v5445_v26  }
 0x14a   : > { %v5448_v52 = vpop.permute.xlu1 %1793  ;;  %v5450_v17 = vpop.permute.xlu0 %2017 }
 0x14b   : > { %4412 = vset.pattern.permute.xlu1 %v6721_v10 }
 0x14c   : > { %1462 = vperm.xlu1 %4412, %v4568_v15  }
 0x14e   : > { %v5454_v23 = vpop.permute.xlu0 %2023 }
 0x14f   : > { %6739 = vst [vmem:[#allocation50_spill] sm:$0xff] %v5454_v23  ;;  %v5456_v38 = vpop.permute.xlu1 %2123  ;;  %v4613_v23 = vadd.low.f32.bf16 %v4885_v22, %v5063_v5  ;;  %v5481_v22 = vand.u32 127, %v6710_v56  ;;  %v6746_v56 = vmov 0.0  }
 0x150   : > { %4413 = vset.pattern.permute.xlu1 %v6714_v51 }
 0x151   : > { %1805 = vperm.xlu1 %4413, %v5445_v26   ;;  %v4614_v7 = vadd.low.f32.bf16 %v4613_v23, %v5071_v29  ;;  %v5489_v29 = vadd.s32 4294967280, %v5481_v22  ;;  %vm1120_vm11 = vcmp.eq.s32.totalorder %v5122_v62, %v5481_v22  ;;  %vm1312_vm14 = vcmp.eq.s32.totalorder %v5170_v1, %v5481_v22 }
 0x152   : > { %v5460_v2 = vpop.permute.xlu0 %2029  ;;  %v3612_v62 = vsel %vm1120_vm11, 1.0, %v6746_v56  ;;  %vm945_vm1 = vcmp.eq.s32.totalorder %v5142_v59, %v5481_v22  ;;  %vm1121_vm2 = vcmp.eq.s32.totalorder %v5154_v60, %v5481_v22  ;;  %vm1314_vm11 = vcmp.eq.s32.totalorder %v5390_v24, %v5481_v22 }
 0x153   : > { %6740 = vst [vmem:[#allocation51_spill] sm:$0xff] %v5460_v2  ;;  %v644_v2 = vmul.f32 0.01, %v566_v48  ;;  %v4615_v5 = vadd.low.f32.bf16 %v4614_v7, %v5078_v36  ;;  %vm1937_vm8 = vcmp.eq.s32.totalorder %v5212_v12, %v5489_v29  ;;  %vm1825_vm9 = vcmp.eq.s32.totalorder %v5129_v40, %v5489_v29 }
 0x154   : > { %v5463_v34 = vpop.permute.xlu1 %2230  ;;  %vm2049_vm10 = vcmp.eq.s32.totalorder %v2003_v13, %v5489_v29  ;;  %v3661_v12 = vsel %vm1825_vm9, 1.0, %v6746_v56  ;;  %vm1826_vm13 = vcmp.eq.s32.totalorder %v5126_v61, %v5489_v29  ;;  %vm2161_vm15 = vcmp.eq.s32.totalorder %v5291_v6, %v5489_v29  ;;  %v6752_v6 = vld [vmem:[#allocation20_spill] sm:$0xff] }
 0x155   : > { %4414 = vset.pattern.permute.xlu1 %v6703_v9  ;;  %v660_v46 = vsel %vm628_vm7, %v566_v48, %v644_v2  ;;  %v1622_v50 = vmax.f32 %v4615_v5, 1.0  ;;  %v3677_v2 = vsel %vm1937_vm8, 1.0, %v6746_v56  ;;  %v3662_v13 = vsel %vm1826_vm13, 1.0, %v6746_v56 }
 0x156   : > { %2135 = vperm.xlu1 %4414, %v4568_v15   ;;  %v5469_v4 = vpop.permute.xlu0 %2035  ;;  %3969 = vmatprep.mubr.msk.f32.mxu1 %vm684_vm3, %v660_v46  ;;  %v1985_v40 = vadd.f32 %v3677_v2, %v3661_v12  ;;  %v5523_v15 = vld [vmem:[%s4814_s29 + $0x50] sm:$0xff]  ;;  %v6750_v2 = vld [vmem:[#allocation17_spill] sm:$0xff]  ;;  %v3628_v12 = vsel %vm1312_vm14, 1.0, %v6746_v56  ;;  %v3709_v59 = vsel %vm2161_vm15, 1.0, %v6746_v56  ;;  %vm1313_vm9 = vcmp.eq.s32.totalorder %v6752_v6, %v5481_v22 }
 0x157   : > { %6741 = vst [vmem:[#allocation52_spill] sm:$0xff] %v5469_v4  ;;  %3970 = vmatmul.mubr.msk.f32.gmra.mxu1 %vm684_vm3, %v661_v53  ;;  %4493 = vrcp.f32 %v1622_v50  ;;  %v6748_v46 = vld [vmem:[#allocation27_spill] sm:$0xff]  ;;  %v6749_v50 = vld [vmem:[#allocation13_spill] sm:$0xff]  ;;  %vm1938_vm6 = vcmp.eq.s32.totalorder %v6750_v2, %v5489_v29  ;;  %vm1489_vm14 = vcmp.eq.s32.totalorder %v5319_v16, %v5481_v22  ;;  %vm2162_vm15 = vcmp.eq.s32.totalorder %v5348_v55, %v5489_v29 }
 0x158   : > { %vm1488_vm4 = vcmp.eq.s32.totalorder %v6748_v46, %v5481_v22  ;;  %vm1827_vm5 = vcmp.eq.s32.totalorder %v6749_v50, %v5489_v29  ;;  %v3613_v46 = vsel %vm1121_vm2, 1.0, %v6746_v56  ;;  %v3630_v6 = vsel %vm1314_vm11, 1.0, %v6746_v56 }
 0x159   : > { %v5471_v31 = vpop.permute.xlu1 %2014  ;;  %v3644_v1 = vsel %vm1488_vm4, 1.0, %v6746_v56  ;;  %vm2163_vm2 = vcmp.eq.s32.totalorder %v5413_v47, %v5489_v29  ;;  %vm1491_vm11 = vcmp.eq.s32.totalorder %v5439_v14, %v5481_v22 }
 0x15a   : > { %4415 = vset.pattern.permute.xlu1 %v6714_v51  ;;  %v5475_v49 = vpop.permute.xlu0 %2041 }
 0x15b   : > { %6742 = vst [vmem:[#allocation53_spill] sm:$0xff] %v5475_v49  ;;  %2246 = vperm.xlu1 %4415, %v5323_v39   ;;  %v3693_v39 = vsel %vm2049_vm10, 1.0, %v6746_v56 }
 0x15c   : > { %v2097_v11 = vadd.f32 %v3693_v39, %v1985_v40  ;;  %v6751_v39 = vld [vmem:[#allocation24_spill] sm:$0xff] }
 0x15d   : > { %vm1122_vm7 = vcmp.eq.s32.totalorder %v6751_v39, %v5481_v22  ;;  %v3629_v39 = vsel %vm1313_vm9, 1.0, %v6746_v56  ;;  %vm2052_vm9 = vcmp.eq.s32.totalorder %v5441_v42, %v5489_v29 }
 0x15e   : > { %v5484_v32 = vpop.permute.xlu1 %1280  ;;  %v5486_v48 = vpop.permute.xlu0 %2047  ;;  %v2209_v40 = vadd.f32 %v3709_v59, %v2097_v11  ;;  %v6754_v59 = vld [vmem:[#allocation29_spill] sm:$0xff] }
 0x15f   : > { %6743 = vst [vmem:[#allocation54_spill] sm:$0xff] %v5486_v48  ;;  %4416 = vset.pattern.permute.xlu1 %v6728_v63  ;;  %vm1939_vm13 = vcmp.eq.s32.totalorder %v6754_v59, %v5489_v29 }
 0x160   : > { %2026 = vperm.xlu1 %4416, %v5425_v20  }
 0x163   : > { %v5498_v36 = vpop.permute.xlu0 %2156  ;;  %v5500_v53 = vpop.permute.xlu1 %915 }
 0x164   : > { %6744 = vst [vmem:[#allocation55_spill] sm:$0xff] %v5498_v36  ;;  %6745 = vst [vmem:[#allocation56_spill] sm:$0xff] %v5500_v53  ;;  %4417 = vset.pattern.permute.xlu1 %v6700_v41  ;;  %v6753_v36 = vld [vmem:[#allocation22_spill] sm:$0xff]  ;;  %v4494_v4 = vpop.eup %4493 }
 0x165   : > { %1292 = vperm.xlu1 %4417, %v5445_v26   ;;  %vm2050_vm10 = vcmp.eq.s32.totalorder %v6753_v36, %v5489_v29  ;;  %v2289_v36 = vmul.f32 %v5436_v3, %v2209_v40  ;;  %v3663_v3 = vsel %vm1827_vm5, 1.0, %v6746_v56  ;;  %vm1123_vm5 = vcmp.eq.s32.totalorder %v5306_v8, %v5481_v22 }
 0x168   : > { %v898_v7 = vpop.permute.xlu0 %897  ;;  %v5511_v23 = vpop.permute.xlu1 %1091 }
 0x169   : > { %6747 = vst [vmem:[#allocation57_spill] sm:$0xff] %v5511_v23  ;;  %vm944_vm0 = vcmp.eq.s32.totalorder %v898_v7, %v5481_v22  ;;  %4418 = vset.pattern.permute.xlu1 %v6705_v25 }
 0x16a   : > { %v3580_v61 = vsel %vm944_vm0, 1.0, %v6746_v56  ;;  %927 = vperm.xlu1 %4418, %v5523_v15  }
 0x16b   : > { %v1168_v5 = vadd.f32 %v3612_v62, %v3580_v61  ;;  %v3581_v61 = vsel %vm945_vm1, 1.0, %v6746_v56  ;;  %vm2051_vm1 = vcmp.eq.s32.totalorder %v5358_v27, %v5489_v29  ;;  %v3710_v27 = vsel %vm2162_vm15, 1.0, %v6746_v56 }
 0x16c   : > { %v904_v60 = vpop.permute.xlu0 %903  ;;  %v1169_v53 = vadd.f32 %v3613_v46, %v3581_v61  ;;  %vm1124_vm15 = vcmp.eq.s32.totalorder %v5392_v18, %v5481_v22 }
 0x16d   : > { %v1360_v7 = vadd.f32 %v3628_v12, %v1168_v5  ;;  %vm946_vm8 = vcmp.eq.s32.totalorder %v904_v60, %v5481_v22  ;;  %v1677_v62 = vpop.permute.xlu1 %1676  ;;  %v3678_v5 = vsel %vm1938_vm6, 1.0, %v6746_v56  ;;  %v3614_v12 = vsel %vm1122_vm7, 1.0, %v6746_v56 }
 0x16e   : > { %v3582_v48 = vsel %vm946_vm8, 1.0, %v6746_v56  ;;  %4419 = vset.pattern.permute.xlu1 %v6708_v44  ;;  %v1986_v23 = vadd.f32 %v3678_v5, %v3662_v13  ;;  %v3645_v13 = vsel %vm1489_vm14, 1.0, %v6746_v56  ;;  %v1361_v50 = vadd.f32 %v3629_v39, %v1169_v53 }
 0x16f   : > { %v1536_v11 = vadd.f32 %v3644_v1, %v1360_v7  ;;  %1103 = vperm.xlu1 %4419, %v5523_v15   ;;  %v1170_v60 = vadd.f32 %v3614_v12, %v3582_v48  ;;  %v6755_v7 = vld [vmem:[#allocation15_spill] sm:$0xff]  ;;  %v3694_v1 = vsel %vm2050_vm10, 1.0, %v6746_v56  ;;  %v3679_v48 = vsel %vm1939_vm13, 1.0, %v6746_v56 }
 0x170   : > { %v907_v24 = vpop.permute.xlu0 %906  ;;  %vm1490_vm0 = vcmp.eq.s32.totalorder %v6755_v7, %v5481_v22  ;;  %v2098_v61 = vadd.f32 %v3694_v1, %v1986_v23  ;;  %v1987_v55 = vadd.f32 %v3679_v48, %v3663_v3  ;;  %v1537_v12 = vadd.f32 %v3645_v13, %v1361_v50  ;;  %v6756_v13 = vld [vmem:[#allocation14_spill] sm:$0xff] }
 0x171   : > { %v1744_v2 = vmul.f32 %v5430_v0, %v1536_v11  ;;  %v1362_v46 = vadd.f32 %v3630_v6, %v1170_v60  ;;  %v3646_v16 = vsel %vm1490_vm0, 1.0, %v6746_v56  ;;  %v3695_v11 = vsel %vm2051_vm1, 1.0, %v6746_v56 }
 0x172   : > { %v5580_v49 = vpop.permute.xlu1 %1796  ;;  %v2210_v5 = vadd.f32 %v3710_v27, %v2098_v61  ;;  %v3711_v53 = vsel %vm2163_vm2, 1.0, %v6746_v56  ;;  %v2099_v47 = vadd.f32 %v3695_v11, %v1987_v55  ;;  %vm947_vm4 = vcmp.eq.s32.totalorder %v907_v24, %v5481_v22 }
 0x173   : > { %4420 = vset.pattern.permute.xlu1 %v6705_v25  ;;  %v2305_v0 = vadd.f32 %v2289_v36, %v1744_v2  ;;  %v1538_v2 = vadd.f32 %v3646_v16, %v1362_v46  ;;  %vm1828_vm6 = vcmp.eq.s32.totalorder %v6756_v13, %v5489_v29  ;;  %vm1940_vm7 = vcmp.eq.s32.totalorder %v5331_v21, %v5489_v29 }
 0x174   : > { %v5601_v40 = vpop.permute.xlu0 %912  ;;  %1696 = vperm.xlu1 %4420, %v4494_v4   ;;  %v2290_v36 = vmul.f32 %v5463_v34, %v2210_v5  ;;  %v2211_v39 = vadd.f32 %v3711_v53, %v2099_v47  ;;  %vm1315_vm8 = vcmp.eq.s32.totalorder %v5376_v35, %v5481_v22  ;;  %v3664_v27 = vsel %vm1828_vm6, 1.0, %v6746_v56 }
 0x175   : > { %3995 = vmatprep.mubr.msk.f32.mxu0 %vm430_vm12, %v2305_v0  ;;  %v1746_v6 = vmul.f32 %v1677_v62, %v1538_v2  ;;  %v5631_v62 = vld [vmem:[%s4814_s29 + $0x58] sm:$0xff]  ;;  %v3680_v50 = vsel %vm1940_vm7, 1.0, %v6746_v56  ;;  %vm2164_vm10 = vcmp.eq.s32.totalorder %v5456_v38, %v5489_v29  ;;  %v3631_v21 = vsel %vm1315_vm8, 1.0, %v6746_v56 }
 0x176   : > { %v3696_v35 = vsel %vm2052_vm9, 1.0, %v6746_v56  ;;  %v1988_v46 = vadd.f32 %v3680_v50, %v3664_v27  ;;  %v3712_v11 = vsel %vm2164_vm10, 1.0, %v6746_v56  ;;  %v3647_v38 = vsel %vm1491_vm11, 1.0, %v6746_v56 }
 0x177   : > { %v5611_v59 = vpop.permute.xlu1 %2126  ;;  %vm948_vm0 = vcmp.eq.s32.totalorder %v5385_v57, %v5481_v22  ;;  %v2591_v57 = vld [vmem:[%s6636_s6 + $0x48] sm:$0xff]  ;;  %vm1316_vm2 = vcmp.eq.s32.totalorder %v5398_v45, %v5481_v22  ;;  %vm2053_vm8 = vcmp.eq.s32.totalorder %v5471_v31, %v5489_v29 }
 0x178   : > { %v1672_v23 = vpop.permute.xlu0 %1671  ;;  %4421 = vset.pattern.permute.xlu1 %v6714_v51  ;;  %v2100_v55 = vadd.f32 %v3696_v35, %v1988_v46  ;;  %v5700_v35 = vld [vmem:[%s4814_s29 + $0x60] sm:$0xff]  ;;  %vm2165_vm9 = vcmp.eq.s32.totalorder %v5611_v59, %v5489_v29 }
 0x179   : > { %v1745_v60 = vmul.f32 %v1672_v23, %v1537_v12  ;;  %1808 = vperm.xlu1 %4421, %v5523_v15   ;;  %v2594_v46 = vld [vmem:[%s6636_s6 + $0x60] sm:$0xff] }
 0x17a   : > { %v2212_v53 = vadd.f32 %v3712_v11, %v2100_v55  ;;  %v2593_v55 = vld [vmem:[%s6636_s6 + $0x58] sm:$0xff] }
 0x17b   : > { %v2306_v7 = vadd.f32 %v2290_v36, %v1745_v60 }
 0x17c   : > { %v2235_v1 = vpop.permute.xlu1 %2234  ;;  %v5649_v61 = vpop.permute.xlu0 %918 }
 0x17d   : > { %v2291_v0 = vmul.f32 %v2235_v1, %v2211_v39  ;;  %3996 = vmatmul.mubr.msk.f32.vlgmr.msra.gmra.mxu0 %vm430_vm12, %v2306_v7  ;;  %4422 = vset.pattern.permute.xlu1 %v6703_v9 }
 0x17e   : > { %2138 = vperm.xlu1 %4422, %v5425_v20   ;;  %v3583_v20 = vsel %vm947_vm4, 1.0, %v6746_v56  ;;  %vm1829_vm4 = vcmp.eq.s32.totalorder %v5403_v19, %v5489_v29  ;;  %v2589_v19 = vld [vmem:[%s6636_s6 + $0x38] sm:$0xff] }
 0x17f   : > { %v2307_v3 = vadd.f32 %v2291_v0, %v1746_v6 }
 0x180   : > { %v1682_v5 = vpop.permute.xlu0 %1681 }
 0x181   : > { %v5620_v48 = vpop.permute.xlu1 %1094  ;;  %3998 = vmatprep.mubr.msk.f32.mxu0 %vm430_vm12, %v2307_v3 }
 0x182   : > { %4423 = vset.pattern.permute.xlu1 %v6714_v51 }
 0x183   : > { %2250 = vperm.xlu1 %4423, %v4494_v4   ;;  %v3615_v4 = vsel %vm1123_vm5, 1.0, %v6746_v56 }
 0x184   : > { %v1171_v8 = vadd.f32 %v3615_v4, %v3583_v20  ;;  %v6757_v20 = vld [vmem:[#allocation5_spill] sm:$0xff] }
 0x185   : > { %v4616_v13 = vadd.low.f32.bf16 %v6757_v20, %v5068_v28 }
 0x186   : > { %v5625_v34 = vpop.permute.xlu1 %1456  ;;  %v1363_v42 = vadd.f32 %v3631_v21, %v1171_v8 }
 0x187   : > { %4424 = vset.pattern.permute.xlu1 %v6708_v44  ;;  %v3934_v23 = vpop.f32.mrf.mxu0 }
 0x188   : > { %1106 = vperm.xlu1 %4424, %v5631_v62   ;;  %v1539_v12 = vadd.f32 %v3647_v38, %v1363_v42  ;;  %v581_v36 = vadd.f32 %v3934_v23, %v5242_v54  ;;  %v2592_v38 = vld [vmem:[%s6636_s6 + $0x50] sm:$0xff] }
 0x189   : > { %v575_v60 = vpop.f32.mrf.mxu0 }
 0x18a   : > { %v1747_v14 = vmul.f32 %v1682_v5, %v1539_v12  ;;  %vm631_vm13 = vcmp.gt.f32.partialorder %v581_v36, 0.0  ;;  %v647_v7 = vmul.f32 0.01, %v581_v36  ;;  %v576_v39 = vadd.f32 %v575_v60, %v5242_v54  ;;  %v6758_v12 = vld [vmem:[#allocation26_spill] sm:$0xff] }
 0x18b   : > { %v5640_v24 = vpop.permute.xlu1 %1799  ;;  %vm1941_vm1 = vcmp.eq.s32.totalorder %v6758_v12, %v5489_v29  ;;  %v2588_v12 = vld [vmem:[%s6636_s6 + $0x30] sm:$0xff] }
 0x18c   : > { %4425 = vset.pattern.permute.xlu1 %v6721_v10  ;;  %vm630_vm14 = vcmp.gt.f32.partialorder %v576_v39, 0.0  ;;  %v646_v6 = vmul.f32 0.01, %v576_v39  ;;  %v663_v3 = vsel %vm631_vm13, %v581_v36, %v647_v7 }
 0x18d   : > { %1468 = vperm.xlu1 %4425, %v5445_v26  }
 0x18e   : > { %v662_v4 = vsel %vm630_vm14, %v576_v39, %v646_v6  ;;  %v6759_v6 = vld [vmem:[#allocation16_spill] sm:$0xff] }
 0x18f   : > { %3972 = vmatprep.mubr.msk.f32.mxu1 %vm684_vm3, %v662_v4  ;;  %vm1492_vm7 = vcmp.eq.s32.totalorder %v6759_v6, %v5481_v22  ;;  %v3632_v4 = vsel %vm1316_vm2, 1.0, %v6746_v56 }
 0x190   : > { %v5658_v16 = vpop.permute.xlu1 %2129  ;;  %3973 = vmatmul.mubr.msk.f32.gmra.mxu1 %vm684_vm3, %v663_v3  ;;  %v3681_v3 = vsel %vm1941_vm1, 1.0, %v6746_v56  ;;  %v3648_v31 = vsel %vm1492_vm7, 1.0, %v6746_v56  ;;  %vm949_vm1 = vcmp.eq.s32.totalorder %v5601_v40, %v5481_v22  ;;  %vm1317_vm7 = vcmp.eq.s32.totalorder %v5484_v32, %v5481_v22 }
 0x191   : > { %4426 = vset.pattern.permute.xlu1 %v6714_v51  ;;  %v3585_v40 = vsel %vm949_vm1, 1.0, %v6746_v56 }
 0x192   : > { %1811 = vperm.xlu1 %4426, %v5631_v62  }
 0x195   : > { %v2239_v47 = vpop.permute.xlu1 %2238 }
 0x196   : > { %v2292_v2 = vmul.f32 %v2239_v47, %v2212_v53  ;;  %4427 = vset.pattern.permute.xlu1 %v6703_v9  ;;  %v3616_v53 = vsel %vm1124_vm15, 1.0, %v6746_v56  ;;  %v3584_v47 = vsel %vm948_vm0, 1.0, %v6746_v56 }
 0x197   : > { %2141 = vperm.xlu1 %4427, %v5445_v26   ;;  %v4617_v26 = vadd.low.f32.bf16 %v4616_v13, %v5075_v33  ;;  %v2596_v33 = vld [vmem:[%s6636_s6 + $0x70] sm:$0xff]  ;;  %v1172_v20 = vadd.f32 %v3616_v53, %v3584_v47  ;;  %v3713_v53 = vsel %vm2165_vm9, 1.0, %v6746_v56  ;;  %v2587_v47 = vld [vmem:[%s6636_s6 + $0x28] sm:$0xff]  ;;  %vm2166_vm9 = vcmp.eq.s32.totalorder %v5658_v16, %v5489_v29 }
 0x198   : > { %v2308_v1 = vadd.f32 %v2292_v2, %v1747_v14  ;;  %v2590_v2 = vld [vmem:[%s6636_s6 + $0x40] sm:$0xff] }
 0x199   : > { %v4618_v8 = vadd.low.f32.bf16 %v4617_v26, %v5084_v37  ;;  %v2595_v37 = vld [vmem:[%s6636_s6 + $0x68] sm:$0xff]  ;;  %v3665_v26 = vsel %vm1829_vm4, 1.0, %v6746_v56  ;;  %vm1125_vm4 = vcmp.eq.s32.totalorder %v5421_v30, %v5481_v22 }
 0x19a   : > { %v5668_v0 = vpop.permute.xlu1 %2020  ;;  %3999 = vmatmul.mubr.msk.f32.gmra.mxu0 %vm430_vm12, %v2308_v1 }
 0x19b   : > { %4428 = vset.pattern.permute.xlu1 %v6714_v51  ;;  %v1624_v28 = vmax.f32 %v4618_v8, 1.0 }
 0x19c   : > { %2254 = vperm.xlu1 %4428, %v5341_v58   ;;  %v2597_v58 = vld [vmem:[%s6636_s6 + $0x78] sm:$0xff] }
 0x19d   : > { %4019 = vmatprep.subr.mxu1 %v2597_v58  ;;  %4495 = vrcp.f32 %v1624_v28 }
 0x19e   : > { %4020 = vmatpush3.msra.mxu1 %v2597_v58 }
 0x19f   : > { %v5679_v27 = vpop.permute.xlu1 %1286  ;;  %4021 = vmatprep.subr.mxu1 %v2596_v33 }
 0x1a0   : > { %4429 = vset.pattern.permute.xlu1 %v6728_v63  ;;  %4022 = vmatpush3.msra.mxu1 %v2596_v33 }
 0x1a1   : > { %2032 = vperm.xlu1 %4429, %v5523_v15   ;;  %4023 = vmatprep.subr.mxu1 %v2595_v37 }
 0x1a2   : > { %4024 = vmatpush3.msra.mxu1 %v2595_v37  ;;  %v3697_v37 = vsel %vm2053_vm8, 1.0, %v6746_v56  ;;  %vm1493_vm8 = vcmp.eq.s32.totalorder %v5625_v34, %v5481_v22  ;;  %v3714_v34 = vsel %vm2166_vm9, 1.0, %v6746_v56 }
 0x1a3   : > { %4025 = vmatprep.subr.mxu1 %v2594_v46  ;;  %v3649_v32 = vsel %vm1493_vm8, 1.0, %v6746_v56  ;;  %vm1319_vm8 = vcmp.eq.s32.totalorder %v5679_v27, %v5481_v22 }
 0x1a4   : > { %v5683_v50 = vpop.permute.xlu1 %921  ;;  %4026 = vmatpush3.msra.mxu1 %v2594_v46 }
 0x1a5   : > { %4430 = vset.pattern.permute.xlu1 %v6700_v41  ;;  %v3937_v11 = vpop.f32.mrf.mxu0  ;;  %4027 = vmatprep.subr.mxu1 %v2593_v55 }
 0x1a6   : > { %1298 = vperm.xlu1 %4430, %v5631_v62   ;;  %v591_v5 = vadd.f32 %v3937_v11, %v5242_v54  ;;  %4028 = vmatpush3.msra.mxu1 %v2593_v55  ;;  %v1364_v55 = vadd.f32 %v3632_v4, %v1172_v20 }
 0x1a7   : > { %v585_v18 = vpop.f32.mrf.mxu0  ;;  %4029 = vmatprep.subr.mxu1 %v2592_v38 }
 0x1a8   : > { %v586_v23 = vadd.f32 %v585_v18, %v5242_v54  ;;  %v649_v36 = vmul.f32 0.01, %v591_v5  ;;  %4030 = vmatpush3.msra.mxu1 %v2592_v38  ;;  %vm633_vm5 = vcmp.gt.f32.partialorder %v591_v5, 0.0  ;;  %v1989_v38 = vadd.f32 %v3681_v3, %v3665_v26 }
 0x1a9   : > { %v5696_v21 = vpop.permute.xlu1 %1097  ;;  %4031 = vmatprep.subr.mxu1 %v2591_v57 }
 0x1aa   : > { %4431 = vset.pattern.permute.xlu1 %v6705_v25  ;;  %v3940_v14 = vpop.f32.mrf.mxu0  ;;  %vm632_vm6 = vcmp.gt.f32.partialorder %v586_v23, 0.0  ;;  %v648_v7 = vmul.f32 0.01, %v586_v23  ;;  %v5739_v1 = vpop.eup %4495  ;;  %4032 = vmatpush3.msra.mxu1 %v2591_v57  ;;  %v665_v45 = vsel %vm633_vm5, %v591_v5, %v649_v36  ;;  %v2101_v36 = vadd.f32 %v3697_v37, %v1989_v38  ;;  %v2582_v38 = vld [vmem:[%s6636_s6] sm:$0xff] }
 0x1ab   : > { %933 = vperm.xlu1 %4431, %v5700_v35   ;;  %v601_v39 = vadd.f32 %v3940_v14, %v5242_v54  ;;  %4033 = vmatprep.subr.mxu1 %v2590_v2  ;;  %vm1830_vm5 = vcmp.eq.s32.totalorder %v5448_v52, %v5489_v29 }
 0x1ac   : > { %v595_v13 = vpop.f32.mrf.mxu0  ;;  %v664_v33 = vsel %vm632_vm6, %v586_v23, %v648_v7  ;;  %4034 = vmatpush3.msra.mxu1 %v2590_v2  ;;  %v2213_v3 = vadd.f32 %v3713_v53, %v2101_v36  ;;  %v3617_v53 = vsel %vm1125_vm4, 1.0, %v6746_v56  ;;  %vm2054_vm6 = vcmp.eq.s32.totalorder %v5450_v17, %v5489_v29  ;;  %v5860_v17 = vpop.permute.xlu0 %924 }
 0x1ad   : > { %v651_v8 = vmul.f32 0.01, %v601_v39  ;;  %v596_v28 = vadd.f32 %v595_v13, %v5242_v54  ;;  %vm635_vm10 = vcmp.gt.f32.partialorder %v601_v39, 0.0  ;;  %3975 = vmatprep.mubr.msk.f32.mxu1 %vm684_vm3, %v664_v33  ;;  %4035 = vmatprep.subr.mxu1 %v2589_v19  ;;  %v2586_v13 = vld [vmem:[%s6636_s6 + $0x20] sm:$0xff]  ;;  %v1173_v52 = vadd.f32 %v3617_v53, %v3585_v40  ;;  %v6768_v40 = vld [vmem:[#allocation44_spill] sm:$0xff] }
 0x1ae   : > { %v5708_v42 = vpop.permute.xlu1 %1686  ;;  %3976 = vmatmul.mubr.msk.f32.gmra.mxu1 %vm684_vm3, %v665_v45  ;;  %v2585_v45 = vld [vmem:[%s6636_s6 + $0x18] sm:$0xff]  ;;  %v3633_v36 = vsel %vm1317_vm7, 1.0, %v6746_v56  ;;  %vm1832_vm7 = vcmp.eq.s32.totalorder %v5640_v24, %v5489_v29  ;;  %v3635_v24 = vsel %vm1319_vm8, 1.0, %v6746_v56 }
 0x1af   : > { %4432 = vset.pattern.permute.xlu1 %v6708_v44  ;;  %v3943_v58 = vpop.f32.mrf.mxu0  ;;  %vm634_vm11 = vcmp.gt.f32.partialorder %v596_v28, 0.0  ;;  %v650_v46 = vmul.f32 0.01, %v596_v28  ;;  %4036 = vmatpush3.msra.mxu1 %v2589_v19  ;;  %v667_v57 = vsel %vm635_vm10, %v601_v39, %v651_v8  ;;  %v1540_v39 = vadd.f32 %v3648_v31, %v1364_v55  ;;  %v2583_v55 = vld [vmem:[%s6636_s6 + $0x8] sm:$0xff] }
 0x1b0   : > { %1109 = vperm.xlu1 %4432, %v5700_v35   ;;  %v611_v11 = vadd.f32 %v3943_v58, %v5242_v54  ;;  %4037 = vmatprep.subr.mxu1 %v2588_v12 }
 0x1b1   : > { %v605_v5 = vpop.f32.mrf.mxu0  ;;  %v666_v59 = vsel %vm634_vm11, %v596_v28, %v650_v46  ;;  %4038 = vmatpush3.msra.mxu1 %v2588_v12  ;;  %v1748_v28 = vmul.f32 %v5708_v42, %v1540_v39  ;;  %v2584_v42 = vld [vmem:[%s6636_s6 + $0x10] sm:$0xff]  ;;  %v5839_v12 = vld [vmem:[%s4814_s29 + $0x68] sm:$0xff] }
 0x1b2   : > { %v606_v23 = vadd.f32 %v605_v5, %v5242_v54  ;;  %v653_v14 = vmul.f32 0.01, %v611_v11  ;;  %vm637_vm13 = vcmp.gt.f32.partialorder %v611_v11, 0.0  ;;  %3978 = vmatprep.mubr.msk.f32.mxu1 %vm684_vm3, %v666_v59  ;;  %4039 = vmatprep.subr.mxu1 %v2587_v47 }
 0x1b3   : > { %v5736_v60 = vpop.permute.xlu1 %1802  ;;  %v3946_v2 = vpop.f32.mrf.mxu0  ;;  %3979 = vmatmul.mubr.msk.f32.gmra.mxu1 %vm684_vm3, %v667_v57 }
 0x1b4   : > { %4433 = vset.pattern.permute.xlu1 %v6705_v25  ;;  %vm636_vm14 = vcmp.gt.f32.partialorder %v606_v23, 0.0  ;;  %v652_v7 = vmul.f32 0.01, %v606_v23  ;;  %v621_v6 = vadd.f32 %v3946_v2, %v5242_v54  ;;  %4040 = vmatpush3.msra.mxu1 %v2587_v47  ;;  %v669_v33 = vsel %vm637_vm13, %v611_v11, %v653_v14 }
 0x1b5   : > { %1706 = vperm.xlu1 %4433, %v5739_v1   ;;  %v615_v20 = vpop.f32.mrf.mxu0  ;;  %4041 = vmatprep.subr.mxu1 %v2586_v13  ;;  %v3698_v47 = vsel %vm2054_vm6, 1.0, %v6746_v56  ;;  %v1365_v14 = vadd.f32 %v3633_v36, %v1173_v52  ;;  %vm1127_vm6 = vcmp.eq.s32.totalorder %v5620_v48, %v5481_v22  ;;  %v6771_v48 = vld [vmem:[#allocation50_spill] sm:$0xff] }
 0x1b6   : > { %v616_v26 = vadd.f32 %v615_v20, %v5242_v54  ;;  %v668_v8 = vsel %vm636_vm14, %v606_v23, %v652_v7  ;;  %v655_v19 = vmul.f32 0.01, %v621_v6  ;;  %vm639_vm0 = vcmp.gt.f32.partialorder %v621_v6, 0.0  ;;  %4042 = vmatpush3.msra.mxu1 %v2586_v13  ;;  %v6761_v13 = vld [vmem:[#allocation6_spill] sm:$0xff] }
 0x1b7   : > { %3981 = vmatprep.mubr.msk.f32.mxu1 %vm684_vm3, %v668_v8  ;;  %4043 = vmatprep.subr.mxu1 %v2585_v45  ;;  %v3666_v23 = vsel %vm1830_vm5, 1.0, %v6746_v56  ;;  %v1541_v7 = vadd.f32 %v3649_v32, %v1365_v14  ;;  %vm1318_vm14 = vcmp.eq.s32.totalorder %v6768_v40, %v5481_v22  ;;  %vm951_vm5 = vcmp.eq.s32.totalorder %v5649_v61, %v5481_v22 }
 0x1b8   : > { %v5773_v18 = vpop.permute.xlu1 %2132  ;;  %vm638_vm15 = vcmp.gt.f32.partialorder %v616_v26, 0.0  ;;  %v654_v37 = vmul.f32 0.01, %v616_v26  ;;  %3982 = vmatmul.mubr.msk.f32.gmra.mxu1 %vm684_vm3, %v669_v33  ;;  %v6763_v33 = vld [vmem:[#allocation38_spill] sm:$0xff]  ;;  %v3668_v61 = vsel %vm1832_vm7, 1.0, %v6746_v56  ;;  %vm2056_vm9 = vcmp.eq.s32.totalorder %v6771_v48, %v5489_v29 }
 0x1b9   : > { %4434 = vset.pattern.permute.xlu1 %v6714_v51  ;;  %4044 = vmatpush3.msra.mxu1 %v2585_v45  ;;  %v6764_v45 = vld [vmem:[#allocation11_spill] sm:$0xff] }
 0x1ba   : > { %1814 = vperm.xlu1 %4434, %v5700_v35   ;;  %v670_v46 = vsel %vm638_vm15, %v616_v26, %v654_v37  ;;  %4045 = vmatprep.subr.mxu1 %v2584_v42  ;;  %vm1831_vm15 = vcmp.eq.s32.totalorder %v5580_v49, %v5489_v29  ;;  %v6769_v49 = vld [vmem:[#allocation18_spill] sm:$0xff] }
 0x1bb   : > { %3984 = vmatprep.mubr.msk.f32.mxu1 %vm684_vm3, %v670_v46  ;;  %4046 = vmatpush3.msra.mxu1 %v2584_v42  ;;  %v5891_v42 = vld [vmem:[%s4814_s29 + $0x70] sm:$0xff]  ;;  %v6765_v46 = vld [vmem:[#allocation57_spill] sm:$0xff]  ;;  %v3667_v36 = vsel %vm1831_vm15, 1.0, %v6746_v56  ;;  %vm1494_vm1 = vcmp.eq.s32.totalorder %v6769_v49, %v5481_v22 }
 0x1bc   : > { %4047 = vmatprep.subr.mxu1 %v2583_v55  ;;  %vm1126_vm10 = vcmp.eq.s32.totalorder %v6765_v46, %v5481_v22 }
 0x1bd   : > { %v2243_v4 = vpop.permute.xlu1 %2242  ;;  %4048 = vmatpush3.msra.mxu1 %v2583_v55  ;;  %v6766_v55 = vld [vmem:[#allocation56_spill] sm:$0xff] }
 0x1be   : > { %v2293_v58 = vmul.f32 %v2243_v4, %v2213_v3  ;;  %4435 = vset.pattern.permute.xlu1 %v6703_v9  ;;  %4049 = vmatprep.subr.mxu1 %v2582_v38  ;;  %v4619_v4 = vadd.low.f32.bf16 %v6761_v13, %v5086_v43  ;;  %vm950_vm11 = vcmp.eq.s32.totalorder %v6766_v55, %v5481_v22 }
 0x1bf   : > { %2144 = vperm.xlu1 %4435, %v5523_v15   ;;  %v671_v15 = vsel %vm639_vm0, %v621_v6, %v655_v19  ;;  %4050 = vmatpush3.msra.mxu1 %v2582_v38  ;;  %v1692_v6 = vpop.permute.xlu0 %1691  ;;  %v3618_v38 = vsel %vm1126_vm10, 1.0, %v6746_v56  ;;  %vm2055_vm0 = vcmp.eq.s32.totalorder %v5668_v0, %v5489_v29 }
 0x1c0   : > { %v2309_v54 = vadd.f32 %v2293_v58, %v1748_v28  ;;  %3985 = vmatmul.mubr.msk.f32.gmra.mxu1 %vm684_vm3, %v671_v15  ;;  %v1749_v3 = vmul.f32 %v1692_v6, %v1541_v7  ;;  %v6762_v28 = vld [vmem:[#allocation9_spill] sm:$0xff]  ;;  %v3699_v32 = vsel %vm2055_vm0, 1.0, %v6746_v56  ;;  %vm1128_vm0 = vcmp.eq.s32.totalorder %v5696_v21, %v5481_v22 }
 0x1c1   : > { %v4620_v58 = vadd.low.f32.bf16 %v4619_v4, %v6762_v28  ;;  %v6770_v28 = vld [vmem:[#allocation31_spill] sm:$0xff] }
 0x1c2   : > { %v5814_v11 = vpop.permute.xlu1 %1100  ;;  %4001 = vmatprep.mubr.msk.f32.mxu0 %vm430_vm12, %v2309_v54  ;;  %vm1944_vm4 = vcmp.eq.s32.totalorder %v6770_v28, %v5489_v29 }
 0x1c3   : > { %4436 = vset.pattern.permute.xlu1 %v6714_v51  ;;  %v4621_v19 = vadd.low.f32.bf16 %v4620_v58, %v6764_v45  ;;  %v3587_v58 = vsel %vm951_vm5, 1.0, %v6746_v56  ;;  %v5966_v46 = vpop.permute.xlu0 %930  ;;  %vm1833_vm5 = vcmp.eq.s32.totalorder %v5736_v60, %v5489_v29 }
 0x1c4   : > { %2258 = vperm.xlu1 %4436, %v5739_v1   ;;  %v6760_v1 = vld [vmem:[#allocation28_spill] sm:$0xff] }
 0x1c5   : > { %vm1942_vm2 = vcmp.eq.s32.totalorder %v6760_v1, %v5489_v29  ;;  %v1626_v43 = vmax.f32 %v4621_v19, 1.0  ;;  %v6767_v1 = vld [vmem:[#allocation30_spill] sm:$0xff] }
 0x1c6   : > { %v3682_v31 = vsel %vm1942_vm2, 1.0, %v6746_v56  ;;  %vm1943_vm13 = vcmp.eq.s32.totalorder %v6767_v1, %v5489_v29  ;;  %vm2167_vm2 = vcmp.eq.s32.totalorder %v5773_v18, %v5489_v29 }
 0x1c7   : > { %v5829_v5 = vpop.permute.xlu1 %1462  ;;  %v1990_v30 = vadd.f32 %v3682_v31, %v3666_v23  ;;  %4497 = vrcp.f32 %v1626_v43  ;;  %v3586_v31 = vsel %vm950_vm11, 1.0, %v6746_v56  ;;  %v3715_v7 = vsel %vm2167_vm2, 1.0, %v6746_v56 }
 0x1c8   : > { %4437 = vset.pattern.permute.xlu1 %v6708_v44  ;;  %v1174_v52 = vadd.f32 %v3618_v38, %v3586_v31  ;;  %vm1495_vm10 = vcmp.eq.s32.totalorder %v5829_v5, %v5481_v22  ;;  %v3700_v43 = vsel %vm2056_vm9, 1.0, %v6746_v56  ;;  %vm955_vm9 = vcmp.eq.s32.totalorder %v5966_v46, %v5481_v22 }
 0x1c9   : > { %1112 = vperm.xlu1 %4437, %v5839_v12   ;;  %v2102_v59 = vadd.f32 %v3698_v47, %v1990_v30  ;;  %v3683_v30 = vsel %vm1943_vm13, 1.0, %v6746_v56  ;;  %v3634_v47 = vsel %vm1318_vm14, 1.0, %v6746_v56 }
 0x1ca   : > { %v1991_v14 = vadd.f32 %v3683_v30, %v3667_v36  ;;  %v6773_v30 = vld [vmem:[#allocation7_spill] sm:$0xff] }
 0x1cb   : > { %v2214_v16 = vadd.f32 %v3714_v34, %v2102_v59  ;;  %v1366_v34 = vadd.f32 %v3634_v47, %v1174_v52  ;;  %v3650_v59 = vsel %vm1494_vm1, 1.0, %v6746_v56  ;;  %v6772_v52 = vld [vmem:[#allocation8_spill] sm:$0xff]  ;;  %vm952_vm1 = vcmp.eq.s32.totalorder %v5683_v50, %v5481_v22 }
 0x1cc   : > { %v5846_v57 = vpop.permute.xlu1 %1805  ;;  %v4622_v47 = vadd.low.f32.bf16 %v6773_v30, %v6772_v52  ;;  %v3588_v21 = vsel %vm952_vm1, 1.0, %v6746_v56 }
 0x1cd   : > { %4438 = vset.pattern.permute.xlu1 %v6721_v10  ;;  %v1542_v6 = vadd.f32 %v3650_v59, %v1366_v34  ;;  %v6775_v59 = vld [vmem:[#allocation12_spill] sm:$0xff] }
 0x1ce   : > { %1474 = vperm.xlu1 %4438, %v5631_v62  }
 0x1d1   : > { %v5863_v2 = vpop.permute.xlu1 %2135 }
 0x1d2   : > { %4439 = vset.pattern.permute.xlu1 %v6714_v51  ;;  %vm2168_vm11 = vcmp.eq.s32.totalorder %v5863_v2, %v5489_v29 }
 0x1d3   : > { %1817 = vperm.xlu1 %4439, %v5839_v12   ;;  %v3716_v5 = vsel %vm2168_vm11, 1.0, %v6746_v56 }
 0x1d4   : > { %v4498_v23 = vpop.eup %4497 }
 0x1d6   : > { %v2247_v39 = vpop.permute.xlu1 %2246 }
 0x1d7   : > { %v2294_v20 = vmul.f32 %v2247_v39, %v2214_v16  ;;  %4440 = vset.pattern.permute.xlu1 %v6703_v9  ;;  %v2103_v16 = vadd.f32 %v3699_v32, %v1991_v14  ;;  %v6774_v32 = vld [vmem:[#allocation10_spill] sm:$0xff] }
 0x1d8   : > { %2147 = vperm.xlu1 %4440, %v5631_v62   ;;  %v4623_v14 = vadd.low.f32.bf16 %v4622_v47, %v6774_v32 }
 0x1d9   : > { %v2310_v26 = vadd.f32 %v2294_v20, %v1749_v3  ;;  %v2215_v39 = vadd.f32 %v3715_v7, %v2103_v16 }
 0x1da   : > { %v4624_v7 = vadd.low.f32.bf16 %v4623_v14, %v6775_v59 }
 0x1db   : > { %v5872_v8 = vpop.permute.xlu1 %2026  ;;  %4002 = vmatmul.mubr.msk.f32.gmra.mxu0 %vm430_vm12, %v2310_v26 }
 0x1dc   : > { %4441 = vset.pattern.permute.xlu1 %v6714_v51 }
 0x1dd   : > { %2262 = vperm.xlu1 %4441, %v6763_v33   ;;  %v3619_v33 = vsel %vm1127_vm6, 1.0, %v6746_v56  ;;  %vm2057_vm6 = vcmp.eq.s32.totalorder %v5872_v8, %v5489_v29 }
 0x1de   : > { %v1175_v27 = vadd.f32 %v3619_v33, %v3587_v58  ;;  %v3701_v8 = vsel %vm2057_vm6, 1.0, %v6746_v56 }
 0x1e0   : > { %v5879_v37 = vpop.permute.xlu1 %1292  ;;  %v1367_v55 = vadd.f32 %v3635_v24, %v1175_v27  ;;  %v3620_v24 = vsel %vm1128_vm0, 1.0, %v6746_v56  ;;  %v6780_v27 = vld [vmem:[#allocation46_spill] sm:$0xff] }
 0x1e1   : > { %4442 = vset.pattern.permute.xlu1 %v6728_v63  ;;  %v1176_v50 = vadd.f32 %v3620_v24, %v3588_v21  ;;  %v6783_v24 = vld [vmem:[#allocation33_spill] sm:$0xff] }
 0x1e2   : > { %2038 = vperm.xlu1 %4442, %v5700_v35   ;;  %vm1946_vm1 = vcmp.eq.s32.totalorder %v6783_v24, %v5489_v29  ;;  %v6785_v21 = vld [vmem:[#allocation37_spill] sm:$0xff] }
 0x1e5   : > { %v5883_v62 = vpop.permute.xlu1 %927 }
 0x1e6   : > { %4443 = vset.pattern.permute.xlu1 %v6700_v41 }
 0x1e7   : > { %1304 = vperm.xlu1 %4443, %v5839_v12  }
 0x1ea   : > { %v5887_v54 = vpop.permute.xlu1 %1103 }
 0x1eb   : > { %4444 = vset.pattern.permute.xlu1 %v6705_v25 }
 0x1ec   : > { %939 = vperm.xlu1 %4444, %v5891_v42  }
 0x1ef   : > { %v1697_v15 = vpop.permute.xlu1 %1696 }
 0x1f0   : > { %4445 = vset.pattern.permute.xlu1 %v6708_v44  ;;  %v1750_v18 = vmul.f32 %v1697_v15, %v1542_v6  ;;  %v3651_v15 = vsel %vm1495_vm10, 1.0, %v6746_v56  ;;  %v6776_v6 = vld [vmem:[#allocation41_spill] sm:$0xff] }
 0x1f1   : > { %1115 = vperm.xlu1 %4445, %v5891_v42   ;;  %v1543_v1 = vadd.f32 %v3651_v15, %v1367_v55 }
 0x1f4   : > { %v5908_v53 = vpop.permute.xlu1 %1808 }
 0x1f5   : > { %4447 = vset.pattern.permute.xlu1 %v6705_v25 }
 0x1f6   : > { %1716 = vperm.xlu1 %4447, %v4498_v23  }
 0x1f9   : > { %v5921_v0 = vpop.permute.xlu1 %2138 }
 0x1fa   : > { %4448 = vset.pattern.permute.xlu1 %v6714_v51  ;;  %vm2169_vm8 = vcmp.eq.s32.totalorder %v5921_v0, %v5489_v29 }
 0x1fb   : > { %1820 = vperm.xlu1 %4448, %v5891_v42   ;;  %v3717_v47 = vsel %vm2169_vm8, 1.0, %v6746_v56  ;;  %vm1129_vm8 = vcmp.eq.s32.totalorder %v5814_v11, %v5481_v22 }
 0x1fe   : > { %v2251_v3 = vpop.permute.xlu1 %2250 }
 0x1ff   : > { %v2295_v20 = vmul.f32 %v2251_v3, %v2215_v39  ;;  %4449 = vset.pattern.permute.xlu1 %v6703_v9  ;;  %v1628_v39 = vmax.f32 %v4624_v7, 1.0 }
 0x200   : > { %2150 = vperm.xlu1 %4449, %v5700_v35   ;;  %v5945_v35 = vld [vmem:[%s4814_s29 + $0x78] sm:$0xff] }
 0x201   : > { %v2311_v13 = vadd.f32 %v2295_v20, %v1750_v18  ;;  %4499 = vrcp.f32 %v1628_v39  ;;  %v6777_v18 = vld [vmem:[#allocation48_spill] sm:$0xff] }
 0x202   : > { %vm1324_vm13 = vcmp.eq.s32.totalorder %v6777_v18, %v5481_v22 }
 0x203   : > { %v5929_v4 = vpop.permute.xlu1 %1106  ;;  %4004 = vmatprep.mubr.msk.f32.mxu0 %vm430_vm12, %v2311_v13 }
 0x204   : > { %4450 = vset.pattern.permute.xlu1 %v6714_v51  ;;  %vm1131_vm11 = vcmp.eq.s32.totalorder %v5929_v4, %v5481_v22 }
 0x205   : > { %2266 = vperm.xlu1 %4450, %v4498_v23   ;;  %v1702_v23 = vpop.permute.xlu0 %1701  ;;  %v3623_v4 = vsel %vm1131_vm11, 1.0, %v6746_v56 }
 0x206   : > { %v1751_v36 = vmul.f32 %v1702_v23, %v1543_v1  ;;  %v6781_v1 = vld [vmem:[#allocation19_spill] sm:$0xff] }
 0x207   : > { %vm1496_vm7 = vcmp.eq.s32.totalorder %v6781_v1, %v5481_v22  ;;  %v6788_v1 = vld [vmem:[#allocation53_spill] sm:$0xff] }
 0x208   : > { %v5933_v26 = vpop.permute.xlu1 %1468  ;;  %v3652_v30 = vsel %vm1496_vm7, 1.0, %v6746_v56  ;;  %vm953_vm7 = vcmp.eq.s32.totalorder %v5860_v17, %v5481_v22  ;;  %vm2062_vm11 = vcmp.eq.s32.totalorder %v6788_v1, %v5489_v29 }
 0x209   : > { %4451 = vset.pattern.permute.xlu1 %v6708_v44  ;;  %v3684_v44 = vsel %vm1944_vm4, 1.0, %v6746_v56  ;;  %vm1320_vm4 = vcmp.eq.s32.totalorder %v6780_v27, %v5481_v22  ;;  %v3589_v17 = vsel %vm953_vm7, 1.0, %v6746_v56 }
 0x20a   : > { %1118 = vperm.xlu1 %4451, %v5945_v35   ;;  %v1992_v19 = vadd.f32 %v3684_v44, %v3668_v61  ;;  %v6778_v61 = vld [vmem:[#allocation25_spill] sm:$0xff]  ;;  %v3636_v55 = vsel %vm1320_vm4, 1.0, %v6746_v56  ;;  %vm1950_vm4 = vcmp.eq.s32.totalorder %v6785_v21, %v5489_v29 }
 0x20b   : > { %v682_v48 = vsub.s32 1, %v6778_v61  ;;  %v1368_v23 = vadd.f32 %v3636_v55, %v1176_v50 }
 0x20c   : > { %v2104_v40 = vadd.f32 %v3700_v43, %v1992_v19  ;;  %v3965_v19 = vpop.f32.mrf.mxu1  ;;  %v6024_v43 = vld [vmem:[%s6639_s9] sm:$0xff] }
 0x20d   : > { %v5954_v45 = vpop.permute.xlu1 %1811  ;;  %v6027_v15 = vrot.slane %v6024_v43, %v682_v48  ;;  %v1544_v32 = vadd.f32 %v3652_v30, %v1368_v23  ;;  %v3706_v30 = vsel %vm2062_vm11, 1.0, %v6746_v56 }
 0x20e   : > { %4452 = vset.pattern.permute.xlu1 %v6721_v10  ;;  %v2216_v31 = vadd.f32 %v3716_v5, %v2104_v40  ;;  %v4500_v33 = vpop.eup %4499  ;;  %v3669_v5 = vsel %vm1833_vm5, 1.0, %v6746_v56  ;;  %v799_v40 = vpop.f32.mrf.mxu1  ;;  %vm1836_vm5 = vcmp.eq.s32.totalorder %v5954_v45, %v5489_v29  ;;  %v6787_v45 = vld [vmem:[#allocation52_spill] sm:$0xff] }
 0x20f   : > { %1480 = vperm.xlu1 %4452, %v5839_v12   ;;  %v805_v52 = vadd.f32 %v3965_v19, %v6027_v15  ;;  %v800_v0 = vadd.f32 %v799_v40, %v6027_v15  ;;  %v6786_v19 = vld [vmem:[#allocation43_spill] sm:$0xff]  ;;  %v3672_v11 = vsel %vm1836_vm5, 1.0, %v6746_v56 }
 0x212   : > { %v5969_v38 = vpop.permute.xlu1 %2141 }
 0x213   : > { %4453 = vset.pattern.permute.xlu1 %v6714_v51 }
 0x214   : > { %1823 = vperm.xlu1 %4453, %v5945_v35  }
 0x217   : > { %v2255_v2 = vpop.permute.xlu1 %2254 }
 0x218   : > { %v2296_v49 = vmul.f32 %v2255_v2, %v2216_v31  ;;  %4455 = vset.pattern.permute.xlu1 %v6703_v9 }
 0x219   : > { %2153 = vperm.xlu1 %4455, %v5839_v12  }
 0x21a   : > { %v2312_v34 = vadd.f32 %v2296_v49, %v1751_v36 }
 0x21c   : > { %v5980_v16 = vpop.permute.xlu1 %2032  ;;  %4005 = vmatmul.mubr.msk.f32.gmra.mxu0 %vm430_vm12, %v2312_v34 }
 0x21d   : > { %4456 = vset.pattern.permute.xlu1 %v6714_v51 }
 0x21e   : > { %2270 = vperm.xlu1 %4456, %v6776_v6   ;;  %v937_v6 = vpop.permute.xlu0 %936 }
 0x21f   : > { %vm957_vm10 = vcmp.eq.s32.totalorder %v937_v6, %v5481_v22 }
 0x221   : > { %v5985_v3 = vpop.permute.xlu1 %1298 }
 0x222   : > { %4458 = vset.pattern.permute.xlu1 %v6728_v63  ;;  %v3640_v63 = vsel %vm1324_vm13, 1.0, %v6746_v56 }
 0x223   : > { %2044 = vperm.xlu1 %4458, %v5891_v42  }
 0x226   : > { %v934_v12 = vpop.permute.xlu1 %933 }
 0x227   : > { %4459 = vset.pattern.permute.xlu1 %v6700_v41  ;;  %vm956_vm14 = vcmp.eq.s32.totalorder %v934_v12, %v5481_v22 }
 0x228   : > { %1310 = vperm.xlu1 %4459, %v5945_v35   ;;  %v3592_v13 = vsel %vm956_vm14, 1.0, %v6746_v56 }
 0x22b   : > { %v1110_v20 = vpop.permute.xlu1 %1109 }
 0x22c   : > { %vm1132_vm15 = vcmp.eq.s32.totalorder %v1110_v20, %v5481_v22  ;;  %4460 = vset.pattern.permute.xlu1 %v6721_v10 }
 0x22d   : > { %v3624_v28 = vsel %vm1132_vm15, 1.0, %v6746_v56  ;;  %1483 = vperm.xlu1 %4460, %v5891_v42   ;;  %v6779_v42 = vld [vmem:[#allocation32_spill] sm:$0xff]  ;;  %vm1323_vm15 = vcmp.eq.s32.totalorder %v5985_v3, %v5481_v22 }
 0x22e   : > { %v1180_v41 = vadd.f32 %v3624_v28, %v3592_v13  ;;  %vm1945_vm2 = vcmp.eq.s32.totalorder %v6779_v42, %v5489_v29  ;;  %v3593_v13 = vsel %vm957_vm10, 1.0, %v6746_v56  ;;  %v3591_v28 = vsel %vm955_vm9, 1.0, %v6746_v56  ;;  %v6784_v42 = vld [vmem:[#allocation35_spill] sm:$0xff] }
 0x22f   : > { %v3685_v60 = vsel %vm1945_vm2, 1.0, %v6746_v56  ;;  %v3639_v3 = vsel %vm1323_vm15, 1.0, %v6746_v56  ;;  %v1179_v48 = vadd.f32 %v3623_v4, %v3591_v28  ;;  %vm1948_vm2 = vcmp.eq.s32.totalorder %v6784_v42, %v5489_v29  ;;  %v1712_v28 = vpop.permute.xlu0 %1711 }
 0x230   : > { %v1707_v44 = vpop.permute.xlu1 %1706  ;;  %v6002_v58 = vadd.f32 %v3640_v63, %v1180_v41  ;;  %v1993_v31 = vadd.f32 %v3685_v60, %v3669_v5  ;;  %vm1834_vm9 = vcmp.eq.s32.totalorder %v5846_v57, %v5489_v29  ;;  %v3686_v60 = vsel %vm1946_vm1, 1.0, %v6746_v56 }
 0x231   : > { %4461 = vset.pattern.permute.xlu1 %v6705_v25  ;;  %v1752_v39 = vmul.f32 %v1707_v44, %v1544_v32  ;;  %v6782_v44 = vld [vmem:[#allocation42_spill] sm:$0xff]  ;;  %vm2060_vm10 = vcmp.eq.s32.totalorder %v6787_v45, %v5489_v29  ;;  %v3688_v5 = vsel %vm1948_vm2, 1.0, %v6746_v56  ;;  %v3690_v57 = vsel %vm1950_vm4, 1.0, %v6746_v56 }
 0x232   : > { %1726 = vperm.xlu1 %4461, %v4500_v33   ;;  %v2105_v36 = vadd.f32 %v3701_v8, %v1993_v31  ;;  %v3621_v8 = vsel %vm1129_vm8, 1.0, %v6746_v56  ;;  %v3670_v40 = vsel %vm1834_vm9, 1.0, %v6746_v56  ;;  %v6789_v31 = vld [vmem:[#allocation45_spill] sm:$0xff]  ;;  %vm1497_vm15 = vcmp.eq.s32.totalorder %v5933_v26, %v5481_v22  ;;  %v3968_v26 = vpop.f32.mrf.mxu1 }
 0x233   : > { %v1994_v32 = vadd.f32 %v3686_v60, %v3670_v40  ;;  %vm2170_vm1 = vcmp.eq.s32.totalorder %v5969_v38, %v5489_v29 }
 0x234   : > { %v2217_v34 = vadd.f32 %v3717_v47, %v2105_v36  ;;  %v1996_v36 = vadd.f32 %v3688_v5, %v3672_v11  ;;  %v809_v38 = vpop.f32.mrf.mxu1 }
 0x235   : > { %v6016_v25 = vpop.permute.xlu1 %1814 }
 0x236   : > { %4464 = vset.pattern.permute.xlu1 %v6714_v51  ;;  %vm1837_vm4 = vcmp.eq.s32.totalorder %v6016_v25, %v5489_v29 }
 0x237   : > { %2274 = vperm.xlu1 %4464, %v4500_v33   ;;  %v3673_v24 = vsel %vm1837_vm4, 1.0, %v6746_v56  ;;  %vm2059_vm4 = vcmp.eq.s32.totalorder %v5980_v16, %v5489_v29  ;;  %v2799_v16 = vld [vmem:[%s6637_s7 + $0x20] sm:$0xff] }
 0x23a   : > { %v6037_v2 = vpop.permute.xlu1 %2144 }
 0x23b   : > { %4465 = vset.pattern.permute.xlu1 %v6721_v10 }
 0x23c   : > { %1486 = vperm.xlu1 %4465, %v5945_v35  }
 0x23d   : > { %v3997_v49 = vpop.f32.mrf.mxu0 }
 0x23e   : > { %v2519_v14 = vadd.f32 %v3997_v49, %v805_v52  ;;  %v6790_v52 = vld [vmem:[#allocation51_spill] sm:$0xff]  ;;  %v1177_v49 = vadd.f32 %v3621_v8, %v3589_v17 }
 0x23f   : > { %v2439_v59 = vpop.f32.mrf.mxu0  ;;  %v2259_v7 = vpop.permute.xlu1 %2258 }
 0x240   : > { %v2518_v12 = vadd.f32 %v2439_v59, %v800_v0  ;;  %v2297_v18 = vmul.f32 %v2259_v7, %v2217_v34  ;;  %4466 = vset.pattern.permute.xlu1 %v6703_v9  ;;  %v2551_v10 = vmul.f32 0.01, %v2519_v14  ;;  %vm2535_vm13 = vcmp.gt.f32.partialorder %v2519_v14, 0.0 }
 0x241   : > { %2159 = vperm.xlu1 %4466, %v5945_v35   ;;  %v3653_v59 = vsel %vm1497_vm15, 1.0, %v6746_v56  ;;  %vm954_vm15 = vcmp.eq.s32.totalorder %v5883_v62, %v5481_v22  ;;  %v2801_v62 = vld [vmem:[%s6637_s7 + $0x30] sm:$0xff] }
 0x242   : > { %v2550_v20 = vmul.f32 0.01, %v2518_v12  ;;  %v2313_v63 = vadd.f32 %v2297_v18, %v1752_v39  ;;  %vm2534_vm14 = vcmp.gt.f32.partialorder %v2518_v12, 0.0  ;;  %v2567_v41 = vsel %vm2535_vm13, %v2519_v14, %v2551_v10 }
 0x243   : > { %vm1321_vm13 = vcmp.eq.s32.totalorder %v5879_v37, %v5481_v22  ;;  %v3704_v37 = vsel %vm2060_vm10, 1.0, %v6746_v56 }
 0x244   : > { %v1113_v9 = vpop.permute.xlu1 %1112  ;;  %4007 = vmatprep.mubr.msk.f32.mxu0 %vm430_vm12, %v2313_v63  ;;  %v2566_v46 = vsel %vm2534_vm14, %v2518_v12, %v2550_v20  ;;  %vm2058_vm14 = vcmp.eq.s32.totalorder %v6790_v52, %v5489_v29  ;;  %v3637_v47 = vsel %vm1321_vm13, 1.0, %v6746_v56  ;;  %v3718_v12 = vsel %vm2170_vm1, 1.0, %v6746_v56 }
 0x245   : > { %vm1133_vm0 = vcmp.eq.s32.totalorder %v1113_v9, %v5481_v22  ;;  %4051 = vmatprep.mubr.f32.mxu1 %v2566_v46  ;;  %4467 = vset.pattern.permute.xlu1 %v6714_v51  ;;  %v1371_v51 = vadd.f32 %v3639_v3, %v1179_v48  ;;  %v3702_v34 = vsel %vm2058_vm14, 1.0, %v6746_v56  ;;  %v1369_v7 = vadd.f32 %v3637_v47, %v1177_v49  ;;  %v6791_v3 = vld [vmem:[#allocation36_spill] sm:$0xff] }
 0x246   : > { %v3625_v35 = vsel %vm1133_vm0, 1.0, %v6746_v56  ;;  %4052 = vmatmul.mubr.f32.vlgmr.msra.gmra.mxu1 %v2567_v41  ;;  %2278 = vperm.xlu1 %4467, %v6782_v44   ;;  %v2108_v18 = vadd.f32 %v3704_v37, %v1996_v36  ;;  %v2106_v63 = vadd.f32 %v3702_v34, %v1994_v32  ;;  %v815_v46 = vadd.f32 %v3968_v26, %v6027_v15  ;;  %v2808_v37 = vld [vmem:[%s6637_s7 + $0x68] sm:$0xff]  ;;  %v6792_v36 = vld [vmem:[#allocation49_spill] sm:$0xff] }
 0x247   : > { %v6063_v33 = vadd.f32 %v3625_v35, %v3593_v13  ;;  %v1545_v10 = vadd.f32 %v3653_v59, %v1369_v7  ;;  %v810_v44 = vadd.f32 %v809_v38, %v6027_v15  ;;  %vm1949_vm5 = vcmp.eq.s32.totalorder %v6791_v3, %v5489_v29  ;;  %v2804_v34 = vld [vmem:[%s6637_s7 + $0x48] sm:$0xff] }
 0x248   : > { %v2218_v9 = vadd.f32 %v3718_v12, %v2106_v63  ;;  %vm1326_vm11 = vcmp.eq.s32.totalorder %v6792_v36, %v5481_v22  ;;  %vm1130_vm14 = vcmp.eq.s32.totalorder %v5887_v54, %v5481_v22  ;;  %v2802_v12 = vld [vmem:[%s6637_s7 + $0x38] sm:$0xff]  ;;  %v6793_v54 = vld [vmem:[#allocation34_spill] sm:$0xff] }
 0x249   : > { %v1475_v27 = vpop.permute.xlu1 %1474  ;;  %v1753_v41 = vmul.f32 %v1712_v28, %v1545_v10  ;;  %v3642_v59 = vsel %vm1326_vm11, 1.0, %v6746_v56  ;;  %v6794_v10 = vld [vmem:[#allocation47_spill] sm:$0xff] }
 0x24a   : > { %vm1499_vm6 = vcmp.eq.s32.totalorder %v1475_v27, %v5481_v22  ;;  %2282 = vperm.xlu1 %4467, %v6786_v19   ;;  %vm1322_vm1 = vcmp.eq.s32.totalorder %v6794_v10, %v5481_v22 }
 0x24b   : > { %v3655_v50 = vsel %vm1499_vm6, 1.0, %v6746_v56 }
 0x24c   : > { %v6085_v55 = vadd.f32 %v3655_v50, %v1371_v51  ;;  %v3689_v51 = vsel %vm1949_vm5, 1.0, %v6746_v56 }
 0x24d   : > { %v1997_v25 = vadd.f32 %v3689_v51, %v3673_v24 }
 0x24e   : > { %2286 = vperm.xlu1 %4467, %v6789_v31   ;;  %v1818_v23 = vpop.permute.xlu1 %1817  ;;  %v2810_v31 = vld [vmem:[%s6637_s7 + $0x78] sm:$0xff] }
 0x24f   : > { %vm1838_vm0 = vcmp.eq.s32.totalorder %v1818_v23, %v5489_v29  ;;  %v2809_v23 = vld [vmem:[%s6637_s7 + $0x70] sm:$0xff]  ;;  %4075 = vmatprep.subr.mxu0 %v2810_v31 }
 0x250   : > { %v3674_v0 = vsel %vm1838_vm0, 1.0, %v6746_v56  ;;  %4076 = vmatpush3.msra.mxu0 %v2810_v31  ;;  %vm1947_vm0 = vcmp.eq.s32.totalorder %v6793_v54, %v5489_v29  ;;  %v3971_v31 = vpop.f32.mrf.mxu1 }
 0x251   : > { %v1998_v14 = vadd.f32 %v3690_v57, %v3674_v0  ;;  %4077 = vmatprep.subr.mxu0 %v2809_v23  ;;  %v2805_v0 = vld [vmem:[%s6637_s7 + $0x50] sm:$0xff] }
 0x252   : > { %4078 = vmatpush3.msra.mxu0 %v2809_v23 }
 0x253   : > { %v2148_v6 = vpop.permute.xlu1 %2147  ;;  %v6114_v39 = vadd.f32 %v3706_v30, %v1998_v14  ;;  %4079 = vmatprep.subr.mxu0 %v2808_v37  ;;  %v2806_v30 = vld [vmem:[%s6637_s7 + $0x58] sm:$0xff] }
 0x254   : > { %vm2172_vm2 = vcmp.eq.s32.totalorder %v2148_v6, %v5489_v29  ;;  %4080 = vmatpush3.msra.mxu0 %v2808_v37  ;;  %v2803_v6 = vld [vmem:[%s6637_s7 + $0x40] sm:$0xff]  ;;  %v825_v37 = vadd.f32 %v3971_v31, %v6027_v15 }
 0x255   : > { %v3720_v20 = vsel %vm2172_vm2, 1.0, %v6746_v56  ;;  %vm1835_vm2 = vcmp.eq.s32.totalorder %v5908_v53, %v5489_v29  ;;  %v3687_v53 = vsel %vm1947_vm0, 1.0, %v6746_v56 }
 0x256   : > { %v6119_v13 = vadd.f32 %v3720_v20, %v2108_v18  ;;  %v3622_v18 = vsel %vm1130_vm14, 1.0, %v6746_v56  ;;  %v3590_v20 = vsel %vm954_vm15, 1.0, %v6746_v56  ;;  %v3671_v28 = vsel %vm1835_vm2, 1.0, %v6746_v56 }
 0x257   : > { %v1178_v38 = vadd.f32 %v3622_v18, %v3590_v20 }
 0x258   : > { %v2263_v4 = vpop.permute.xlu1 %2262 }
 0x259   : > { %v2298_v35 = vmul.f32 %v2263_v4, %v2218_v9  ;;  %v2800_v9 = vld [vmem:[%s6637_s7 + $0x28] sm:$0xff]  ;;  %v6795_v4 = vld [vmem:[#allocation21_spill] sm:$0xff] }
 0x25a   : > { %v4000_v48 = vpop.f32.mrf.mxu0  ;;  %vm1498_vm5 = vcmp.eq.s32.totalorder %v6795_v4, %v5481_v22  ;;  %v6798_v4 = vld [vmem:[#allocation23_spill] sm:$0xff] }
 0x25b   : > { %v2314_v42 = vadd.f32 %v2298_v35, %v1753_v41  ;;  %v2521_v27 = vadd.f32 %v4000_v48, %v815_v46  ;;  %v3638_v46 = vsel %vm1322_vm1, 1.0, %v6746_v56  ;;  %v3703_v41 = vsel %vm2059_vm4, 1.0, %v6746_v56 }
 0x25c   : > { %v2449_v21 = vpop.f32.mrf.mxu0  ;;  %v1995_v35 = vadd.f32 %v3687_v53, %v3671_v28  ;;  %v3654_v48 = vsel %vm1498_vm5, 1.0, %v6746_v56  ;;  %vm1500_vm15 = vcmp.eq.s32.totalorder %v6798_v4, %v5481_v22 }
 0x25d   : > { %v2520_v19 = vadd.f32 %v2449_v21, %v810_v44  ;;  %v2039_v50 = vpop.permute.xlu1 %2038  ;;  %4008 = vmatmul.mubr.msk.f32.gmra.mxu0 %vm430_vm12, %v2314_v42  ;;  %v2553_v60 = vmul.f32 0.01, %v2521_v27  ;;  %vm2537_vm8 = vcmp.gt.f32.partialorder %v2521_v27, 0.0  ;;  %v1370_v44 = vadd.f32 %v3638_v46, %v1178_v38 }
 0x25e   : > { %vm2061_vm6 = vcmp.eq.s32.totalorder %v2039_v50, %v5489_v29  ;;  %v2107_v42 = vadd.f32 %v3703_v41, %v1995_v35  ;;  %v3656_v35 = vsel %vm1500_vm15, 1.0, %v6746_v56 }
 0x25f   : > { %v2552_v45 = vmul.f32 0.01, %v2520_v19  ;;  %v3705_v5 = vsel %vm2061_vm6, 1.0, %v6746_v56  ;;  %vm2536_vm7 = vcmp.gt.f32.partialorder %v2520_v19, 0.0  ;;  %v2569_v17 = vsel %vm2537_vm8, %v2521_v27, %v2553_v60  ;;  %v2798_v60 = vld [vmem:[%s6637_s7 + $0x18] sm:$0xff] }
 0x260   : > { %v6132_v1 = vadd.f32 %v3705_v5, %v1997_v25  ;;  %vm2171_vm6 = vcmp.eq.s32.totalorder %v6037_v2, %v5489_v29  ;;  %v1546_v2 = vadd.f32 %v3654_v48, %v1370_v44  ;;  %v1548_v44 = vadd.f32 %v3656_v35, %v6002_v58 }
 0x261   : > { %v2568_v11 = vsel %vm2536_vm7, %v2520_v19, %v2552_v45  ;;  %v3719_v24 = vsel %vm2171_vm6, 1.0, %v6746_v56  ;;  %v2797_v45 = vld [vmem:[%s6637_s7 + $0x10] sm:$0xff] }
 0x262   : > { %v1305_v57 = vpop.permute.xlu1 %1304  ;;  %4054 = vmatprep.mubr.f32.mxu1 %v2568_v11  ;;  %v2219_v27 = vadd.f32 %v3719_v24, %v2107_v42  ;;  %v2796_v11 = vld [vmem:[%s6637_s7 + $0x8] sm:$0xff] }
 0x263   : > { %vm1325_vm9 = vcmp.eq.s32.totalorder %v1305_v57, %v5481_v22  ;;  %4055 = vmatmul.mubr.f32.gmra.mxu1 %v2569_v17  ;;  %v2795_v57 = vld [vmem:[%s6637_s7] sm:$0xff] }
 0x264   : > { %v3641_v8 = vsel %vm1325_vm9, 1.0, %v6746_v56 }
 0x265   : > { %v6137_v40 = vadd.f32 %v3641_v8, %v6063_v33  ;;  %v2807_v33 = vld [vmem:[%s6637_s7 + $0x60] sm:$0xff]  ;;  %v6229_v8 = vpop.permute.xlu0 %942 }
 0x266   : > { %4081 = vmatprep.subr.mxu0 %v2807_v33  ;;  %vm959_vm2 = vcmp.eq.s32.totalorder %v6229_v8, %v5481_v22 }
 0x267   : > { %v940_v52 = vpop.permute.xlu1 %939  ;;  %4082 = vmatpush3.msra.mxu0 %v2807_v33 }
 0x268   : > { %vm958_vm10 = vcmp.eq.s32.totalorder %v940_v52, %v5481_v22  ;;  %4083 = vmatprep.subr.mxu0 %v2806_v30  ;;  %v819_v52 = vpop.f32.mrf.mxu1 }
 0x269   : > { %v3594_v49 = vsel %vm958_vm10, 1.0, %v6746_v56  ;;  %4084 = vmatpush3.msra.mxu0 %v2806_v30  ;;  %v1722_v33 = vpop.permute.xlu0 %1721 }
 0x26a   : > { %4085 = vmatprep.subr.mxu0 %v2805_v0 }
 0x26b   : > { %4086 = vmatpush3.msra.mxu0 %v2805_v0  ;;  %v820_v0 = vadd.f32 %v819_v52, %v6027_v15 }
 0x26c   : > { %v1116_v47 = vpop.permute.xlu1 %1115  ;;  %4087 = vmatprep.subr.mxu0 %v2804_v34 }
 0x26d   : > { %vm1134_vm13 = vcmp.eq.s32.totalorder %v1116_v47, %v5481_v22  ;;  %4088 = vmatpush3.msra.mxu0 %v2804_v34  ;;  %v1755_v47 = vmul.f32 %v1722_v33, %v6085_v55  ;;  %v6797_v55 = vld [vmem:[#allocation55_spill] sm:$0xff] }
 0x26e   : > { %v3626_v32 = vsel %vm1134_vm13, 1.0, %v6746_v56  ;;  %4089 = vmatprep.subr.mxu0 %v2803_v6  ;;  %vm2175_vm9 = vcmp.eq.s32.totalorder %v6797_v55, %v5489_v29 }
 0x26f   : > { %v1182_v14 = vadd.f32 %v3626_v32, %v3594_v49  ;;  %4090 = vmatpush3.msra.mxu0 %v2803_v6  ;;  %v6796_v49 = vld [vmem:[#allocation39_spill] sm:$0xff] }
 0x270   : > { %4091 = vmatprep.subr.mxu0 %v2802_v12  ;;  %vm1951_vm8 = vcmp.eq.s32.totalorder %v6796_v49, %v5489_v29 }
 0x271   : > { %v1717_v26 = vpop.permute.xlu1 %1716  ;;  %v6169_v7 = vadd.f32 %v3642_v59, %v1182_v14  ;;  %4092 = vmatpush3.msra.mxu0 %v2802_v12  ;;  %v3691_v6 = vsel %vm1951_vm8, 1.0, %v6746_v56 }
 0x272   : > { %4093 = vmatprep.subr.mxu0 %v2801_v62  ;;  %v1754_v51 = vmul.f32 %v1717_v26, %v1546_v2 }
 0x273   : > { %4094 = vmatpush3.msra.mxu0 %v2801_v62 }
 0x274   : > { %4095 = vmatprep.subr.mxu0 %v2800_v9 }
 0x275   : > { %4096 = vmatpush3.msra.mxu0 %v2800_v9 }
 0x276   : > { %v1821_v63 = vpop.permute.xlu1 %1820  ;;  %4097 = vmatprep.subr.mxu0 %v2799_v16 }
 0x277   : > { %4098 = vmatpush3.msra.mxu0 %v2799_v16  ;;  %vm1839_vm7 = vcmp.eq.s32.totalorder %v1821_v63, %v5489_v29  ;;  %v3723_v63 = vsel %vm2175_vm9, 1.0, %v6746_v56 }
 0x278   : > { %4099 = vmatprep.subr.mxu0 %v2798_v60  ;;  %v3675_v14 = vsel %vm1839_vm7, 1.0, %v6746_v56 }
 0x279   : > { %4100 = vmatpush3.msra.mxu0 %v2798_v60  ;;  %v3595_v60 = vsel %vm959_vm2, 1.0, %v6746_v56 }
 0x27a   : > { %4101 = vmatprep.subr.mxu0 %v2797_v45 }
 0x27b   : > { %v6206_v3 = vpop.permute.xlu1 %2150  ;;  %4102 = vmatpush3.msra.mxu0 %v2797_v45 }
 0x27c   : > { %4103 = vmatprep.subr.mxu0 %v2796_v11  ;;  %vm2173_vm14 = vcmp.eq.s32.totalorder %v6206_v3, %v5489_v29 }
 0x27d   : > { %4104 = vmatpush3.msra.mxu0 %v2796_v11  ;;  %v3721_v41 = vsel %vm2173_vm14, 1.0, %v6746_v56 }
 0x27e   : > { %4105 = vmatprep.subr.mxu0 %v2795_v57  ;;  %v2221_v48 = vadd.f32 %v3721_v41, %v6132_v1  ;;  %v6799_v1 = vld [vmem:[#allocation40_spill] sm:$0xff] }
 0x27f   : > { %4106 = vmatpush3.msra.mxu0 %v2795_v57  ;;  %vm1952_vm7 = vcmp.eq.s32.totalorder %v6799_v1, %v5489_v29 }
 0x280   : > { %v2267_v21 = vpop.permute.xlu1 %2266  ;;  %v3692_v11 = vsel %vm1952_vm7, 1.0, %v6746_v56 }
 0x281   : > { %v2299_v19 = vmul.f32 %v2267_v21, %v2219_v27 }
 0x283   : > { %v2315_v50 = vadd.f32 %v2299_v19, %v1754_v51  ;;  %v1732_v51 = vpop.permute.xlu0 %1731 }
 0x285   : > { %v6210_v25 = vpop.permute.xlu1 %1118  ;;  %4010 = vmatprep.mubr.msk.f32.mxu0 %vm430_vm12, %v2315_v50 }
 0x286   : > { %vm1135_vm4 = vcmp.eq.s32.totalorder %v6210_v25, %v5481_v22 }
 0x287   : > { %v3627_v45 = vsel %vm1135_vm4, 1.0, %v6746_v56 }
 0x28a   : > { %v6219_v5 = vpop.permute.xlu1 %1480 }
 0x28b   : > { %vm1501_vm0 = vcmp.eq.s32.totalorder %v6219_v5, %v5481_v22 }
 0x28c   : > { %v3657_v21 = vsel %vm1501_vm0, 1.0, %v6746_v56 }
 0x28d   : > { %v1549_v19 = vadd.f32 %v3657_v21, %v6137_v40  ;;  %v6800_v40 = vld [vmem:[#allocation54_spill] sm:$0xff] }
 0x28f   : > { %v6227_v17 = vpop.permute.xlu1 %1823  ;;  %v1757_v31 = vmul.f32 %v1732_v51, %v1549_v19 }
 0x290   : > { %vm1840_vm5 = vcmp.eq.s32.totalorder %v6227_v17, %v5489_v29  ;;  %v1183_v17 = vadd.f32 %v3627_v45, %v3595_v60 }
 0x291   : > { %v3676_v25 = vsel %vm1840_vm5, 1.0, %v6746_v56 }
 0x292   : > { %v2000_v52 = vadd.f32 %v3692_v11, %v3676_v25 }
 0x294   : > { %v2154_v23 = vpop.permute.xlu1 %2153 }
 0x295   : > { %vm2174_vm1 = vcmp.eq.s32.totalorder %v2154_v23, %v5489_v29 }
 0x296   : > { %v3722_v50 = vsel %vm2174_vm1, 1.0, %v6746_v56 }
 0x297   : > { %v2222_v57 = vadd.f32 %v3722_v50, %v6114_v39 }
 0x299   : > { %v2271_v30 = vpop.permute.xlu1 %2270 }
 0x29a   : > { %v2300_v36 = vmul.f32 %v2271_v30, %v6119_v13  ;;  %v1999_v13 = vadd.f32 %v3691_v6, %v3675_v14  ;;  %v1737_v30 = vpop.permute.xlu0 %1736 }
 0x29b   : > { %v4003_v32 = vpop.f32.mrf.mxu0 }
 0x29c   : > { %v2316_v34 = vadd.f32 %v2300_v36, %v1755_v47  ;;  %v2523_v59 = vadd.f32 %v4003_v32, %v825_v37 }
 0x29d   : > { %v2459_v26 = vpop.f32.mrf.mxu0 }
 0x29e   : > { %v2522_v12 = vadd.f32 %v2459_v26, %v820_v0  ;;  %v2045_v18 = vpop.permute.xlu1 %2044  ;;  %4011 = vmatmul.mubr.msk.f32.gmra.mxu0 %vm430_vm12, %v2316_v34  ;;  %v2555_v54 = vmul.f32 0.01, %v2523_v59  ;;  %vm2539_vm13 = vcmp.gt.f32.partialorder %v2523_v59, 0.0 }
 0x29f   : > { %vm2063_vm10 = vcmp.eq.s32.totalorder %v2045_v18, %v5489_v29 }
 0x2a0   : > { %v2554_v10 = vmul.f32 0.01, %v2522_v12  ;;  %v3707_v62 = vsel %vm2063_vm10, 1.0, %v6746_v56  ;;  %vm2538_vm11 = vcmp.gt.f32.partialorder %v2522_v12, 0.0  ;;  %v2571_v53 = vsel %vm2539_vm13, %v2523_v59, %v2555_v54 }
 0x2a1   : > { %v2111_v20 = vadd.f32 %v3707_v62, %v1999_v13  ;;  %vm2064_vm10 = vcmp.eq.s32.totalorder %v6800_v40, %v5489_v29  ;;  %v3974_v13 = vpop.f32.mrf.mxu1 }
 0x2a2   : > { %v2570_v38 = vsel %vm2538_vm11, %v2522_v12, %v2554_v10  ;;  %v3708_v39 = vsel %vm2064_vm10, 1.0, %v6746_v56  ;;  %v835_v54 = vadd.f32 %v3974_v13, %v6027_v15 }
 0x2a3   : > { %v1311_v9 = vpop.permute.xlu1 %1310  ;;  %4057 = vmatprep.mubr.f32.mxu1 %v2570_v38  ;;  %v2223_v46 = vadd.f32 %v3723_v63, %v2111_v20  ;;  %v2112_v59 = vadd.f32 %v3708_v39, %v2000_v52 }
 0x2a4   : > { %4058 = vmatmul.mubr.f32.gmra.mxu1 %v2571_v53  ;;  %vm1327_vm8 = vcmp.eq.s32.totalorder %v1311_v9, %v5481_v22 }
 0x2a5   : > { %v3643_v8 = vsel %vm1327_vm8, 1.0, %v6746_v56 }
 0x2a8   : > { %v1484_v28 = vpop.permute.xlu1 %1483 }
 0x2a9   : > { %vm1502_vm6 = vcmp.eq.s32.totalorder %v1484_v28, %v5481_v22 }
 0x2aa   : > { %v3658_v5 = vsel %vm1502_vm6, 1.0, %v6746_v56 }
 0x2ab   : > { %v1550_v37 = vadd.f32 %v3658_v5, %v6169_v7 }
 0x2ad   : > { %v1727_v16 = vpop.permute.xlu1 %1726  ;;  %v1758_v14 = vmul.f32 %v1737_v30, %v1550_v37 }
 0x2ae   : > { %v1756_v42 = vmul.f32 %v1727_v16, %v1548_v44 }
 0x2b2   : > { %v2275_v24 = vpop.permute.xlu1 %2274 }
 0x2b3   : > { %v2301_v2 = vmul.f32 %v2275_v24, %v2221_v48 }
 0x2b5   : > { %v2317_v27 = vadd.f32 %v2301_v2, %v1756_v42  ;;  %v2600_v42 = vsub.s32 2, %v6778_v61 }
 0x2b7   : > { %v1487_v3 = vpop.permute.xlu1 %1486  ;;  %4013 = vmatprep.mubr.msk.f32.mxu0 %vm430_vm12, %v2317_v27  ;;  %v6301_v27 = vrot.slane %v6024_v43, %v2600_v42 }
 0x2b8   : > { %vm1503_vm9 = vcmp.eq.s32.totalorder %v1487_v3, %v5481_v22  ;;  %v1375_v22 = vadd.f32 %v3643_v8, %v1183_v17 }
 0x2b9   : > { %v3659_v47 = vsel %vm1503_vm9, 1.0, %v6746_v56 }
 0x2ba   : > { %v1551_v32 = vadd.f32 %v3659_v47, %v1375_v22 }
 0x2bc   : > { %v2160_v58 = vpop.permute.xlu1 %2159 }
 0x2bd   : > { %vm2176_vm11 = vcmp.eq.s32.totalorder %v2160_v58, %v5489_v29  ;;  %v1742_v29 = vpop.permute.xlu0 %1741 }
 0x2be   : > { %v3724_v0 = vsel %vm2176_vm11, 1.0, %v6746_v56  ;;  %v1759_v12 = vmul.f32 %v1742_v29, %v1551_v32  ;;  %v829_v56 = vpop.f32.mrf.mxu1 }
 0x2bf   : > { %v2224_v26 = vadd.f32 %v3724_v0, %v2112_v59  ;;  %v830_v10 = vadd.f32 %v829_v56, %v6027_v15  ;;  %v3015_v0 = vld [vmem:[%s6638_s8 + $0x38] sm:$0xff] }
 0x2c0   : > { %v3977_v4 = vpop.f32.mrf.mxu1  ;;  %4171 = vmatprep.subr.mxu1 %v3015_v0  ;;  %4131 = vmatprep.subr.mxu0 %v3015_v0 }
 0x2c1   : > { %v2279_v23 = vpop.permute.xlu1 %2278  ;;  %v845_v45 = vadd.f32 %v3977_v4, %v6027_v15  ;;  %4179 = vmatpush3.msra.mxu1 %v3015_v0  ;;  %v3008_v4 = vld [vmem:[%s6638_s8] sm:$0xff] }
 0x2c2   : > { %v2302_v33 = vmul.f32 %v2279_v23, %v2222_v57  ;;  %v839_v16 = vpop.f32.mrf.mxu1 }
 0x2c3   : > { %v840_v25 = vadd.f32 %v839_v16, %v6027_v15 }
 0x2c4   : > { %v2318_v36 = vadd.f32 %v2302_v33, %v1757_v31  ;;  %v3980_v41 = vpop.f32.mrf.mxu1 }
 0x2c5   : > { %v2283_v49 = vpop.permute.xlu1 %2282 }
 0x2c6   : > { %v2303_v34 = vmul.f32 %v2283_v49, %v2223_v46  ;;  %4014 = vmatmul.mubr.msk.f32.gmra.mxu0 %vm430_vm12, %v2318_v36  ;;  %v849_v35 = vpop.f32.mrf.mxu1  ;;  %v855_v49 = vadd.f32 %v3980_v41, %v6027_v15 }
 0x2c7   : > { %v850_v32 = vadd.f32 %v849_v35, %v6027_v15 }
 0x2c8   : > { %v2319_v7 = vadd.f32 %v2303_v34, %v1758_v14  ;;  %v6291_v44 = vpop.f32.mrf.mxu1 }
 0x2c9   : > { %v2287_v6 = vpop.permute.xlu1 %2286  ;;  %v865_v16 = vadd.f32 %v6291_v44, %v6027_v15 }
 0x2ca   : > { %v2304_v18 = vmul.f32 %v2287_v6, %v2224_v26  ;;  %4016 = vmatprep.mubr.msk.f32.mxu0 %vm430_vm12, %v2319_v7  ;;  %v6293_v48 = vpop.f32.mrf.mxu1 }
 0x2cb   : > { %v860_v35 = vadd.f32 %v6293_v48, %v6027_v15 }
 0x2cc   : > { %v2320_v55 = vadd.f32 %v2304_v18, %v1759_v12  ;;  %v6295_v24 = vpop.f32.mrf.mxu1 }
 0x2ce   : > { %4017 = vmatmul.mubr.msk.f32.gmra.mxu0 %vm430_vm12, %v2320_v55  ;;  %v6298_v2 = vpop.f32.mrf.mxu1 }
 0x2cf   : > { %v870_v44 = vadd.f32 %v6298_v2, %v6027_v15 }
 0x2dc   : > { %v4006_v62 = vpop.f32.mrf.mxu0 }
 0x2dd   : > { %v2525_v20 = vadd.f32 %v4006_v62, %v835_v54 }
 0x2de   : > { %v2469_v63 = vpop.f32.mrf.mxu0 }
 0x2df   : > { %v2524_v38 = vadd.f32 %v2469_v63, %v830_v10  ;;  %v2557_v9 = vmul.f32 0.01, %v2525_v20  ;;  %vm2541_vm14 = vcmp.gt.f32.partialorder %v2525_v20, 0.0  ;;  %v3014_v10 = vld [vmem:[%s6638_s8 + $0x30] sm:$0xff] }
 0x2e0   : > { %4172 = vmatprep.subr.mxu1 %v3014_v10 }
 0x2e1   : > { %v2556_v53 = vmul.f32 0.01, %v2524_v38  ;;  %vm2540_vm13 = vcmp.gt.f32.partialorder %v2524_v38, 0.0  ;;  %v2573_v28 = vsel %vm2541_vm14, %v2525_v20, %v2557_v9  ;;  %4180 = vmatpush3.msra.mxu1 %v3014_v10  ;;  %v3013_v20 = vld [vmem:[%s6638_s8 + $0x28] sm:$0xff] }
 0x2e2   : > { %4173 = vmatprep.subr.mxu1 %v3013_v20 }
 0x2e3   : > { %v2572_v46 = vsel %vm2540_vm13, %v2524_v38, %v2556_v53  ;;  %v3012_v38 = vld [vmem:[%s6638_s8 + $0x20] sm:$0xff]  ;;  %4181 = vmatpush3.msra.mxu1 %v3013_v20  ;;  %v3011_v53 = vld [vmem:[%s6638_s8 + $0x18] sm:$0xff] }
 0x2e4   : > { %4060 = vmatprep.mubr.f32.mxu1 %v2572_v46  ;;  %4174 = vmatprep.subr.mxu1 %v3012_v38  ;;  %v3010_v46 = vld [vmem:[%s6638_s8 + $0x10] sm:$0xff] }
 0x2e5   : > { %4061 = vmatmul.mubr.f32.gmra.mxu1 %v2573_v28  ;;  %v3009_v28 = vld [vmem:[%s6638_s8 + $0x8] sm:$0xff] }
 0x2e6   : > { %4182 = vmatpush3.msra.mxu1 %v3012_v38 }
 0x2e7   : > { %4175 = vmatprep.subr.mxu1 %v3011_v53 }
 0x2e8   : > { %4183 = vmatpush3.msra.mxu1 %v3011_v53 }
 0x2e9   : > { %4176 = vmatprep.subr.mxu1 %v3010_v46 }
 0x2ea   : > { %4184 = vmatpush3.msra.mxu1 %v3010_v46 }
 0x2eb   : > { %4177 = vmatprep.subr.mxu1 %v3009_v28 }
 0x2ec   : > { %4185 = vmatpush3.msra.mxu1 %v3009_v28 }
 0x2ed   : > { %4178 = vmatprep.subr.mxu1 %v3008_v4 }
 0x2ee   : > { %4186 = vmatpush3.msra.mxu1 %v3008_v4 }
 0x306   : > { %v4053_v3 = vpop.f32.mrf.mxu1 }
 0x307   : > { %v2674_v21 = vadd.f32 %v4053_v3, %v6301_v27 }
 0x308   : > { %v2668_v58 = vpop.f32.mrf.mxu1 }
 0x309   : > { %v2669_v1 = vadd.f32 %v2668_v58, %v6301_v27  ;;  %v2764_v51 = vmul.f32 0.01, %v2674_v21  ;;  %vm2748_vm12 = vcmp.gt.f32.partialorder %v2674_v21, 0.0 }
 0x30b   : > { %v2763_v19 = vmul.f32 0.01, %v2669_v1  ;;  %vm2747_vm15 = vcmp.gt.f32.partialorder %v2669_v1, 0.0  ;;  %v2780_v60 = vsel %vm2748_vm12, %v2674_v21, %v2764_v51  ;;  %v875_v51 = vadd.f32 %v6295_v24, %v6027_v15 }
 0x30d   : > { %v2779_v50 = vsel %vm2747_vm15, %v2669_v1, %v2763_v19 }
 0x30e   : > { %4107 = vmatprep.mubr.f32.mxu0 %v2779_v50 }
 0x30f   : > { %4108 = vmatmul.mubr.f32.vlgmr.msra.gmra.mxu0 %v2780_v60 }
 0x310   : > { %4132 = vmatpush3.msra.mxu0 %v3015_v0 }
 0x311   : > { %4133 = vmatprep.subr.mxu0 %v3014_v10 }
 0x312   : > { %4134 = vmatpush3.msra.mxu0 %v3014_v10 }
 0x313   : > { %4135 = vmatprep.subr.mxu0 %v3013_v20 }
 0x314   : > { %4136 = vmatpush3.msra.mxu0 %v3013_v20 }
 0x315   : > { %4137 = vmatprep.subr.mxu0 %v3012_v38 }
 0x316   : > { %4138 = vmatpush3.msra.mxu0 %v3012_v38 }
 0x317   : > { %4139 = vmatprep.subr.mxu0 %v3011_v53 }
 0x318   : > { %4140 = vmatpush3.msra.mxu0 %v3011_v53 }
 0x319   : > { %4141 = vmatprep.subr.mxu0 %v3010_v46 }
 0x31a   : > { %4142 = vmatpush3.msra.mxu0 %v3010_v46 }
 0x31b   : > { %4143 = vmatprep.subr.mxu0 %v3009_v28 }
 0x31c   : > { %4144 = vmatpush3.msra.mxu0 %v3009_v28 }
 0x31d   : > { %v4009_v5 = vpop.f32.mrf.mxu0  ;;  %4145 = vmatprep.subr.mxu0 %v3008_v4 }
 0x31e   : > { %v2527_v11 = vadd.f32 %v4009_v5, %v845_v45  ;;  %4146 = vmatpush3.msra.mxu0 %v3008_v4 }
 0x31f   : > { %v2479_v57 = vpop.f32.mrf.mxu0 }
 0x320   : > { %v2526_v40 = vadd.f32 %v2479_v57, %v840_v25  ;;  %v2559_v17 = vmul.f32 0.01, %v2527_v11  ;;  %vm2543_vm1 = vcmp.gt.f32.partialorder %v2527_v11, 0.0 }
 0x322   : > { %v2558_v8 = vmul.f32 0.01, %v2526_v40  ;;  %vm2542_vm0 = vcmp.gt.f32.partialorder %v2526_v40, 0.0  ;;  %v2575_v33 = vsel %vm2543_vm1, %v2527_v11, %v2559_v17 }
 0x323   : > { %v4056_v31 = vpop.f32.mrf.mxu1 }
 0x324   : > { %v2684_v23 = vadd.f32 %v4056_v31, %v6301_v27  ;;  %v2574_v52 = vsel %vm2542_vm0, %v2526_v40, %v2558_v8 }
 0x325   : > { %v2678_v37 = vpop.f32.mrf.mxu1  ;;  %4063 = vmatprep.mubr.f32.mxu1 %v2574_v52 }
 0x326   : > { %v2679_v30 = vadd.f32 %v2678_v37, %v6301_v27  ;;  %4064 = vmatmul.mubr.f32.gmra.mxu1 %v2575_v33  ;;  %v2766_v47 = vmul.f32 0.01, %v2684_v23  ;;  %vm2750_vm4 = vcmp.gt.f32.partialorder %v2684_v23, 0.0 }
 0x328   : > { %v2765_v22 = vmul.f32 0.01, %v2679_v30  ;;  %vm2749_vm2 = vcmp.gt.f32.partialorder %v2679_v30, 0.0  ;;  %v2782_v39 = vsel %vm2750_vm4, %v2684_v23, %v2766_v47 }
 0x32a   : > { %v2781_v36 = vsel %vm2749_vm2, %v2679_v30, %v2765_v22  ;;  %v2813_v30 = vsub.s32 3, %v6778_v61 }
 0x32b   : > { %4110 = vmatprep.mubr.f32.mxu0 %v2781_v36 }
 0x32c   : > { %4111 = vmatmul.mubr.f32.gmra.mxu0 %v2782_v39 }
 0x35e   : > { %v4012_v14 = vpop.f32.mrf.mxu0 }
 0x35f   : > { %v2529_v34 = vadd.f32 %v4012_v14, %v855_v49  ;;  %v6353_v49 = vrot.slane %v6024_v43, %v2813_v30 }
 0x360   : > { %v2489_v59 = vpop.f32.mrf.mxu0 }
 0x361   : > { %v2528_v7 = vadd.f32 %v2489_v59, %v850_v32  ;;  %v2561_v26 = vmul.f32 0.01, %v2529_v34  ;;  %vm2545_vm6 = vcmp.gt.f32.partialorder %v2529_v34, 0.0 }
 0x363   : > { %v2560_v29 = vmul.f32 0.01, %v2528_v7  ;;  %vm2544_vm5 = vcmp.gt.f32.partialorder %v2528_v7, 0.0  ;;  %v2577_v13 = vsel %vm2545_vm6, %v2529_v34, %v2561_v26 }
 0x364   : > { %v4059_v6 = vpop.f32.mrf.mxu1 }
 0x365   : > { %v2694_v12 = vadd.f32 %v4059_v6, %v6301_v27  ;;  %v2576_v18 = vsel %vm2544_vm5, %v2528_v7, %v2560_v29 }
 0x366   : > { %v2688_v55 = vpop.f32.mrf.mxu1  ;;  %4066 = vmatprep.mubr.f32.mxu1 %v2576_v18 }
 0x367   : > { %v2689_v56 = vadd.f32 %v2688_v55, %v6301_v27  ;;  %4067 = vmatmul.mubr.f32.gmra.mxu1 %v2577_v13  ;;  %v2768_v54 = vmul.f32 0.01, %v2694_v12  ;;  %vm2752_vm8 = vcmp.gt.f32.partialorder %v2694_v12, 0.0 }
 0x369   : > { %v2767_v62 = vmul.f32 0.01, %v2689_v56  ;;  %vm2751_vm7 = vcmp.gt.f32.partialorder %v2689_v56, 0.0  ;;  %v2784_v9 = vsel %vm2752_vm8, %v2694_v12, %v2768_v54 }
 0x36b   : > { %v2783_v63 = vsel %vm2751_vm7, %v2689_v56, %v2767_v62 }
 0x36c   : > { %4113 = vmatprep.mubr.f32.mxu0 %v2783_v63 }
 0x36d   : > { %4114 = vmatmul.mubr.f32.gmra.mxu0 %v2784_v9 }
 0x386   : > { %v4015_v41 = vpop.f32.mrf.mxu0 }
 0x387   : > { %v2531_v42 = vadd.f32 %v4015_v41, %v865_v16 }
 0x388   : > { %v2499_v3 = vpop.f32.mrf.mxu0 }
 0x389   : > { %v2530_v21 = vadd.f32 %v2499_v3, %v860_v35  ;;  %v2563_v58 = vmul.f32 0.01, %v2531_v42  ;;  %vm2547_vm10 = vcmp.gt.f32.partialorder %v2531_v42, 0.0 }
 0x38b   : > { %v2562_v1 = vmul.f32 0.01, %v2530_v21  ;;  %vm2546_vm9 = vcmp.gt.f32.partialorder %v2530_v21, 0.0  ;;  %v2579_v60 = vsel %vm2547_vm10, %v2531_v42, %v2563_v58 }
 0x38d   : > { %v2578_v19 = vsel %vm2546_vm9, %v2530_v21, %v2562_v1 }
 0x38e   : > { %v4018_v50 = vpop.f32.mrf.mxu0  ;;  %4069 = vmatprep.mubr.f32.mxu1 %v2578_v19 }
 0x38f   : > { %v2533_v45 = vadd.f32 %v4018_v50, %v875_v51  ;;  %4070 = vmatmul.mubr.f32.gmra.mxu1 %v2579_v60 }
 0x390   : > { %v2509_v48 = vpop.f32.mrf.mxu0 }
 0x391   : > { %v2532_v25 = vadd.f32 %v2509_v48, %v870_v44  ;;  %v2565_v5 = vmul.f32 0.01, %v2533_v45  ;;  %vm2549_vm13 = vcmp.gt.f32.partialorder %v2533_v45, 0.0 }
 0x393   : > { %v2564_v11 = vmul.f32 0.01, %v2532_v25  ;;  %vm2548_vm11 = vcmp.gt.f32.partialorder %v2532_v25, 0.0  ;;  %v2581_v40 = vsel %vm2549_vm13, %v2533_v45, %v2565_v5 }
 0x395   : > { %v2580_v57 = vsel %vm2548_vm11, %v2532_v25, %v2564_v11 }
 0x396   : > { %4072 = vmatprep.mubr.f32.mxu1 %v2580_v57 }
 0x397   : > { %4073 = vmatmul.mubr.f32.gmra.mxu1 %v2581_v40 }
 0x3a5   : > { %v4062_v24 = vpop.f32.mrf.mxu1 }
 0x3a6   : > { %v2704_v17 = vadd.f32 %v4062_v24, %v6301_v27 }
 0x3a7   : > { %v2698_v8 = vpop.f32.mrf.mxu1 }
 0x3a8   : > { %v2699_v31 = vadd.f32 %v2698_v8, %v6301_v27  ;;  %v2770_v23 = vmul.f32 0.01, %v2704_v17  ;;  %vm2754_vm12 = vcmp.gt.f32.partialorder %v2704_v17, 0.0 }
 0x3aa   : > { %v2769_v15 = vmul.f32 0.01, %v2699_v31  ;;  %vm2753_vm14 = vcmp.gt.f32.partialorder %v2699_v31, 0.0  ;;  %v2786_v52 = vsel %vm2754_vm12, %v2704_v17, %v2770_v23 }
 0x3ac   : > { %v2785_v2 = vsel %vm2753_vm14, %v2699_v31, %v2769_v15 }
 0x3ad   : > { %4116 = vmatprep.mubr.f32.mxu0 %v2785_v2 }
 0x3ae   : > { %4117 = vmatmul.mubr.f32.gmra.mxu0 %v2786_v52 }
 0x3cf   : > { %v6347_v37 = vpop.f32.mrf.mxu0 }
 0x3d0   : > { %v2887_v25 = vadd.f32 %v6347_v37, %v6353_v49 }
 0x3d1   : > { %v2881_v39 = vpop.f32.mrf.mxu0 }
 0x3d2   : > { %v2882_v60 = vadd.f32 %v2881_v39, %v6353_v49  ;;  %v2977_v24 = vmul.f32 0.01, %v2887_v25  ;;  %vm2961_vm14 = vcmp.gt.f32.partialorder %v2887_v25, 0.0 }
 0x3d4   : > { %v2976_v11 = vmul.f32 0.01, %v2882_v60  ;;  %vm2960_vm13 = vcmp.gt.f32.partialorder %v2882_v60, 0.0  ;;  %v2993_v31 = vsel %vm2961_vm14, %v2887_v25, %v2977_v24  ;;  %v3216_v25 = vld [vmem:[%s6394_s25 + $0x18] sm:$0xff]  ;;  %v3215_v24 = vld [vmem:[%s6394_s25 + $0x10] sm:$0xff] }
 0x3d5   : > { %vm3231_vm14 = vcmp.ne.s32.totalorder %v3215_v24, 0 }
 0x3d6   : > { %v2992_v8 = vsel %vm2960_vm13, %v2882_v60, %v2976_v11  ;;  %vm3232_vm13 = vcmp.ne.s32.totalorder %v3216_v25, 0 }
 0x3e6   : > { %v4065_v33 = vpop.f32.mrf.mxu1 }
 0x3e7   : > { %v2714_v47 = vadd.f32 %v4065_v33, %v6301_v27 }
 0x3e8   : > { %v2708_v22 = vpop.f32.mrf.mxu1 }
 0x3e9   : > { %v2709_v36 = vadd.f32 %v2708_v22, %v6301_v27  ;;  %v2772_v0 = vmul.f32 0.01, %v2714_v47  ;;  %vm2756_vm0 = vcmp.gt.f32.partialorder %v2714_v47, 0.0 }
 0x3eb   : > { %v2771_v32 = vmul.f32 0.01, %v2709_v36  ;;  %vm2755_vm15 = vcmp.gt.f32.partialorder %v2709_v36, 0.0  ;;  %v2788_v26 = vsel %vm2756_vm0, %v2714_v47, %v2772_v0 }
 0x3ec   : > { %v4112_v14 = vpop.f32.mrf.mxu0 }
 0x3ed   : > { %v2897_v34 = vadd.f32 %v4112_v14, %v6353_v49  ;;  %v2787_v59 = vsel %vm2755_vm15, %v2709_v36, %v2771_v32 }
 0x3ee   : > { %v2891_v7 = vpop.f32.mrf.mxu0  ;;  %4119 = vmatprep.mubr.f32.mxu0 %v2787_v59 }
 0x3ef   : > { %v2892_v29 = vadd.f32 %v2891_v7, %v6353_v49  ;;  %4120 = vmatmul.mubr.f32.gmra.mxu0 %v2788_v26  ;;  %v2979_v6 = vmul.f32 0.01, %v2897_v34  ;;  %vm2963_vm1 = vcmp.gt.f32.partialorder %v2897_v34, 0.0 }
 0x3f1   : > { %vm2962_vm2 = vcmp.gt.f32.partialorder %v2892_v29, 0.0  ;;  %v2978_v12 = vmul.f32 0.01, %v2892_v29  ;;  %v2995_v43 = vsel %vm2963_vm1, %v2897_v34, %v2979_v6 }
 0x3f3   : > { %v2994_v18 = vsel %vm2962_vm2, %v2892_v29, %v2978_v12 }
 0x3f4   : > { %4150 = vmatprep.mubr.msk.f32.mxu1 %vm684_vm3, %v2994_v18 }
 0x3f5   : > { %4151 = vmatmul.mubr.msk.f32.vlgmr.msra.gmra.mxu1 %vm684_vm3, %v2995_v43 }
 0x427   : > { %v4068_v55 = vpop.f32.mrf.mxu1 }
 0x428   : > { %v2724_v13 = vadd.f32 %v4068_v55, %v6301_v27 }
 0x429   : > { %v2718_v56 = vpop.f32.mrf.mxu1 }
 0x42a   : > { %v2719_v54 = vadd.f32 %v2718_v56, %v6301_v27  ;;  %v2774_v10 = vmul.f32 0.01, %v2724_v13  ;;  %vm2758_vm5 = vcmp.gt.f32.partialorder %v2724_v13, 0.0 }
 0x42c   : > { %v2773_v62 = vmul.f32 0.01, %v2719_v54  ;;  %vm2757_vm4 = vcmp.gt.f32.partialorder %v2719_v54, 0.0  ;;  %v2790_v53 = vsel %vm2758_vm5, %v2724_v13, %v2774_v10 }
 0x42d   : > { %v4115_v20 = vpop.f32.mrf.mxu0 }
 0x42e   : > { %v2907_v63 = vadd.f32 %v4115_v20, %v6353_v49  ;;  %v2789_v38 = vsel %vm2757_vm4, %v2719_v54, %v2773_v62 }
 0x42f   : > { %v2901_v9 = vpop.f32.mrf.mxu0  ;;  %4122 = vmatprep.mubr.f32.mxu0 %v2789_v38  ;;  %v3018_v38 = vsub.s32 4, %v6778_v61 }
 0x430   : > { %v2902_v46 = vadd.f32 %v2901_v9, %v6353_v49  ;;  %4123 = vmatmul.mubr.f32.gmra.mxu0 %v2790_v53  ;;  %v2981_v28 = vmul.f32 0.01, %v2907_v63  ;;  %vm2965_vm6 = vcmp.gt.f32.partialorder %v2907_v63, 0.0 }
 0x432   : > { %vm2964_vm7 = vcmp.gt.f32.partialorder %v2902_v46, 0.0  ;;  %v2980_v4 = vmul.f32 0.01, %v2902_v46  ;;  %v2997_v41 = vsel %vm2965_vm6, %v2907_v63, %v2981_v28 }
 0x434   : > { %v2996_v16 = vsel %vm2964_vm7, %v2902_v46, %v2980_v4 }
 0x435   : > { %4153 = vmatprep.mubr.msk.f32.mxu1 %vm684_vm3, %v2996_v16  ;;  %v3214_v16 = vld [vmem:[%s6394_s25 + $0x8] sm:$0xff] }
 0x436   : > { %4154 = vmatmul.mubr.msk.f32.gmra.mxu1 %vm684_vm3, %v2997_v41  ;;  %v4576_v41 = vld [vmem:[%s6639_s9] sm:$0xff]  ;;  %vm3230_vm7 = vcmp.ne.s32.totalorder %v3214_v16, 0 }
 0x44f   : > { %v4071_v35 = vpop.f32.mrf.mxu1 }
 0x450   : > { %v2734_v42 = vadd.f32 %v4071_v35, %v6301_v27  ;;  %v6402_v35 = vrot.slane %v4576_v41, %v3018_v38 }
 0x451   : > { %v2728_v3 = vpop.f32.mrf.mxu1 }
 0x452   : > { %v2729_v21 = vadd.f32 %v2728_v3, %v6301_v27  ;;  %v2776_v58 = vmul.f32 0.01, %v2734_v42  ;;  %vm2760_vm9 = vcmp.gt.f32.partialorder %v2734_v42, 0.0  ;;  %v3213_v3 = vld [vmem:[%s6394_s25] sm:$0xff] }
 0x454   : > { %v2775_v1 = vmul.f32 0.01, %v2729_v21  ;;  %vm2759_vm8 = vcmp.gt.f32.partialorder %v2729_v21, 0.0  ;;  %v2792_v50 = vsel %vm2760_vm9, %v2734_v42, %v2776_v58 }
 0x456   : > { %v2791_v51 = vsel %vm2759_vm8, %v2729_v21, %v2775_v1 }
 0x457   : > { %v4074_v19 = vpop.f32.mrf.mxu1  ;;  %4125 = vmatprep.mubr.f32.mxu0 %v2791_v51 }
 0x458   : > { %v2744_v44 = vadd.f32 %v4074_v19, %v6301_v27  ;;  %4126 = vmatmul.mubr.f32.gmra.mxu0 %v2792_v50  ;;  %v3217_v50 = vld [vmem:[%s6394_s25 + $0x20] sm:$0xff] }
 0x459   : > { %v2738_v45 = vpop.f32.mrf.mxu1 }
 0x45a   : > { %v2739_v48 = vadd.f32 %v2738_v45, %v6301_v27  ;;  %v2778_v5 = vmul.f32 0.01, %v2744_v44  ;;  %vm2762_vm11 = vcmp.gt.f32.partialorder %v2744_v44, 0.0 }
 0x45c   : > { %v2777_v57 = vmul.f32 0.01, %v2739_v48  ;;  %vm2761_vm10 = vcmp.gt.f32.partialorder %v2739_v48, 0.0  ;;  %v2794_v17 = vsel %vm2762_vm11, %v2744_v44, %v2778_v5  ;;  %vm3233_vm11 = vcmp.ne.s32.totalorder %v3217_v50, 0 }
 0x45e   : > { %v2793_v40 = vsel %vm2761_vm10, %v2739_v48, %v2777_v57  ;;  %vm3229_vm10 = vcmp.ne.s32.totalorder %v3213_v3, 0 }
 0x45f   : > { %4128 = vmatprep.mubr.f32.mxu0 %v2793_v40 }
 0x460   : > { %4129 = vmatmul.mubr.f32.gmra.mxu0 %v2794_v17 }
 0x461   : > { %4147 = vmatprep.mubr.msk.f32.mxu0 %vm684_vm3, %v2992_v8 }
 0x464   : > { %4148 = vmatmul.mubr.msk.f32.vlgmr.msra.gmra.mxu0 %vm684_vm3, %v2993_v31  ;;  %v3218_v31 = vld [vmem:[%s6394_s25 + $0x28] sm:$0xff] }
 0x46e   : > { %v4118_v27 = vpop.f32.mrf.mxu0 }
 0x46f   : > { %v2917_v23 = vadd.f32 %v4118_v27, %v6353_v49 }
 0x470   : > { %v2911_v15 = vpop.f32.mrf.mxu0 }
 0x471   : > { %v2912_v2 = vadd.f32 %v2911_v15, %v6353_v49  ;;  %v2983_v52 = vmul.f32 0.01, %v2917_v23  ;;  %vm2967_vm12 = vcmp.gt.f32.partialorder %v2917_v23, 0.0  ;;  %v3220_v15 = vld [vmem:[%s6394_s25 + $0x38] sm:$0xff] }
 0x473   : > { %vm2966_vm15 = vcmp.gt.f32.partialorder %v2912_v2, 0.0  ;;  %v2982_v37 = vmul.f32 0.01, %v2912_v2  ;;  %v2999_v30 = vsel %vm2967_vm12, %v2917_v23, %v2983_v52  ;;  %v3219_v52 = vld [vmem:[%s6394_s25 + $0x30] sm:$0xff]  ;;  %vm3236_vm12 = vcmp.ne.s32.totalorder %v3220_v15, 0 }
 0x475   : > { %v2998_v33 = vsel %vm2966_vm15, %v2912_v2, %v2982_v37  ;;  %vm3235_vm15 = vcmp.ne.s32.totalorder %v3219_v52, 0 }
 0x476   : > { %4156 = vmatprep.mubr.msk.f32.mxu1 %vm684_vm3, %v2998_v33 }
 0x477   : > { %4157 = vmatmul.mubr.msk.f32.gmra.mxu1 %vm684_vm3, %v2999_v30 }
 0x4af   : > { %v4121_v47 = vpop.f32.mrf.mxu0 }
 0x4b0   : > { %v2927_v22 = vadd.f32 %v4121_v47, %v6353_v49 }
 0x4b1   : > { %v2921_v36 = vpop.f32.mrf.mxu0 }
 0x4b2   : > { %v2922_v39 = vadd.f32 %v2921_v36, %v6353_v49  ;;  %v2985_v0 = vmul.f32 0.01, %v2927_v22  ;;  %vm2969_vm0 = vcmp.gt.f32.partialorder %v2927_v22, 0.0 }
 0x4b4   : > { %vm2968_vm1 = vcmp.gt.f32.partialorder %v2922_v39, 0.0  ;;  %v2984_v32 = vmul.f32 0.01, %v2922_v39  ;;  %v3001_v34 = vsel %vm2969_vm0, %v2927_v22, %v2985_v0  ;;  %v3221_v0 = vld [vmem:[%s6394_s25 + $0x40] sm:$0xff] }
 0x4b5   : > { %v4152_v56 = vpop.f32.mrf.mxu1 }
 0x4b6   : > { %v3000_v14 = vsel %vm2968_vm1, %v2922_v39, %v2984_v32  ;;  %v3150_v11 = vadd.f32 %v4152_v56, %v6402_v35  ;;  %v3222_v39 = vld [vmem:[%s6394_s25 + $0x48] sm:$0xff]  ;;  %vm3237_vm1 = vcmp.ne.s32.totalorder %v3221_v0, 0 }
 0x4b7   : > { %4159 = vmatprep.mubr.msk.f32.mxu1 %vm684_vm3, %v3000_v14  ;;  %v3144_v63 = vpop.f32.mrf.mxu1  ;;  %vm3238_vm0 = vcmp.ne.s32.totalorder %v3222_v39, 0 }
 0x4b8   : > { %4160 = vmatmul.mubr.msk.f32.gmra.mxu1 %vm684_vm3, %v3001_v34  ;;  %v3145_v17 = vadd.f32 %v3144_v63, %v6402_v35  ;;  %v6425_v8 = vsel %vm3232_vm13, %v3150_v11, -1e+30  ;;  %v3227_v11 = vld [vmem:[%s6394_s25 + $0x70] sm:$0xff] }
 0x4ba   : > { %v6430_v23 = vsel %vm3231_vm14, %v3145_v17, -1e+30 }
 0x4f0   : > { %v4124_v59 = vpop.f32.mrf.mxu0 }
 0x4f1   : > { %v2937_v7 = vadd.f32 %v4124_v59, %v6353_v49 }
 0x4f2   : > { %v2931_v26 = vpop.f32.mrf.mxu0 }
 0x4f3   : > { %v2932_v29 = vadd.f32 %v2931_v26, %v6353_v49  ;;  %v2987_v6 = vmul.f32 0.01, %v2937_v7  ;;  %vm2971_vm2 = vcmp.gt.f32.partialorder %v2937_v7, 0.0 }
 0x4f5   : > { %vm2970_vm4 = vcmp.gt.f32.partialorder %v2932_v29, 0.0  ;;  %v2986_v12 = vmul.f32 0.01, %v2932_v29  ;;  %v3003_v43 = vsel %vm2971_vm2, %v2937_v7, %v2987_v6  ;;  %v3223_v6 = vld [vmem:[%s6394_s25 + $0x50] sm:$0xff] }
 0x4f6   : > { %v4155_v53 = vpop.f32.mrf.mxu1 }
 0x4f7   : > { %v3002_v18 = vsel %vm2970_vm4, %v2932_v29, %v2986_v12  ;;  %v3160_v27 = vadd.f32 %v4155_v53, %v6402_v35  ;;  %v3224_v29 = vld [vmem:[%s6394_s25 + $0x58] sm:$0xff]  ;;  %vm3239_vm4 = vcmp.ne.s32.totalorder %v3223_v6, 0  ;;  %v3226_v53 = vld [vmem:[%s6394_s25 + $0x68] sm:$0xff] }
 0x4f8   : > { %4162 = vmatprep.mubr.msk.f32.mxu1 %vm684_vm3, %v3002_v18  ;;  %v3154_v21 = vpop.f32.mrf.mxu1  ;;  %vm3240_vm2 = vcmp.ne.s32.totalorder %v3224_v29, 0 }
 0x4f9   : > { %4163 = vmatmul.mubr.msk.f32.gmra.mxu1 %vm684_vm3, %v3003_v43  ;;  %v3155_v44 = vadd.f32 %v3154_v21, %v6402_v35 }
 0x4fb   : > { %v6420_v40 = vsel %vm3233_vm11, %v3155_v44, -1e+30 }
 0x518   : > { %v4127_v55 = vpop.f32.mrf.mxu0 }
 0x519   : > { %v2947_v13 = vadd.f32 %v4127_v55, %v6353_v49 }
 0x51a   : > { %v2941_v54 = vpop.f32.mrf.mxu0 }
 0x51b   : > { %v2942_v10 = vadd.f32 %v2941_v54, %v6353_v49  ;;  %v2989_v62 = vmul.f32 0.01, %v2947_v13  ;;  %vm2973_vm5 = vcmp.gt.f32.partialorder %v2947_v13, 0.0 }
 0x51d   : > { %vm2972_vm6 = vcmp.gt.f32.partialorder %v2942_v10, 0.0  ;;  %v2988_v20 = vmul.f32 0.01, %v2942_v10  ;;  %v3005_v28 = vsel %vm2973_vm5, %v2947_v13, %v2989_v62  ;;  %vm3242_vm5 = vcmp.ne.s32.totalorder %v3226_v53, 0 }
 0x51f   : > { %v3004_v9 = vsel %vm2972_vm6, %v2942_v10, %v2988_v20 }
 0x520   : > { %v4130_v46 = vpop.f32.mrf.mxu0  ;;  %4165 = vmatprep.mubr.msk.f32.mxu1 %vm684_vm3, %v3004_v9 }
 0x521   : > { %v2957_v4 = vadd.f32 %v4130_v46, %v6353_v49  ;;  %4166 = vmatmul.mubr.msk.f32.gmra.mxu1 %vm684_vm3, %v3005_v28 }
 0x522   : > { %v2951_v61 = vpop.f32.mrf.mxu0 }
 0x523   : > { %v2952_v42 = vadd.f32 %v2951_v61, %v6353_v49  ;;  %v2991_v58 = vmul.f32 0.01, %v2957_v4  ;;  %vm2975_vm8 = vcmp.gt.f32.partialorder %v2957_v4, 0.0 }
 0x524   : > { %v4149_v1 = vpop.f32.mrf.mxu0 }
 0x525   : > { %vm2974_vm9 = vcmp.gt.f32.partialorder %v2952_v42, 0.0  ;;  %v2990_v51 = vmul.f32 0.01, %v2952_v42  ;;  %v3140_v19 = vadd.f32 %v4149_v1, %v6402_v35  ;;  %v3007_v5 = vsel %vm2975_vm8, %v2957_v4, %v2991_v58  ;;  %v3225_v4 = vld [vmem:[%s6394_s25 + $0x60] sm:$0xff] }
 0x526   : > { %v3134_v60 = vpop.f32.mrf.mxu0  ;;  %vm3241_vm6 = vcmp.ne.s32.totalorder %v3225_v4, 0  ;;  %vm3243_vm8 = vcmp.ne.s32.totalorder %v3227_v11, 0 }
 0x527   : > { %v3135_v45 = vadd.f32 %v3134_v60, %v6402_v35  ;;  %v3006_v49 = vsel %vm2974_vm9, %v2952_v42, %v2990_v51  ;;  %v6410_v48 = vsel %vm3230_vm7, %v3140_v19, -1e+30 }
 0x528   : > { %4168 = vmatprep.mubr.msk.f32.mxu1 %vm684_vm3, %v3006_v49  ;;  %3263 = vmax.xlane.f32.xlu1 %v6410_v48 }
 0x529   : > { %4169 = vmatmul.mubr.msk.f32.gmra.mxu1 %vm684_vm3, %v3007_v5  ;;  %v6417_v57 = vsel %vm3229_vm10, %v3135_v45, -1e+30  ;;  %vm3234_vm3 = vcmp.ne.s32.totalorder %v3218_v31, 0 }
 0x52a   : > { %3261 = vmax.xlane.f32.xlu0 %v6417_v57  ;;  %v6434_v2 = vsel %vm3234_vm3, %v3160_v27, -1e+30 }
 0x52c   : > { %3269 = vmax.xlane.f32.xlu1 %v6420_v40 }
 0x52e   : > { %3267 = vmax.xlane.f32.xlu0 %v6425_v8 }
 0x532   : > { %3265 = vmax.xlane.f32.xlu0 %v6430_v23 }
 0x536   : > { %3271 = vmax.xlane.f32.xlu0 %v6434_v2 }
 0x537   : > { %v4158_v37 = vpop.f32.mrf.mxu1 }
 0x538   : > { %v3170_v33 = vadd.f32 %v4158_v37, %v6402_v35 }
 0x539   : > { %v3164_v30 = vpop.f32.mrf.mxu1 }
 0x53a   : > { %v3165_v47 = vadd.f32 %v3164_v30, %v6402_v35  ;;  %v6440_v22 = vsel %vm3236_vm12, %v3170_v33, -1e+30 }
 0x53b   : > { %3275 = vmax.xlane.f32.xlu0 %v6440_v22 }
 0x53c   : > { %v6443_v36 = vsel %vm3235_vm15, %v3165_v47, -1e+30 }
 0x53d   : > { %3273 = vmax.xlane.f32.xlu1 %v6443_v36 }
 0x578   : > { %v4161_v32 = vpop.f32.mrf.mxu1 }
 0x579   : > { %v3180_v14 = vadd.f32 %v4161_v32, %v6402_v35 }
 0x57a   : > { %v3174_v34 = vpop.f32.mrf.mxu1 }
 0x57b   : > { %v3175_v59 = vadd.f32 %v3174_v34, %v6402_v35  ;;  %v6450_v7 = vsel %vm3238_vm0, %v3180_v14, -1e+30 }
 0x57c   : > { %3279 = vmax.xlane.f32.xlu0 %v6450_v7 }
 0x57d   : > { %v6453_v26 = vsel %vm3237_vm1, %v3175_v59, -1e+30 }
 0x57e   : > { %3277 = vmax.xlane.f32.xlu1 %v6453_v26 }
 0x5b1   : > { %v3264_v62 = vpop.xlane.xlu1 %3263 }
 0x5b2   : > { %v3294_v63 = vsub.f32 %v6410_v48, %v3264_v62  ;;  %v3228_v48 = vld [vmem:[%s6394_s25 + $0x78] sm:$0xff]  ;;  %s4625_s25 = scalar_lea.vmem %s6583_s18, 2048 }
 0x5b3   : > { %v3262_v54 = vpop.xlane.xlu0 %3261  ;;  %vm3244_vm7 = vcmp.ne.s32.totalorder %v3228_v48, 0  ;;  %p4626_p11 = scmp.ne.s32.totalorder %s6583_s18, %s4625_s25  ;;  %p4633_p1 = scmp.lt.s32.totalorder %s4631_s30, %s4625_s25 }
 0x5b4   : > { %v3293_v38 = vsub.f32 %v6417_v57, %v3262_v54  ;;  %v3311_v46 = vmul.f32 1.442695, %v3294_v63 }
 0x5b5   : > { %v3270_v42 = vpop.xlane.xlu1 %3269  ;;  %p4627_p12 = pnand %p4626_p11, %p4795_p5  ;;  %p4634_p2 = por %p4633_p1, %p4632_p0 }
 0x5b6   : > { %v3309_v16 = vmul.f32 1.442695, %v3293_v38  ;;  %4501 = vpow2.f32 %v3311_v46  ;;  %v3297_v60 = vsub.f32 %v6420_v40, %v3270_v42 }
 0x5b7   : > { %v3268_v10 = vpop.xlane.xlu0 %3267  ;;  %p4628_p13 = pneg %p4627_p12 }
 0x5b8   : > { %v3296_v28 = vsub.f32 %v6425_v8, %v3268_v10  ;;  %4503 = vpow2.f32 %v3309_v16  ;;  %v3317_v57 = vmul.f32 1.442695, %v3297_v60 }
 0x5b9   : > { %v4164_v12 = vpop.f32.mrf.mxu1  ;;  %p4635_p3 = pnand %p4634_p2, %p4628_p13 }
 0x5ba   : > { %v3190_v18 = vadd.f32 %v4164_v12, %v6402_v35  ;;  %v3315_v21 = vmul.f32 1.442695, %v3296_v28 }
 0x5bb   : > { %v3184_v43 = vpop.f32.mrf.mxu1  ;;  %v3266_v20 = vpop.xlane.xlu0 %3265 }
 0x5bc   : > { %v3185_v55 = vadd.f32 %v3184_v43, %v6402_v35  ;;  %v6460_v13 = vsel %vm3240_vm2, %v3190_v18, -1e+30  ;;  %v3295_v61 = vsub.f32 %v6430_v23, %v3266_v20  ;;  %4505 = vpow2.f32 %v3315_v21 }
 0x5bd   : > { %3283 = vmax.xlane.f32.xlu0 %v6460_v13 }
 0x5be   : > { %v6463_v56 = vsel %vm3239_vm4, %v3185_v55, -1e+30  ;;  %v3313_v44 = vmul.f32 1.442695, %v3295_v61 }
 0x5bf   : > { %3281 = vmax.xlane.f32.xlu1 %v6463_v56  ;;  %v3272_v9 = vpop.xlane.xlu0 %3271 }
 0x5c0   : > { %v3298_v58 = vsub.f32 %v6434_v2, %v3272_v9  ;;  %4507 = vpow2.f32 %v3313_v44 }
 0x5c2   : > { %v3319_v25 = vmul.f32 1.442695, %v3298_v58 }
 0x5c3   : > { %v6488_v52 = vpop.eup %4501 }
 0x5c4   : > { %v3276_v51 = vpop.xlane.xlu0 %3275  ;;  %4509 = vpow2.f32 %v3319_v25 }
 0x5c5   : > { %v3300_v5 = vsub.f32 %v6440_v22, %v3276_v51  ;;  %4511 = vpow2.f32 %v3317_v57  ;;  %v6491_v37 = vpop.eup %4503 }
 0x5c6   : > { %v3274_v45 = vpop.xlane.xlu1 %3273 }
 0x5c7   : > { %v3299_v24 = vsub.f32 %v6443_v36, %v3274_v45  ;;  %v3323_v8 = vmul.f32 1.442695, %v3300_v5 }
 0x5c9   : > { %v3321_v15 = vmul.f32 1.442695, %v3299_v24  ;;  %4513 = vpow2.f32 %v3323_v8  ;;  %v6494_v33 = vpop.eup %4505 }
 0x5cb   : > { %4515 = vpow2.f32 %v3321_v15 }
 0x5e1   : > { %v4167_v41 = vpop.f32.mrf.mxu1 }
 0x5e2   : > { %v3200_v3 = vadd.f32 %v4167_v41, %v6402_v35 }
 0x5e3   : > { %v3194_v1 = vpop.f32.mrf.mxu1 }
 0x5e4   : > { %v3195_v19 = vadd.f32 %v3194_v1, %v6402_v35  ;;  %v6475_v50 = vsel %vm3242_vm5, %v3200_v3, -1e+30 }
 0x5e5   : > { %3287 = vmax.xlane.f32.xlu0 %v6475_v50 }
 0x5e6   : > { %v6479_v49 = vsel %vm3241_vm6, %v3195_v19, -1e+30 }
 0x5e7   : > { %3285 = vmax.xlane.f32.xlu1 %v6479_v49 }
 0x5e9   : > { %v4170_v17 = vpop.f32.mrf.mxu1 }
 0x5ea   : > { %v3210_v40 = vadd.f32 %v4170_v17, %v6402_v35 }
 0x5eb   : > { %v3204_v31 = vpop.f32.mrf.mxu1 }
 0x5ec   : > { %v3205_v27 = vadd.f32 %v3204_v31, %v6402_v35  ;;  %v3260_v23 = vsel %vm3244_vm7, %v3210_v40, -1e+30  ;;  %v6497_v35 = vpop.eup %4507 }
 0x5ed   : > { %3291 = vmax.xlane.f32.xlu0 %v3260_v23  ;;  %v6500_v30 = vpop.eup %4509 }
 0x5ee   : > { %v3259_v2 = vsel %vm3243_vm8, %v3205_v27, -1e+30  ;;  %v6503_v47 = vpop.eup %4511 }
 0x5ef   : > { %3289 = vmax.xlane.f32.xlu1 %v3259_v2  ;;  %v6506_v22 = vpop.eup %4513 }
 0x5f0   : > { %v6509_v36 = vpop.eup %4515 }
 0x5f1   : > { %3343 = vadd.xlane.f32.xlu0 %v6488_v52 }
 0x5f3   : > { %3341 = vadd.xlane.f32.xlu1 %v6491_v37 }
 0x5f5   : > { %3347 = vadd.xlane.f32.xlu0 %v6494_v33 }
 0x5f7   : > { %3345 = vadd.xlane.f32.xlu1 %v6497_v35 }
 0x5f9   : > { %3351 = vadd.xlane.f32.xlu0 %v6500_v30 }
 0x5fb   : > { %3349 = vadd.xlane.f32.xlu1 %v6503_v47 }
 0x5fd   : > { %3355 = vadd.xlane.f32.xlu0 %v6506_v22 }
 0x5ff   : > { %3353 = vadd.xlane.f32.xlu1 %v6509_v36 }
 0x605   : > { %v3280_v39 = vpop.xlane.xlu0 %3279 }
 0x606   : > { %v3302_v0 = vsub.f32 %v6450_v7, %v3280_v39 }
 0x607   : > { %v3278_v32 = vpop.xlane.xlu1 %3277 }
 0x608   : > { %v3327_v14 = vmul.f32 1.442695, %v3302_v0  ;;  %v3301_v34 = vsub.f32 %v6453_v26, %v3278_v32 }
 0x60a   : > { %4517 = vpow2.f32 %v3327_v14  ;;  %v3325_v59 = vmul.f32 1.442695, %v3301_v34 }
 0x60c   : > { %4519 = vpow2.f32 %v3325_v59 }
 0x617   : > { %v6514_v29 = vpop.eup %4517 }
 0x618   : > { %3359 = vadd.xlane.f32.xlu0 %v6514_v29 }
 0x619   : > { %v6517_v6 = vpop.eup %4519 }
 0x61a   : > { %3357 = vadd.xlane.f32.xlu1 %v6517_v6 }
 0x646   : > { %v3284_v12 = vpop.xlane.xlu0 %3283 }
 0x647   : > { %v3304_v18 = vsub.f32 %v6460_v13, %v3284_v12 }
 0x648   : > { %v3282_v43 = vpop.xlane.xlu1 %3281 }
 0x649   : > { %v3331_v7 = vmul.f32 1.442695, %v3304_v18  ;;  %v3303_v55 = vsub.f32 %v6463_v56, %v3282_v43 }
 0x64b   : > { %4521 = vpow2.f32 %v3331_v7  ;;  %v3329_v26 = vmul.f32 1.442695, %v3303_v55 }
 0x64d   : > { %4523 = vpow2.f32 %v3329_v26 }
 0x658   : > { %v6522_v54 = vpop.eup %4521 }
 0x659   : > { %3363 = vadd.xlane.f32.xlu0 %v6522_v54 }
 0x65a   : > { %v6525_v10 = vpop.eup %4523 }
 0x65b   : > { %3361 = vadd.xlane.f32.xlu1 %v6525_v10 }
 0x66e   : > { %v3288_v62 = vpop.xlane.xlu0 %3287 }
 0x66f   : > { %v3306_v20 = vsub.f32 %v6475_v50, %v3288_v62 }
 0x670   : > { %v3286_v63 = vpop.xlane.xlu1 %3285 }
 0x671   : > { %v3335_v13 = vmul.f32 1.442695, %v3306_v20  ;;  %v3305_v38 = vsub.f32 %v6479_v49, %v3286_v63 }
 0x673   : > { %4525 = vpow2.f32 %v3335_v13  ;;  %v3333_v56 = vmul.f32 1.442695, %v3305_v38 }
 0x675   : > { %4527 = vpow2.f32 %v3333_v56 }
 0x676   : > { %v3292_v9 = vpop.xlane.xlu0 %3291 }
 0x677   : > { %v3308_v53 = vsub.f32 %v3260_v23, %v3292_v9 }
 0x678   : > { %v3290_v46 = vpop.xlane.xlu1 %3289 }
 0x679   : > { %v3339_v28 = vmul.f32 1.442695, %v3308_v53  ;;  %v3307_v4 = vsub.f32 %v3259_v2, %v3290_v46 }
 0x67a   : > { %v3344_v16 = vpop.xlane.xlu0 %3343 }
 0x67b   : > { %4529 = vpow2.f32 %v3339_v28  ;;  %v3337_v61 = vmul.f32 1.442695, %v3307_v4 }
 0x67c   : > { %4531 = vrcp.f32 %v3344_v16  ;;  %v3342_v41 = vpop.xlane.xlu1 %3341 }
 0x67d   : > { %4533 = vpow2.f32 %v3337_v61 }
 0x67e   : > { %4535 = vrcp.f32 %v3342_v41  ;;  %v3348_v42 = vpop.xlane.xlu0 %3347 }
 0x67f   : > { %4537 = vrcp.f32 %v3348_v42 }
 0x680   : > { %v6530_v3 = vpop.eup %4525  ;;  %v3346_v21 = vpop.xlane.xlu1 %3345 }
 0x681   : > { %4539 = vrcp.f32 %v3346_v21  ;;  %3367 = vadd.xlane.f32.xlu0 %v6530_v3 }
 0x682   : > { %v6533_v58 = vpop.eup %4527  ;;  %v3352_v1 = vpop.xlane.xlu0 %3351 }
 0x683   : > { %4541 = vrcp.f32 %v3352_v1  ;;  %3365 = vadd.xlane.f32.xlu1 %v6533_v58 }
 0x684   : > { %v3350_v51 = vpop.xlane.xlu1 %3349 }
 0x685   : > { %4543 = vrcp.f32 %v3350_v51 }
 0x686   : > { %v3356_v19 = vpop.xlane.xlu0 %3355 }
 0x687   : > { %4545 = vrcp.f32 %v3356_v19 }
 0x688   : > { %v6539_v50 = vpop.eup %4529  ;;  %v3354_v60 = vpop.xlane.xlu1 %3353 }
 0x689   : > { %v4532_v44 = vpop.eup %4531  ;;  %4547 = vrcp.f32 %v3354_v60  ;;  %3371 = vadd.xlane.f32.xlu0 %v6539_v50 }
 0x68a   : > { %v6542_v45 = vpop.eup %4533  ;;  %v3406_v49 = vmul.f32 %v4532_v44, %v6488_v52 }
 0x68b   : > { %v4536_v48 = vpop.eup %4535  ;;  %3369 = vadd.xlane.f32.xlu1 %v6542_v45 }
 0x68c   : > { %v4538_v25 = vpop.eup %4537  ;;  %3422 = vst [vmem:[%s6546_s12 + $0x8] sm:$0xff] %v3406_v49  ;;  %v3405_v5 = vmul.f32 %v4536_v48, %v6491_v37 }
 0x68d   : > { %v3408_v11 = vmul.f32 %v4538_v25, %v6494_v33 }
 0x68e   : > { %v4540_v57 = vpop.eup %4539  ;;  %3421 = vst [vmem:[%s6546_s12] sm:$0xff] %v3405_v5 }
 0x68f   : > { %3424 = vst [vmem:[%s6546_s12 + $0x18] sm:$0xff] %v3408_v11  ;;  %v3407_v24 = vmul.f32 %v4540_v57, %v6497_v35 }
 0x690   : > { %v4542_v17 = vpop.eup %4541 }
 0x691   : > { %3423 = vst [vmem:[%s6546_s12 + $0x10] sm:$0xff] %v3407_v24  ;;  %v3410_v40 = vmul.f32 %v4542_v17, %v6500_v30 }
 0x692   : > { %v4544_v8 = vpop.eup %4543 }
 0x693   : > { %3426 = vst [vmem:[%s6546_s12 + $0x28] sm:$0xff] %v3410_v40  ;;  %v3409_v31 = vmul.f32 %v4544_v8, %v6503_v47 }
 0x694   : > { %v4546_v27 = vpop.eup %4545 }
 0x695   : > { %3425 = vst [vmem:[%s6546_s12 + $0x20] sm:$0xff] %v3409_v31  ;;  %v3412_v23 = vmul.f32 %v4546_v27, %v6506_v22 }
 0x696   : > { %v4548_v15 = vpop.eup %4547 }
 0x697   : > { %3428 = vst [vmem:[%s6546_s12 + $0x38] sm:$0xff] %v3412_v23  ;;  %v3411_v2 = vmul.f32 %v4548_v15, %v6509_v36 }
 0x699   : > { %3427 = vst [vmem:[%s6546_s12 + $0x30] sm:$0xff] %v3411_v2 }
 0x6a1   : > { %v3360_v52 = vpop.xlane.xlu0 %3359 }
 0x6a2   : > { %4549 = vrcp.f32 %v3360_v52 }
 0x6a3   : > { %v3358_v37 = vpop.xlane.xlu1 %3357 }
 0x6a4   : > { %4551 = vrcp.f32 %v3358_v37 }
 0x6af   : > { %v4550_v33 = vpop.eup %4549 }
 0x6b0   : > { %v3414_v35 = vmul.f32 %v4550_v33, %v6514_v29 }
 0x6b1   : > { %v4552_v30 = vpop.eup %4551 }
 0x6b2   : > { %3430 = vst [vmem:[%s6546_s12 + $0x48] sm:$0xff] %v3414_v35  ;;  %v3413_v47 = vmul.f32 %v4552_v30, %v6517_v6 }
 0x6b4   : > { %3429 = vst [vmem:[%s6546_s12 + $0x40] sm:$0xff] %v3413_v47 }
 0x6e2   : > { %v3364_v22 = vpop.xlane.xlu0 %3363 }
 0x6e3   : > { %4553 = vrcp.f32 %v3364_v22 }
 0x6e4   : > { %v3362_v39 = vpop.xlane.xlu1 %3361 }
 0x6e5   : > { %4555 = vrcp.f32 %v3362_v39 }
 0x6f0   : > { %v4554_v36 = vpop.eup %4553 }
 0x6f1   : > { %v3416_v0 = vmul.f32 %v4554_v36, %v6522_v54 }
 0x6f2   : > { %v4556_v32 = vpop.eup %4555 }
 0x6f3   : > { %3432 = vst [vmem:[%s6546_s12 + $0x58] sm:$0xff] %v3416_v0  ;;  %v3415_v14 = vmul.f32 %v4556_v32, %v6525_v10 }
 0x6f5   : > { %3431 = vst [vmem:[%s6546_s12 + $0x50] sm:$0xff] %v3415_v14 }
 0x70a   : > { %v3368_v34 = vpop.xlane.xlu0 %3367 }
 0x70b   : > { %4557 = vrcp.f32 %v3368_v34 }
 0x70c   : > { %v3366_v59 = vpop.xlane.xlu1 %3365 }
 0x70d   : > { %4559 = vrcp.f32 %v3366_v59 }
 0x712   : > { %v3372_v29 = vpop.xlane.xlu0 %3371 }
 0x713   : > { %4561 = vrcp.f32 %v3372_v29 }
 0x714   : > { %v3370_v6 = vpop.xlane.xlu1 %3369 }
 0x715   : > { %4563 = vrcp.f32 %v3370_v6 }
 0x718   : > { %v4558_v12 = vpop.eup %4557 }
 0x719   : > { %v3418_v18 = vmul.f32 %v4558_v12, %v6530_v3 }
 0x71a   : > { %v4560_v43 = vpop.eup %4559 }
 0x71b   : > { %3434 = vst [vmem:[%s6546_s12 + $0x68] sm:$0xff] %v3418_v18  ;;  %v3417_v7 = vmul.f32 %v4560_v43, %v6533_v58 }
 0x71d   : > { %3433 = vst [vmem:[%s6546_s12 + $0x60] sm:$0xff] %v3417_v7 }
 0x720   : > { %v4562_v55 = vpop.eup %4561 }
 0x721   : > { %v3420_v26 = vmul.f32 %v4562_v55, %v6539_v50 }
 0x722   : > { %v4564_v54 = vpop.eup %4563 }
 0x723   : > { %3436 = vst [vmem:[%s6546_s12 + $0x78] sm:$0xff] %v3420_v26  ;;  %v3419_v10 = vmul.f32 %v4564_v54, %v6542_v45 }
 0x725   : > { %3435 = vst [vmem:[%s6546_s12 + $0x70] sm:$0xff] %v3419_v10 }
 0x726   : > { %4638 = shalt.err (!%p4635_p3)
}
 0x727   : > { %s4639_s26 = scalar_lea.hbm %s6581_s21, 2048  ;;  %s4643_s20 = scalar_lea.hbm %s6640_s10, 4096 }
 0x728   : > { %p4640_p4 = scmp.ne.s32.totalorder %s6581_s21, %s4639_s26  ;;  %p4644_p9 = scmp.lt.s32.totalorder %s6581_s21, %s6640_s10 }
 0x729   : > { %p4645_p10 = scmp.lt.s32.totalorder %s4643_s20, %s4639_s26 }
 0x72a   : > { %p4641_p7 = pnand %p4640_p4, %p4795_p5 }
 0x72b   : > { %p4646_p11 = por %p4645_p10, %p4644_p9 }
 0x72c   : > { %p4642_p8 = pneg %p4641_p7 }
 0x72e   : > { %p4647_p12 = pnand %p4646_p11, %p4642_p8 }
 0x730   : > { %4650 = shalt.err (!%p4647_p12)
}
 0x731   : > { %s4700_s25 = smov 128   ;;  %s4701_s11 = smov 8  }
 0x732   : > { %4187 = dma.vmem_to_hbm [thread:$0]  (%p4795_p5), %s6583_s18, 2048, %s6581_s21, %s6590_s17, %s4700_s25, %s4700_s25, %s4701_s11  }
 0x733 PF: > { %p4193_p13 = scmp.ge.s32.totalorder %s4685_s16, 2  ;;  %s3466_s30 = sand.u32 1, %s4673_s13  }
 0x734   : > { %s3467_s26 = scalar_lea.sflag [#allocation3], %s3466_s30 }
 0x735   : > { %p4190_p0 = pnand %p4193_p13, %p4799_p6 }
 0x737   : > { %p4191_p1 = pneg %p4190_p0 }
 0x739   : > { %4668 = dma.done.wait (%p4191_p1), %s3467_s26, 2048  }
 0x73a   : > { %4670 = vsyncadd (%p4191_p1), %s3467_s26, 4294965248  ;;  %p20_p2 = scmp.ge.s32.totalorder %s4782_s19, 4   ;;  %s6801_s13 = smov %s4677_s14 }
 0x73b   : > { %s6802_s14 = smov %s4681_s15  ;;  %s6803_s15 = smov %s4793_s22 }
 0x73c   : > { %s6804_s16 = smov %s4782_s19  ;;  %22 = sbr.rel (!%p20_p2) target bundleno = 3 (0x3), region = 101 }
 0x741   :  { %3472 = vsyncpa [#allocation3], 1 }
 0x742   :  { %3474 = vsyncpa [#allocation3 + $0x1], 1 }

</bundles_post_ra>
